<compile_context>
chip_gen: v6e
topology: v6e:2x2x1
jax: 0.10.0
libtpu: 0.0.40
codegen_flags: <defaults>
</compile_context>

<pallas_src>
import jax
import jax.numpy as jnp
from jax.experimental import pallas as pl
from jax.experimental.pallas import tpu as pltpu


_VMEM_SPEC = pl.BlockSpec(memory_space=pltpu.MemorySpace.VMEM)


# ----------------------------------------------------------------------------
# Fused Pallas kernel
# ----------------------------------------------------------------------------
def _make_fused_kernel(T, B, H, num_layers):
    """Builds the fused StockPredictor forward kernel.

    Input refs (in order):
      bert_x  : (B, T, E_b)
      price_x : (B, T, E_p)
      for each bert layer l : Wx_l (D_in, 4H), Wh_l (H, 4H), b_l (1, 4H)
      for each price layer l: Wx_l, Wh_l, b_l
      head: w1 (2H, 64), b1 (1, 64), w2 (64, 32), b2 (1, 32), w3 (32, 1), b3 (1, 1)
    Output ref: (B, 1)
    Gate order (PyTorch): i, f, g, o.
    """

    def lstm_stack(x_all, layer_ws):
        # x_all: (B, T, D_in) f32. Static (fully unrolled) loops over layers/T.
        xs = [x_all[:, t, :] for t in range(T)]            # T x (B, D_in)
        h = jnp.zeros((B, H), jnp.float32)
        for (wx_ref, wh_ref, b_ref) in layer_ws:
            Wx = wx_ref[...]                                # (D_in, 4H)  hoisted
            Wh = wh_ref[...]                                # (H, 4H)     hoisted
            bv = b_ref[...]                                 # (1, 4H)     hoisted
            # Input projection + bias for ALL timesteps in one matmul
            # (off the serial recurrence critical path).
            x_cat = jnp.concatenate(xs, axis=0)             # (T*B, D_in)
            gx = jnp.dot(x_cat, Wx, preferred_element_type=jnp.float32) + bv
            h = jnp.zeros((B, H), jnp.float32)
            c = jnp.zeros((B, H), jnp.float32)
            outs = []
            for t in range(T):
                gates = gx[t * B:(t + 1) * B, :] + jnp.dot(
                    h, Wh, preferred_element_type=jnp.float32)   # (B, 4H)
                i_g = jax.nn.sigmoid(gates[:, 0 * H:1 * H])
                f_g = jax.nn.sigmoid(gates[:, 1 * H:2 * H])
                g_g = jnp.tanh(gates[:, 2 * H:3 * H])
                o_g = jax.nn.sigmoid(gates[:, 3 * H:4 * H])
                c = f_g * c + i_g * g_g
                h = o_g * jnp.tanh(c)
                outs.append(h)
            xs = outs      # next layer's inputs stay VMEM/vreg resident
        return h           # last timestep hidden of last layer, (B, H)

    def kernel(*refs):
        bert_ref, price_ref = refs[0], refs[1]
        o_ref = refs[-1]
        wrefs = refs[2:-1]
        per_stack = 3 * num_layers
        bert_ws = [tuple(wrefs[3 * l:3 * l + 3]) for l in range(num_layers)]
        price_ws = [tuple(wrefs[per_stack + 3 * l:per_stack + 3 * l + 3])
                    for l in range(num_layers)]
        w1, b1, w2, b2, w3, b3 = wrefs[2 * per_stack:2 * per_stack + 6]

        hb = lstm_stack(bert_ref[...].astype(jnp.float32), bert_ws)    # (B, H)
        hp = lstm_stack(price_ref[...].astype(jnp.float32), price_ws)  # (B, H)

        # Head: Linear(2H,64)+ReLU -> Linear(64,32)+ReLU -> Linear(32,1).
        # Split W1 by rows (aligned sublane slice) instead of lane-concat(hb,hp).
        W1 = w1[...]
        h1 = jnp.maximum(
            jnp.dot(hb, W1[:H, :], preferred_element_type=jnp.float32)
            + jnp.dot(hp, W1[H:, :], preferred_element_type=jnp.float32)
            + b1[...], 0.0)
        h2 = jnp.maximum(
            jnp.dot(h1, w2[...], preferred_element_type=jnp.float32)
            + b2[...], 0.0)
        o_ref[...] = (jnp.dot(h2, w3[...], preferred_element_type=jnp.float32)
                      + b3[...])

    return kernel


# ----------------------------------------------------------------------------
# Parameter packing (done once, outside the forward path)
# ----------------------------------------------------------------------------
def pack_params(params):
    def pack_lstm(layers):
        packed = []
        for (w_ih, w_hh, b_ih, b_hh) in layers:
            packed.append((
                jnp.asarray(w_ih, jnp.float32).T,                 # (D_in, 4H)
                jnp.asarray(w_hh, jnp.float32).T,                 # (H, 4H)
                (b_ih + b_hh).reshape(1, -1).astype(jnp.float32),  # (1, 4H)
            ))
        return packed

    def pack_linear(wb):
        w, b = wb
        return (jnp.asarray(w, jnp.float32).T,
                b.reshape(1, -1).astype(jnp.float32))

    return {
        "lstm_bert": pack_lstm(params["lstm_bert"]),
        "lstm_price": pack_lstm(params["lstm_price"]),
        "head": tuple(pack_linear(wb) for wb in params["head"]),
    }


# ----------------------------------------------------------------------------
# Forward wrapper: a single pallas_call
# ----------------------------------------------------------------------------
def stock_predictor_forward(bert_x, price_x, packed):
    B, T, _ = bert_x.shape
    bert_layers = packed["lstm_bert"]
    price_layers = packed["lstm_price"]
    (w1, b1), (w2, b2), (w3, b3) = packed["head"]
    num_layers = len(bert_layers)
    H = bert_layers[0][1].shape[0]

    flat = []
    for lyr in bert_layers + price_layers:
        flat.extend(lyr)
    flat.extend([w1, b1, w2, b2, w3, b3])

    kernel = _make_fused_kernel(T=T, B=B, H=H, num_layers=num_layers)
    return pl.pallas_call(
        kernel,
        out_shape=jax.ShapeDtypeStruct((B, 1), jnp.float32),
        in_specs=[_VMEM_SPEC] * (2 + len(flat)),
        out_specs=_VMEM_SPEC,
    )(bert_x.astype(jnp.float32), price_x.astype(jnp.float32), *flat)


# ----------------------------------------------------------------------------
# Deterministic parameter initialization (PyTorch-like uniform ranges)
# ----------------------------------------------------------------------------
def init_lstm_params(key, input_dim, hidden_dim, num_layers):
    layers = []
    k = 1.0 / jnp.sqrt(hidden_dim)
    for layer in range(num_layers):
        d_in = input_dim if layer == 0 else hidden_dim
        key, k1, k2, k3, k4 = jax.random.split(key, 5)
        w_ih = jax.random.uniform(k1, (4 * hidden_dim, d_in), jnp.float32, -k, k)
        w_hh = jax.random.uniform(k2, (4 * hidden_dim, hidden_dim), jnp.float32, -k, k)
        b_ih = jax.random.uniform(k3, (4 * hidden_dim,), jnp.float32, -k, k)
        b_hh = jax.random.uniform(k4, (4 * hidden_dim,), jnp.float32, -k, k)
        layers.append((w_ih, w_hh, b_ih, b_hh))
    return layers, key


def init_linear(key, in_dim, out_dim):
    k = 1.0 / jnp.sqrt(in_dim)
    key, k1, k2 = jax.random.split(key, 3)
    w = jax.random.uniform(k1, (out_dim, in_dim), jnp.float32, -k, k)
    b = jax.random.uniform(k2, (out_dim,), jnp.float32, -k, k)
    return (w, b), key


def init_params(key, embedding_dim, price_dim, hidden_dim, num_layers):
    lstm_bert, key = init_lstm_params(key, embedding_dim, hidden_dim, num_layers)
    lstm_price, key = init_lstm_params(key, price_dim, hidden_dim, num_layers)
    l1, key = init_linear(key, hidden_dim * 2, 64)
    l2, key = init_linear(key, 64, 32)
    l3, key = init_linear(key, 32, 1)
    return {"lstm_bert": lstm_bert, "lstm_price": lstm_price, "head": (l1, l2, l3)}


# ----------------------------------------------------------------------------
# Pure-JAX reference (numerical sanity check)
# ----------------------------------------------------------------------------
def _ref_lstm_stack(x, layer_params):
    B, T, _ = x.shape
    y = x
    for (w_ih, w_hh, b_ih, b_hh) in layer_params:
        H = w_hh.shape[1]
        h = jnp.zeros((B, H), jnp.float32)
        c = jnp.zeros((B, H), jnp.float32)
        outs = []
        for t in range(T):
            gates = y[:, t, :] @ w_ih.T + h @ w_hh.T + b_ih + b_hh
            i = jax.nn.sigmoid(gates[:, 0 * H:1 * H])
            f = jax.nn.sigmoid(gates[:, 1 * H:2 * H])
            g = jnp.tanh(gates[:, 2 * H:3 * H])
            o = jax.nn.sigmoid(gates[:, 3 * H:4 * H])
            c = f * c + i * g
            h = o * jnp.tanh(c)
            outs.append(h)
        y = jnp.stack(outs, axis=1)
    return y


def _ref_forward(bert_x, price_x, params):
    ob = _ref_lstm_stack(bert_x, params["lstm_bert"])[:, -1, :]
    op = _ref_lstm_stack(price_x, params["lstm_price"])[:, -1, :]
    z = jnp.concatenate([ob, op], axis=1)
    (w1, b1), (w2, b2), (w3, b3) = params["head"]
    z = jnp.maximum(z @ w1.T + b1, 0.0)
    z = jnp.maximum(z @ w2.T + b2, 0.0)
    return z @ w3.T + b3


# ----------------------------------------------------------------------------
if __name__ == "__main__":
    B, T = 2, 8
    embedding_dim, price_dim, hidden_dim, num_layers = 16, 8, 32, 2

    key = jax.random.PRNGKey(0)
    key, kb, kp = jax.random.split(key, 3)
    bert_x = jax.random.normal(kb, (B, T, embedding_dim), jnp.float32)
    price_x = jax.random.normal(kp, (B, T, price_dim), jnp.float32)

    params = init_params(key, embedding_dim, price_dim, hidden_dim, num_layers)
    packed = pack_params(params)   # one-time weight packing

    out = stock_predictor_forward(bert_x, price_x, packed)
    out = jax.block_until_ready(out)
    assert out.shape == (B, 1), out.shape

    ref = _ref_forward(bert_x, price_x, params)
    assert jnp.allclose(out, ref, atol=1e-4, rtol=1e-4), (out, ref)

    print("KERNEL_OK")
</pallas_src>

<mosaic_0001>
module attributes {stable_mosaic.version = 11 : i64} {
  func.func @kernel(%arg0: memref<2x8x16xf32, #tpu.memory_space<vmem>>, %arg1: memref<2x8x8xf32, #tpu.memory_space<vmem>>, %arg2: memref<16x128xf32, #tpu.memory_space<vmem>>, %arg3: memref<32x128xf32, #tpu.memory_space<vmem>>, %arg4: memref<1x128xf32, #tpu.memory_space<vmem>>, %arg5: memref<32x128xf32, #tpu.memory_space<vmem>>, %arg6: memref<32x128xf32, #tpu.memory_space<vmem>>, %arg7: memref<1x128xf32, #tpu.memory_space<vmem>>, %arg8: memref<8x128xf32, #tpu.memory_space<vmem>>, %arg9: memref<32x128xf32, #tpu.memory_space<vmem>>, %arg10: memref<1x128xf32, #tpu.memory_space<vmem>>, %arg11: memref<32x128xf32, #tpu.memory_space<vmem>>, %arg12: memref<32x128xf32, #tpu.memory_space<vmem>>, %arg13: memref<1x128xf32, #tpu.memory_space<vmem>>, %arg14: memref<64x64xf32, #tpu.memory_space<vmem>>, %arg15: memref<1x64xf32, #tpu.memory_space<vmem>>, %arg16: memref<64x32xf32, #tpu.memory_space<vmem>>, %arg17: memref<1x32xf32, #tpu.memory_space<vmem>>, %arg18: memref<32x1xf32, #tpu.memory_space<vmem>>, %arg19: memref<1x1xf32, #tpu.memory_space<vmem>>, %arg20: memref<2x1xf32, #tpu.memory_space<vmem>>) attributes {dimension_semantics = [], scalar_prefetch = 0 : i64, scratch_operands = 0 : i64, tpu.core_type = #tpu.core_type<tc>} {
    %c0 = arith.constant 0 : index
    %c0_0 = arith.constant 0 : index
    %c0_1 = arith.constant 0 : index
    %0 = vector.load %arg0[%c0, %c0_0, %c0_1] : memref<2x8x16xf32, #tpu.memory_space<vmem>>, vector<2x8x16xf32>
    %1 = vector.extract_strided_slice %0 {offsets = [0, 0, 0], sizes = [2, 1, 16], strides = [1, 1, 1]} : vector<2x8x16xf32> to vector<2x1x16xf32>
    %2 = vector.shape_cast %1 : vector<2x1x16xf32> to vector<2x16xf32>
    %3 = vector.extract_strided_slice %0 {offsets = [0, 1, 0], sizes = [2, 1, 16], strides = [1, 1, 1]} : vector<2x8x16xf32> to vector<2x1x16xf32>
    %4 = vector.shape_cast %3 : vector<2x1x16xf32> to vector<2x16xf32>
    %5 = vector.extract_strided_slice %0 {offsets = [0, 2, 0], sizes = [2, 1, 16], strides = [1, 1, 1]} : vector<2x8x16xf32> to vector<2x1x16xf32>
    %6 = vector.shape_cast %5 : vector<2x1x16xf32> to vector<2x16xf32>
    %7 = vector.extract_strided_slice %0 {offsets = [0, 3, 0], sizes = [2, 1, 16], strides = [1, 1, 1]} : vector<2x8x16xf32> to vector<2x1x16xf32>
    %8 = vector.shape_cast %7 : vector<2x1x16xf32> to vector<2x16xf32>
    %9 = vector.extract_strided_slice %0 {offsets = [0, 4, 0], sizes = [2, 1, 16], strides = [1, 1, 1]} : vector<2x8x16xf32> to vector<2x1x16xf32>
    %10 = vector.shape_cast %9 : vector<2x1x16xf32> to vector<2x16xf32>
    %11 = vector.extract_strided_slice %0 {offsets = [0, 5, 0], sizes = [2, 1, 16], strides = [1, 1, 1]} : vector<2x8x16xf32> to vector<2x1x16xf32>
    %12 = vector.shape_cast %11 : vector<2x1x16xf32> to vector<2x16xf32>
    %13 = vector.extract_strided_slice %0 {offsets = [0, 6, 0], sizes = [2, 1, 16], strides = [1, 1, 1]} : vector<2x8x16xf32> to vector<2x1x16xf32>
    %14 = vector.shape_cast %13 : vector<2x1x16xf32> to vector<2x16xf32>
    %15 = vector.extract_strided_slice %0 {offsets = [0, 7, 0], sizes = [2, 1, 16], strides = [1, 1, 1]} : vector<2x8x16xf32> to vector<2x1x16xf32>
    %16 = vector.shape_cast %15 : vector<2x1x16xf32> to vector<2x16xf32>
    %c0_2 = arith.constant 0 : index
    %c0_3 = arith.constant 0 : index
    %17 = vector.load %arg2[%c0_2, %c0_3] : memref<16x128xf32, #tpu.memory_space<vmem>>, vector<16x128xf32>
    %c0_4 = arith.constant 0 : index
    %c0_5 = arith.constant 0 : index
    %18 = vector.load %arg3[%c0_4, %c0_5] : memref<32x128xf32, #tpu.memory_space<vmem>>, vector<32x128xf32>
    %c0_6 = arith.constant 0 : index
    %c0_7 = arith.constant 0 : index
    %19 = vector.load %arg4[%c0_6, %c0_7] : memref<1x128xf32, #tpu.memory_space<vmem>>, vector<1x128xf32>
    %20 = tpu.concatenate %2, %4, %6, %8, %10, %12, %14, %16 in 0 : vector<2x16xf32>, vector<2x16xf32>, vector<2x16xf32>, vector<2x16xf32>, vector<2x16xf32>, vector<2x16xf32>, vector<2x16xf32>, vector<2x16xf32> -> vector<16x16xf32>
    %cst = arith.constant dense<0.000000e+00> : vector<16x128xf32>
    %21 = tpu.matmul %20, %17, %cst {dimension_numbers = #tpu.dot_dimension_numbers<[1], [0], [0], [1], [0, 0, 1, 1], [], []>} : vector<16x16xf32>, vector<16x128xf32>, vector<16x128xf32> -> vector<16x128xf32>
    %22 = vector.broadcast %19 : vector<1x128xf32> to vector<16x128xf32>
    %23 = arith.addf %21, %22 : vector<16x128xf32>
    %cst_8 = arith.constant 0.000000e+00 : f32
    %24 = vector.broadcast %cst_8 : f32 to vector<2x32xf32>
    %cst_9 = arith.constant 0.000000e+00 : f32
    %25 = vector.broadcast %cst_9 : f32 to vector<2x32xf32>
    %26 = vector.extract_strided_slice %23 {offsets = [0, 0], sizes = [2, 128], strides = [1, 1]} : vector<16x128xf32> to vector<2x128xf32>
    %cst_10 = arith.constant dense<0.000000e+00> : vector<2x128xf32>
    %27 = tpu.matmul %24, %18, %cst_10 {dimension_numbers = #tpu.dot_dimension_numbers<[1], [0], [0], [1], [0, 0, 1, 1], [], []>} : vector<2x32xf32>, vector<32x128xf32>, vector<2x128xf32> -> vector<2x128xf32>
    %28 = arith.addf %26, %27 : vector<2x128xf32>
    %29 = vector.extract_strided_slice %28 {offsets = [0, 0], sizes = [2, 32], strides = [1, 1]} : vector<2x128xf32> to vector<2x32xf32>
    %30 = arith.negf %29 : vector<2x32xf32>
    %31 = math.exp %30 : vector<2x32xf32>
    %cst_11 = arith.constant 1.000000e+00 : f32
    %32 = vector.broadcast %cst_11 : f32 to vector<2x32xf32>
    %33 = arith.addf %32, %31 : vector<2x32xf32>
    %34 = arith.divf %32, %33 : vector<2x32xf32>
    %35 = vector.extract_strided_slice %28 {offsets = [0, 32], sizes = [2, 32], strides = [1, 1]} : vector<2x128xf32> to vector<2x32xf32>
    %36 = arith.negf %35 : vector<2x32xf32>
    %37 = math.exp %36 : vector<2x32xf32>
    %cst_12 = arith.constant 1.000000e+00 : f32
    %38 = vector.broadcast %cst_12 : f32 to vector<2x32xf32>
    %39 = arith.addf %38, %37 : vector<2x32xf32>
    %40 = arith.divf %38, %39 : vector<2x32xf32>
    %41 = vector.extract_strided_slice %28 {offsets = [0, 64], sizes = [2, 32], strides = [1, 1]} : vector<2x128xf32> to vector<2x32xf32>
    %42 = math.tanh %41 : vector<2x32xf32>
    %43 = vector.extract_strided_slice %28 {offsets = [0, 96], sizes = [2, 32], strides = [1, 1]} : vector<2x128xf32> to vector<2x32xf32>
    %44 = arith.negf %43 : vector<2x32xf32>
    %45 = math.exp %44 : vector<2x32xf32>
    %cst_13 = arith.constant 1.000000e+00 : f32
    %46 = vector.broadcast %cst_13 : f32 to vector<2x32xf32>
    %47 = arith.addf %46, %45 : vector<2x32xf32>
    %48 = arith.divf %46, %47 : vector<2x32xf32>
    %49 = arith.mulf %40, %25 : vector<2x32xf32>
    %50 = arith.mulf %34, %42 : vector<2x32xf32>
    %51 = arith.addf %49, %50 : vector<2x32xf32>
    %52 = math.tanh %51 : vector<2x32xf32>
    %53 = arith.mulf %48, %52 : vector<2x32xf32>
    %54 = vector.extract_strided_slice %23 {offsets = [2, 0], sizes = [2, 128], strides = [1, 1]} : vector<16x128xf32> to vector<2x128xf32>
    %cst_14 = arith.constant dense<0.000000e+00> : vector<2x128xf32>
    %55 = tpu.matmul %53, %18, %cst_14 {dimension_numbers = #tpu.dot_dimension_numbers<[1], [0], [0], [1], [0, 0, 1, 1], [], []>} : vector<2x32xf32>, vector<32x128xf32>, vector<2x128xf32> -> vector<2x128xf32>
    %56 = arith.addf %54, %55 : vector<2x128xf32>
    %57 = vector.extract_strided_slice %56 {offsets = [0, 0], sizes = [2, 32], strides = [1, 1]} : vector<2x128xf32> to vector<2x32xf32>
    %58 = arith.negf %57 : vector<2x32xf32>
    %59 = math.exp %58 : vector<2x32xf32>
    %cst_15 = arith.constant 1.000000e+00 : f32
    %60 = vector.broadcast %cst_15 : f32 to vector<2x32xf32>
    %61 = arith.addf %60, %59 : vector<2x32xf32>
    %62 = arith.divf %60, %61 : vector<2x32xf32>
    %63 = vector.extract_strided_slice %56 {offsets = [0, 32], sizes = [2, 32], strides = [1, 1]} : vector<2x128xf32> to vector<2x32xf32>
    %64 = arith.negf %63 : vector<2x32xf32>
    %65 = math.exp %64 : vector<2x32xf32>
    %cst_16 = arith.constant 1.000000e+00 : f32
    %66 = vector.broadcast %cst_16 : f32 to vector<2x32xf32>
    %67 = arith.addf %66, %65 : vector<2x32xf32>
    %68 = arith.divf %66, %67 : vector<2x32xf32>
    %69 = vector.extract_strided_slice %56 {offsets = [0, 64], sizes = [2, 32], strides = [1, 1]} : vector<2x128xf32> to vector<2x32xf32>
    %70 = math.tanh %69 : vector<2x32xf32>
    %71 = vector.extract_strided_slice %56 {offsets = [0, 96], sizes = [2, 32], strides = [1, 1]} : vector<2x128xf32> to vector<2x32xf32>
    %72 = arith.negf %71 : vector<2x32xf32>
    %73 = math.exp %72 : vector<2x32xf32>
    %cst_17 = arith.constant 1.000000e+00 : f32
    %74 = vector.broadcast %cst_17 : f32 to vector<2x32xf32>
    %75 = arith.addf %74, %73 : vector<2x32xf32>
    %76 = arith.divf %74, %75 : vector<2x32xf32>
    %77 = arith.mulf %68, %51 : vector<2x32xf32>
    %78 = arith.mulf %62, %70 : vector<2x32xf32>
    %79 = arith.addf %77, %78 : vector<2x32xf32>
    %80 = math.tanh %79 : vector<2x32xf32>
    %81 = arith.mulf %76, %80 : vector<2x32xf32>
    %82 = vector.extract_strided_slice %23 {offsets = [4, 0], sizes = [2, 128], strides = [1, 1]} : vector<16x128xf32> to vector<2x128xf32>
    %cst_18 = arith.constant dense<0.000000e+00> : vector<2x128xf32>
    %83 = tpu.matmul %81, %18, %cst_18 {dimension_numbers = #tpu.dot_dimension_numbers<[1], [0], [0], [1], [0, 0, 1, 1], [], []>} : vector<2x32xf32>, vector<32x128xf32>, vector<2x128xf32> -> vector<2x128xf32>
    %84 = arith.addf %82, %83 : vector<2x128xf32>
    %85 = vector.extract_strided_slice %84 {offsets = [0, 0], sizes = [2, 32], strides = [1, 1]} : vector<2x128xf32> to vector<2x32xf32>
    %86 = arith.negf %85 : vector<2x32xf32>
    %87 = math.exp %86 : vector<2x32xf32>
    %cst_19 = arith.constant 1.000000e+00 : f32
    %88 = vector.broadcast %cst_19 : f32 to vector<2x32xf32>
    %89 = arith.addf %88, %87 : vector<2x32xf32>
    %90 = arith.divf %88, %89 : vector<2x32xf32>
    %91 = vector.extract_strided_slice %84 {offsets = [0, 32], sizes = [2, 32], strides = [1, 1]} : vector<2x128xf32> to vector<2x32xf32>
    %92 = arith.negf %91 : vector<2x32xf32>
    %93 = math.exp %92 : vector<2x32xf32>
    %cst_20 = arith.constant 1.000000e+00 : f32
    %94 = vector.broadcast %cst_20 : f32 to vector<2x32xf32>
    %95 = arith.addf %94, %93 : vector<2x32xf32>
    %96 = arith.divf %94, %95 : vector<2x32xf32>
    %97 = vector.extract_strided_slice %84 {offsets = [0, 64], sizes = [2, 32], strides = [1, 1]} : vector<2x128xf32> to vector<2x32xf32>
    %98 = math.tanh %97 : vector<2x32xf32>
    %99 = vector.extract_strided_slice %84 {offsets = [0, 96], sizes = [2, 32], strides = [1, 1]} : vector<2x128xf32> to vector<2x32xf32>
    %100 = arith.negf %99 : vector<2x32xf32>
    %101 = math.exp %100 : vector<2x32xf32>
    %cst_21 = arith.constant 1.000000e+00 : f32
    %102 = vector.broadcast %cst_21 : f32 to vector<2x32xf32>
    %103 = arith.addf %102, %101 : vector<2x32xf32>
    %104 = arith.divf %102, %103 : vector<2x32xf32>
    %105 = arith.mulf %96, %79 : vector<2x32xf32>
    %106 = arith.mulf %90, %98 : vector<2x32xf32>
    %107 = arith.addf %105, %106 : vector<2x32xf32>
    %108 = math.tanh %107 : vector<2x32xf32>
    %109 = arith.mulf %104, %108 : vector<2x32xf32>
    %110 = vector.extract_strided_slice %23 {offsets = [6, 0], sizes = [2, 128], strides = [1, 1]} : vector<16x128xf32> to vector<2x128xf32>
    %cst_22 = arith.constant dense<0.000000e+00> : vector<2x128xf32>
    %111 = tpu.matmul %109, %18, %cst_22 {dimension_numbers = #tpu.dot_dimension_numbers<[1], [0], [0], [1], [0, 0, 1, 1], [], []>} : vector<2x32xf32>, vector<32x128xf32>, vector<2x128xf32> -> vector<2x128xf32>
    %112 = arith.addf %110, %111 : vector<2x128xf32>
    %113 = vector.extract_strided_slice %112 {offsets = [0, 0], sizes = [2, 32], strides = [1, 1]} : vector<2x128xf32> to vector<2x32xf32>
    %114 = arith.negf %113 : vector<2x32xf32>
    %115 = math.exp %114 : vector<2x32xf32>
    %cst_23 = arith.constant 1.000000e+00 : f32
    %116 = vector.broadcast %cst_23 : f32 to vector<2x32xf32>
    %117 = arith.addf %116, %115 : vector<2x32xf32>
    %118 = arith.divf %116, %117 : vector<2x32xf32>
    %119 = vector.extract_strided_slice %112 {offsets = [0, 32], sizes = [2, 32], strides = [1, 1]} : vector<2x128xf32> to vector<2x32xf32>
    %120 = arith.negf %119 : vector<2x32xf32>
    %121 = math.exp %120 : vector<2x32xf32>
    %cst_24 = arith.constant 1.000000e+00 : f32
    %122 = vector.broadcast %cst_24 : f32 to vector<2x32xf32>
    %123 = arith.addf %122, %121 : vector<2x32xf32>
    %124 = arith.divf %122, %123 : vector<2x32xf32>
    %125 = vector.extract_strided_slice %112 {offsets = [0, 64], sizes = [2, 32], strides = [1, 1]} : vector<2x128xf32> to vector<2x32xf32>
    %126 = math.tanh %125 : vector<2x32xf32>
    %127 = vector.extract_strided_slice %112 {offsets = [0, 96], sizes = [2, 32], strides = [1, 1]} : vector<2x128xf32> to vector<2x32xf32>
    %128 = arith.negf %127 : vector<2x32xf32>
    %129 = math.exp %128 : vector<2x32xf32>
    %cst_25 = arith.constant 1.000000e+00 : f32
    %130 = vector.broadcast %cst_25 : f32 to vector<2x32xf32>
    %131 = arith.addf %130, %129 : vector<2x32xf32>
    %132 = arith.divf %130, %131 : vector<2x32xf32>
    %133 = arith.mulf %124, %107 : vector<2x32xf32>
    %134 = arith.mulf %118, %126 : vector<2x32xf32>
    %135 = arith.addf %133, %134 : vector<2x32xf32>
    %136 = math.tanh %135 : vector<2x32xf32>
    %137 = arith.mulf %132, %136 : vector<2x32xf32>
    %138 = vector.extract_strided_slice %23 {offsets = [8, 0], sizes = [2, 128], strides = [1, 1]} : vector<16x128xf32> to vector<2x128xf32>
    %cst_26 = arith.constant dense<0.000000e+00> : vector<2x128xf32>
    %139 = tpu.matmul %137, %18, %cst_26 {dimension_numbers = #tpu.dot_dimension_numbers<[1], [0], [0], [1], [0, 0, 1, 1], [], []>} : vector<2x32xf32>, vector<32x128xf32>, vector<2x128xf32> -> vector<2x128xf32>
    %140 = arith.addf %138, %139 : vector<2x128xf32>
    %141 = vector.extract_strided_slice %140 {offsets = [0, 0], sizes = [2, 32], strides = [1, 1]} : vector<2x128xf32> to vector<2x32xf32>
    %142 = arith.negf %141 : vector<2x32xf32>
    %143 = math.exp %142 : vector<2x32xf32>
    %cst_27 = arith.constant 1.000000e+00 : f32
    %144 = vector.broadcast %cst_27 : f32 to vector<2x32xf32>
    %145 = arith.addf %144, %143 : vector<2x32xf32>
    %146 = arith.divf %144, %145 : vector<2x32xf32>
    %147 = vector.extract_strided_slice %140 {offsets = [0, 32], sizes = [2, 32], strides = [1, 1]} : vector<2x128xf32> to vector<2x32xf32>
    %148 = arith.negf %147 : vector<2x32xf32>
    %149 = math.exp %148 : vector<2x32xf32>
    %cst_28 = arith.constant 1.000000e+00 : f32
    %150 = vector.broadcast %cst_28 : f32 to vector<2x32xf32>
    %151 = arith.addf %150, %149 : vector<2x32xf32>
    %152 = arith.divf %150, %151 : vector<2x32xf32>
    %153 = vector.extract_strided_slice %140 {offsets = [0, 64], sizes = [2, 32], strides = [1, 1]} : vector<2x128xf32> to vector<2x32xf32>
    %154 = math.tanh %153 : vector<2x32xf32>
    %155 = vector.extract_strided_slice %140 {offsets = [0, 96], sizes = [2, 32], strides = [1, 1]} : vector<2x128xf32> to vector<2x32xf32>
    %156 = arith.negf %155 : vector<2x32xf32>
    %157 = math.exp %156 : vector<2x32xf32>
    %cst_29 = arith.constant 1.000000e+00 : f32
    %158 = vector.broadcast %cst_29 : f32 to vector<2x32xf32>
    %159 = arith.addf %158, %157 : vector<2x32xf32>
    %160 = arith.divf %158, %159 : vector<2x32xf32>
    %161 = arith.mulf %152, %135 : vector<2x32xf32>
    %162 = arith.mulf %146, %154 : vector<2x32xf32>
    %163 = arith.addf %161, %162 : vector<2x32xf32>
    %164 = math.tanh %163 : vector<2x32xf32>
    %165 = arith.mulf %160, %164 : vector<2x32xf32>
    %166 = vector.extract_strided_slice %23 {offsets = [10, 0], sizes = [2, 128], strides = [1, 1]} : vector<16x128xf32> to vector<2x128xf32>
    %cst_30 = arith.constant dense<0.000000e+00> : vector<2x128xf32>
    %167 = tpu.matmul %165, %18, %cst_30 {dimension_numbers = #tpu.dot_dimension_numbers<[1], [0], [0], [1], [0, 0, 1, 1], [], []>} : vector<2x32xf32>, vector<32x128xf32>, vector<2x128xf32> -> vector<2x128xf32>
    %168 = arith.addf %166, %167 : vector<2x128xf32>
    %169 = vector.extract_strided_slice %168 {offsets = [0, 0], sizes = [2, 32], strides = [1, 1]} : vector<2x128xf32> to vector<2x32xf32>
    %170 = arith.negf %169 : vector<2x32xf32>
    %171 = math.exp %170 : vector<2x32xf32>
    %cst_31 = arith.constant 1.000000e+00 : f32
    %172 = vector.broadcast %cst_31 : f32 to vector<2x32xf32>
    %173 = arith.addf %172, %171 : vector<2x32xf32>
    %174 = arith.divf %172, %173 : vector<2x32xf32>
    %175 = vector.extract_strided_slice %168 {offsets = [0, 32], sizes = [2, 32], strides = [1, 1]} : vector<2x128xf32> to vector<2x32xf32>
    %176 = arith.negf %175 : vector<2x32xf32>
    %177 = math.exp %176 : vector<2x32xf32>
    %cst_32 = arith.constant 1.000000e+00 : f32
    %178 = vector.broadcast %cst_32 : f32 to vector<2x32xf32>
    %179 = arith.addf %178, %177 : vector<2x32xf32>
    %180 = arith.divf %178, %179 : vector<2x32xf32>
    %181 = vector.extract_strided_slice %168 {offsets = [0, 64], sizes = [2, 32], strides = [1, 1]} : vector<2x128xf32> to vector<2x32xf32>
    %182 = math.tanh %181 : vector<2x32xf32>
    %183 = vector.extract_strided_slice %168 {offsets = [0, 96], sizes = [2, 32], strides = [1, 1]} : vector<2x128xf32> to vector<2x32xf32>
    %184 = arith.negf %183 : vector<2x32xf32>
    %185 = math.exp %184 : vector<2x32xf32>
    %cst_33 = arith.constant 1.000000e+00 : f32
    %186 = vector.broadcast %cst_33 : f32 to vector<2x32xf32>
    %187 = arith.addf %186, %185 : vector<2x32xf32>
    %188 = arith.divf %186, %187 : vector<2x32xf32>
    %189 = arith.mulf %180, %163 : vector<2x32xf32>
    %190 = arith.mulf %174, %182 : vector<2x32xf32>
    %191 = arith.addf %189, %190 : vector<2x32xf32>
    %192 = math.tanh %191 : vector<2x32xf32>
    %193 = arith.mulf %188, %192 : vector<2x32xf32>
    %194 = vector.extract_strided_slice %23 {offsets = [12, 0], sizes = [2, 128], strides = [1, 1]} : vector<16x128xf32> to vector<2x128xf32>
    %cst_34 = arith.constant dense<0.000000e+00> : vector<2x128xf32>
    %195 = tpu.matmul %193, %18, %cst_34 {dimension_numbers = #tpu.dot_dimension_numbers<[1], [0], [0], [1], [0, 0, 1, 1], [], []>} : vector<2x32xf32>, vector<32x128xf32>, vector<2x128xf32> -> vector<2x128xf32>
    %196 = arith.addf %194, %195 : vector<2x128xf32>
    %197 = vector.extract_strided_slice %196 {offsets = [0, 0], sizes = [2, 32], strides = [1, 1]} : vector<2x128xf32> to vector<2x32xf32>
    %198 = arith.negf %197 : vector<2x32xf32>
    %199 = math.exp %198 : vector<2x32xf32>
    %cst_35 = arith.constant 1.000000e+00 : f32
    %200 = vector.broadcast %cst_35 : f32 to vector<2x32xf32>
    %201 = arith.addf %200, %199 : vector<2x32xf32>
    %202 = arith.divf %200, %201 : vector<2x32xf32>
    %203 = vector.extract_strided_slice %196 {offsets = [0, 32], sizes = [2, 32], strides = [1, 1]} : vector<2x128xf32> to vector<2x32xf32>
    %204 = arith.negf %203 : vector<2x32xf32>
    %205 = math.exp %204 : vector<2x32xf32>
    %cst_36 = arith.constant 1.000000e+00 : f32
    %206 = vector.broadcast %cst_36 : f32 to vector<2x32xf32>
    %207 = arith.addf %206, %205 : vector<2x32xf32>
    %208 = arith.divf %206, %207 : vector<2x32xf32>
    %209 = vector.extract_strided_slice %196 {offsets = [0, 64], sizes = [2, 32], strides = [1, 1]} : vector<2x128xf32> to vector<2x32xf32>
    %210 = math.tanh %209 : vector<2x32xf32>
    %211 = vector.extract_strided_slice %196 {offsets = [0, 96], sizes = [2, 32], strides = [1, 1]} : vector<2x128xf32> to vector<2x32xf32>
    %212 = arith.negf %211 : vector<2x32xf32>
    %213 = math.exp %212 : vector<2x32xf32>
    %cst_37 = arith.constant 1.000000e+00 : f32
    %214 = vector.broadcast %cst_37 : f32 to vector<2x32xf32>
    %215 = arith.addf %214, %213 : vector<2x32xf32>
    %216 = arith.divf %214, %215 : vector<2x32xf32>
    %217 = arith.mulf %208, %191 : vector<2x32xf32>
    %218 = arith.mulf %202, %210 : vector<2x32xf32>
    %219 = arith.addf %217, %218 : vector<2x32xf32>
    %220 = math.tanh %219 : vector<2x32xf32>
    %221 = arith.mulf %216, %220 : vector<2x32xf32>
    %222 = vector.extract_strided_slice %23 {offsets = [14, 0], sizes = [2, 128], strides = [1, 1]} : vector<16x128xf32> to vector<2x128xf32>
    %cst_38 = arith.constant dense<0.000000e+00> : vector<2x128xf32>
    %223 = tpu.matmul %221, %18, %cst_38 {dimension_numbers = #tpu.dot_dimension_numbers<[1], [0], [0], [1], [0, 0, 1, 1], [], []>} : vector<2x32xf32>, vector<32x128xf32>, vector<2x128xf32> -> vector<2x128xf32>
    %224 = arith.addf %222, %223 : vector<2x128xf32>
    %225 = vector.extract_strided_slice %224 {offsets = [0, 0], sizes = [2, 32], strides = [1, 1]} : vector<2x128xf32> to vector<2x32xf32>
    %226 = arith.negf %225 : vector<2x32xf32>
    %227 = math.exp %226 : vector<2x32xf32>
    %cst_39 = arith.constant 1.000000e+00 : f32
    %228 = vector.broadcast %cst_39 : f32 to vector<2x32xf32>
    %229 = arith.addf %228, %227 : vector<2x32xf32>
    %230 = arith.divf %228, %229 : vector<2x32xf32>
    %231 = vector.extract_strided_slice %224 {offsets = [0, 32], sizes = [2, 32], strides = [1, 1]} : vector<2x128xf32> to vector<2x32xf32>
    %232 = arith.negf %231 : vector<2x32xf32>
    %233 = math.exp %232 : vector<2x32xf32>
    %cst_40 = arith.constant 1.000000e+00 : f32
    %234 = vector.broadcast %cst_40 : f32 to vector<2x32xf32>
    %235 = arith.addf %234, %233 : vector<2x32xf32>
    %236 = arith.divf %234, %235 : vector<2x32xf32>
    %237 = vector.extract_strided_slice %224 {offsets = [0, 64], sizes = [2, 32], strides = [1, 1]} : vector<2x128xf32> to vector<2x32xf32>
    %238 = math.tanh %237 : vector<2x32xf32>
    %239 = vector.extract_strided_slice %224 {offsets = [0, 96], sizes = [2, 32], strides = [1, 1]} : vector<2x128xf32> to vector<2x32xf32>
    %240 = arith.negf %239 : vector<2x32xf32>
    %241 = math.exp %240 : vector<2x32xf32>
    %cst_41 = arith.constant 1.000000e+00 : f32
    %242 = vector.broadcast %cst_41 : f32 to vector<2x32xf32>
    %243 = arith.addf %242, %241 : vector<2x32xf32>
    %244 = arith.divf %242, %243 : vector<2x32xf32>
    %245 = arith.mulf %236, %219 : vector<2x32xf32>
    %246 = arith.mulf %230, %238 : vector<2x32xf32>
    %247 = arith.addf %245, %246 : vector<2x32xf32>
    %248 = math.tanh %247 : vector<2x32xf32>
    %249 = arith.mulf %244, %248 : vector<2x32xf32>
    %c0_42 = arith.constant 0 : index
    %c0_43 = arith.constant 0 : index
    %250 = vector.load %arg5[%c0_42, %c0_43] : memref<32x128xf32, #tpu.memory_space<vmem>>, vector<32x128xf32>
    %c0_44 = arith.constant 0 : index
    %c0_45 = arith.constant 0 : index
    %251 = vector.load %arg6[%c0_44, %c0_45] : memref<32x128xf32, #tpu.memory_space<vmem>>, vector<32x128xf32>
    %c0_46 = arith.constant 0 : index
    %c0_47 = arith.constant 0 : index
    %252 = vector.load %arg7[%c0_46, %c0_47] : memref<1x128xf32, #tpu.memory_space<vmem>>, vector<1x128xf32>
    %253 = tpu.concatenate %53, %81, %109, %137, %165, %193, %221, %249 in 0 : vector<2x32xf32>, vector<2x32xf32>, vector<2x32xf32>, vector<2x32xf32>, vector<2x32xf32>, vector<2x32xf32>, vector<2x32xf32>, vector<2x32xf32> -> vector<16x32xf32>
    %cst_48 = arith.constant dense<0.000000e+00> : vector<16x128xf32>
    %254 = tpu.matmul %253, %250, %cst_48 {dimension_numbers = #tpu.dot_dimension_numbers<[1], [0], [0], [1], [0, 0, 1, 1], [], []>} : vector<16x32xf32>, vector<32x128xf32>, vector<16x128xf32> -> vector<16x128xf32>
    %255 = vector.broadcast %252 : vector<1x128xf32> to vector<16x128xf32>
    %256 = arith.addf %254, %255 : vector<16x128xf32>
    %cst_49 = arith.constant 0.000000e+00 : f32
    %257 = vector.broadcast %cst_49 : f32 to vector<2x32xf32>
    %cst_50 = arith.constant 0.000000e+00 : f32
    %258 = vector.broadcast %cst_50 : f32 to vector<2x32xf32>
    %259 = vector.extract_strided_slice %256 {offsets = [0, 0], sizes = [2, 128], strides = [1, 1]} : vector<16x128xf32> to vector<2x128xf32>
    %cst_51 = arith.constant dense<0.000000e+00> : vector<2x128xf32>
    %260 = tpu.matmul %257, %251, %cst_51 {dimension_numbers = #tpu.dot_dimension_numbers<[1], [0], [0], [1], [0, 0, 1, 1], [], []>} : vector<2x32xf32>, vector<32x128xf32>, vector<2x128xf32> -> vector<2x128xf32>
    %261 = arith.addf %259, %260 : vector<2x128xf32>
    %262 = vector.extract_strided_slice %261 {offsets = [0, 0], sizes = [2, 32], strides = [1, 1]} : vector<2x128xf32> to vector<2x32xf32>
    %263 = arith.negf %262 : vector<2x32xf32>
    %264 = math.exp %263 : vector<2x32xf32>
    %cst_52 = arith.constant 1.000000e+00 : f32
    %265 = vector.broadcast %cst_52 : f32 to vector<2x32xf32>
    %266 = arith.addf %265, %264 : vector<2x32xf32>
    %267 = arith.divf %265, %266 : vector<2x32xf32>
    %268 = vector.extract_strided_slice %261 {offsets = [0, 32], sizes = [2, 32], strides = [1, 1]} : vector<2x128xf32> to vector<2x32xf32>
    %269 = arith.negf %268 : vector<2x32xf32>
    %270 = math.exp %269 : vector<2x32xf32>
    %cst_53 = arith.constant 1.000000e+00 : f32
    %271 = vector.broadcast %cst_53 : f32 to vector<2x32xf32>
    %272 = arith.addf %271, %270 : vector<2x32xf32>
    %273 = arith.divf %271, %272 : vector<2x32xf32>
    %274 = vector.extract_strided_slice %261 {offsets = [0, 64], sizes = [2, 32], strides = [1, 1]} : vector<2x128xf32> to vector<2x32xf32>
    %275 = math.tanh %274 : vector<2x32xf32>
    %276 = vector.extract_strided_slice %261 {offsets = [0, 96], sizes = [2, 32], strides = [1, 1]} : vector<2x128xf32> to vector<2x32xf32>
    %277 = arith.negf %276 : vector<2x32xf32>
    %278 = math.exp %277 : vector<2x32xf32>
    %cst_54 = arith.constant 1.000000e+00 : f32
    %279 = vector.broadcast %cst_54 : f32 to vector<2x32xf32>
    %280 = arith.addf %279, %278 : vector<2x32xf32>
    %281 = arith.divf %279, %280 : vector<2x32xf32>
    %282 = arith.mulf %273, %258 : vector<2x32xf32>
    %283 = arith.mulf %267, %275 : vector<2x32xf32>
    %284 = arith.addf %282, %283 : vector<2x32xf32>
    %285 = math.tanh %284 : vector<2x32xf32>
    %286 = arith.mulf %281, %285 : vector<2x32xf32>
    %287 = vector.extract_strided_slice %256 {offsets = [2, 0], sizes = [2, 128], strides = [1, 1]} : vector<16x128xf32> to vector<2x128xf32>
    %cst_55 = arith.constant dense<0.000000e+00> : vector<2x128xf32>
    %288 = tpu.matmul %286, %251, %cst_55 {dimension_numbers = #tpu.dot_dimension_numbers<[1], [0], [0], [1], [0, 0, 1, 1], [], []>} : vector<2x32xf32>, vector<32x128xf32>, vector<2x128xf32> -> vector<2x128xf32>
    %289 = arith.addf %287, %288 : vector<2x128xf32>
    %290 = vector.extract_strided_slice %289 {offsets = [0, 0], sizes = [2, 32], strides = [1, 1]} : vector<2x128xf32> to vector<2x32xf32>
    %291 = arith.negf %290 : vector<2x32xf32>
    %292 = math.exp %291 : vector<2x32xf32>
    %cst_56 = arith.constant 1.000000e+00 : f32
    %293 = vector.broadcast %cst_56 : f32 to vector<2x32xf32>
    %294 = arith.addf %293, %292 : vector<2x32xf32>
    %295 = arith.divf %293, %294 : vector<2x32xf32>
    %296 = vector.extract_strided_slice %289 {offsets = [0, 32], sizes = [2, 32], strides = [1, 1]} : vector<2x128xf32> to vector<2x32xf32>
    %297 = arith.negf %296 : vector<2x32xf32>
    %298 = math.exp %297 : vector<2x32xf32>
    %cst_57 = arith.constant 1.000000e+00 : f32
    %299 = vector.broadcast %cst_57 : f32 to vector<2x32xf32>
    %300 = arith.addf %299, %298 : vector<2x32xf32>
    %301 = arith.divf %299, %300 : vector<2x32xf32>
    %302 = vector.extract_strided_slice %289 {offsets = [0, 64], sizes = [2, 32], strides = [1, 1]} : vector<2x128xf32> to vector<2x32xf32>
    %303 = math.tanh %302 : vector<2x32xf32>
    %304 = vector.extract_strided_slice %289 {offsets = [0, 96], sizes = [2, 32], strides = [1, 1]} : vector<2x128xf32> to vector<2x32xf32>
    %305 = arith.negf %304 : vector<2x32xf32>
    %306 = math.exp %305 : vector<2x32xf32>
    %cst_58 = arith.constant 1.000000e+00 : f32
    %307 = vector.broadcast %cst_58 : f32 to vector<2x32xf32>
    %308 = arith.addf %307, %306 : vector<2x32xf32>
    %309 = arith.divf %307, %308 : vector<2x32xf32>
    %310 = arith.mulf %301, %284 : vector<2x32xf32>
    %311 = arith.mulf %295, %303 : vector<2x32xf32>
    %312 = arith.addf %310, %311 : vector<2x32xf32>
    %313 = math.tanh %312 : vector<2x32xf32>
    %314 = arith.mulf %309, %313 : vector<2x32xf32>
    %315 = vector.extract_strided_slice %256 {offsets = [4, 0], sizes = [2, 128], strides = [1, 1]} : vector<16x128xf32> to vector<2x128xf32>
    %cst_59 = arith.constant dense<0.000000e+00> : vector<2x128xf32>
    %316 = tpu.matmul %314, %251, %cst_59 {dimension_numbers = #tpu.dot_dimension_numbers<[1], [0], [0], [1], [0, 0, 1, 1], [], []>} : vector<2x32xf32>, vector<32x128xf32>, vector<2x128xf32> -> vector<2x128xf32>
    %317 = arith.addf %315, %316 : vector<2x128xf32>
    %318 = vector.extract_strided_slice %317 {offsets = [0, 0], sizes = [2, 32], strides = [1, 1]} : vector<2x128xf32> to vector<2x32xf32>
    %319 = arith.negf %318 : vector<2x32xf32>
    %320 = math.exp %319 : vector<2x32xf32>
    %cst_60 = arith.constant 1.000000e+00 : f32
    %321 = vector.broadcast %cst_60 : f32 to vector<2x32xf32>
    %322 = arith.addf %321, %320 : vector<2x32xf32>
    %323 = arith.divf %321, %322 : vector<2x32xf32>
    %324 = vector.extract_strided_slice %317 {offsets = [0, 32], sizes = [2, 32], strides = [1, 1]} : vector<2x128xf32> to vector<2x32xf32>
    %325 = arith.negf %324 : vector<2x32xf32>
    %326 = math.exp %325 : vector<2x32xf32>
    %cst_61 = arith.constant 1.000000e+00 : f32
    %327 = vector.broadcast %cst_61 : f32 to vector<2x32xf32>
    %328 = arith.addf %327, %326 : vector<2x32xf32>
    %329 = arith.divf %327, %328 : vector<2x32xf32>
    %330 = vector.extract_strided_slice %317 {offsets = [0, 64], sizes = [2, 32], strides = [1, 1]} : vector<2x128xf32> to vector<2x32xf32>
    %331 = math.tanh %330 : vector<2x32xf32>
    %332 = vector.extract_strided_slice %317 {offsets = [0, 96], sizes = [2, 32], strides = [1, 1]} : vector<2x128xf32> to vector<2x32xf32>
    %333 = arith.negf %332 : vector<2x32xf32>
    %334 = math.exp %333 : vector<2x32xf32>
    %cst_62 = arith.constant 1.000000e+00 : f32
    %335 = vector.broadcast %cst_62 : f32 to vector<2x32xf32>
    %336 = arith.addf %335, %334 : vector<2x32xf32>
    %337 = arith.divf %335, %336 : vector<2x32xf32>
    %338 = arith.mulf %329, %312 : vector<2x32xf32>
    %339 = arith.mulf %323, %331 : vector<2x32xf32>
    %340 = arith.addf %338, %339 : vector<2x32xf32>
    %341 = math.tanh %340 : vector<2x32xf32>
    %342 = arith.mulf %337, %341 : vector<2x32xf32>
    %343 = vector.extract_strided_slice %256 {offsets = [6, 0], sizes = [2, 128], strides = [1, 1]} : vector<16x128xf32> to vector<2x128xf32>
    %cst_63 = arith.constant dense<0.000000e+00> : vector<2x128xf32>
    %344 = tpu.matmul %342, %251, %cst_63 {dimension_numbers = #tpu.dot_dimension_numbers<[1], [0], [0], [1], [0, 0, 1, 1], [], []>} : vector<2x32xf32>, vector<32x128xf32>, vector<2x128xf32> -> vector<2x128xf32>
    %345 = arith.addf %343, %344 : vector<2x128xf32>
    %346 = vector.extract_strided_slice %345 {offsets = [0, 0], sizes = [2, 32], strides = [1, 1]} : vector<2x128xf32> to vector<2x32xf32>
    %347 = arith.negf %346 : vector<2x32xf32>
    %348 = math.exp %347 : vector<2x32xf32>
    %cst_64 = arith.constant 1.000000e+00 : f32
    %349 = vector.broadcast %cst_64 : f32 to vector<2x32xf32>
    %350 = arith.addf %349, %348 : vector<2x32xf32>
    %351 = arith.divf %349, %350 : vector<2x32xf32>
    %352 = vector.extract_strided_slice %345 {offsets = [0, 32], sizes = [2, 32], strides = [1, 1]} : vector<2x128xf32> to vector<2x32xf32>
    %353 = arith.negf %352 : vector<2x32xf32>
    %354 = math.exp %353 : vector<2x32xf32>
    %cst_65 = arith.constant 1.000000e+00 : f32
    %355 = vector.broadcast %cst_65 : f32 to vector<2x32xf32>
    %356 = arith.addf %355, %354 : vector<2x32xf32>
    %357 = arith.divf %355, %356 : vector<2x32xf32>
    %358 = vector.extract_strided_slice %345 {offsets = [0, 64], sizes = [2, 32], strides = [1, 1]} : vector<2x128xf32> to vector<2x32xf32>
    %359 = math.tanh %358 : vector<2x32xf32>
    %360 = vector.extract_strided_slice %345 {offsets = [0, 96], sizes = [2, 32], strides = [1, 1]} : vector<2x128xf32> to vector<2x32xf32>
    %361 = arith.negf %360 : vector<2x32xf32>
    %362 = math.exp %361 : vector<2x32xf32>
    %cst_66 = arith.constant 1.000000e+00 : f32
    %363 = vector.broadcast %cst_66 : f32 to vector<2x32xf32>
    %364 = arith.addf %363, %362 : vector<2x32xf32>
    %365 = arith.divf %363, %364 : vector<2x32xf32>
    %366 = arith.mulf %357, %340 : vector<2x32xf32>
    %367 = arith.mulf %351, %359 : vector<2x32xf32>
    %368 = arith.addf %366, %367 : vector<2x32xf32>
    %369 = math.tanh %368 : vector<2x32xf32>
    %370 = arith.mulf %365, %369 : vector<2x32xf32>
    %371 = vector.extract_strided_slice %256 {offsets = [8, 0], sizes = [2, 128], strides = [1, 1]} : vector<16x128xf32> to vector<2x128xf32>
    %cst_67 = arith.constant dense<0.000000e+00> : vector<2x128xf32>
    %372 = tpu.matmul %370, %251, %cst_67 {dimension_numbers = #tpu.dot_dimension_numbers<[1], [0], [0], [1], [0, 0, 1, 1], [], []>} : vector<2x32xf32>, vector<32x128xf32>, vector<2x128xf32> -> vector<2x128xf32>
    %373 = arith.addf %371, %372 : vector<2x128xf32>
    %374 = vector.extract_strided_slice %373 {offsets = [0, 0], sizes = [2, 32], strides = [1, 1]} : vector<2x128xf32> to vector<2x32xf32>
    %375 = arith.negf %374 : vector<2x32xf32>
    %376 = math.exp %375 : vector<2x32xf32>
    %cst_68 = arith.constant 1.000000e+00 : f32
    %377 = vector.broadcast %cst_68 : f32 to vector<2x32xf32>
    %378 = arith.addf %377, %376 : vector<2x32xf32>
    %379 = arith.divf %377, %378 : vector<2x32xf32>
    %380 = vector.extract_strided_slice %373 {offsets = [0, 32], sizes = [2, 32], strides = [1, 1]} : vector<2x128xf32> to vector<2x32xf32>
    %381 = arith.negf %380 : vector<2x32xf32>
    %382 = math.exp %381 : vector<2x32xf32>
    %cst_69 = arith.constant 1.000000e+00 : f32
    %383 = vector.broadcast %cst_69 : f32 to vector<2x32xf32>
    %384 = arith.addf %383, %382 : vector<2x32xf32>
    %385 = arith.divf %383, %384 : vector<2x32xf32>
    %386 = vector.extract_strided_slice %373 {offsets = [0, 64], sizes = [2, 32], strides = [1, 1]} : vector<2x128xf32> to vector<2x32xf32>
    %387 = math.tanh %386 : vector<2x32xf32>
    %388 = vector.extract_strided_slice %373 {offsets = [0, 96], sizes = [2, 32], strides = [1, 1]} : vector<2x128xf32> to vector<2x32xf32>
    %389 = arith.negf %388 : vector<2x32xf32>
    %390 = math.exp %389 : vector<2x32xf32>
    %cst_70 = arith.constant 1.000000e+00 : f32
    %391 = vector.broadcast %cst_70 : f32 to vector<2x32xf32>
    %392 = arith.addf %391, %390 : vector<2x32xf32>
    %393 = arith.divf %391, %392 : vector<2x32xf32>
    %394 = arith.mulf %385, %368 : vector<2x32xf32>
    %395 = arith.mulf %379, %387 : vector<2x32xf32>
    %396 = arith.addf %394, %395 : vector<2x32xf32>
    %397 = math.tanh %396 : vector<2x32xf32>
    %398 = arith.mulf %393, %397 : vector<2x32xf32>
    %399 = vector.extract_strided_slice %256 {offsets = [10, 0], sizes = [2, 128], strides = [1, 1]} : vector<16x128xf32> to vector<2x128xf32>
    %cst_71 = arith.constant dense<0.000000e+00> : vector<2x128xf32>
    %400 = tpu.matmul %398, %251, %cst_71 {dimension_numbers = #tpu.dot_dimension_numbers<[1], [0], [0], [1], [0, 0, 1, 1], [], []>} : vector<2x32xf32>, vector<32x128xf32>, vector<2x128xf32> -> vector<2x128xf32>
    %401 = arith.addf %399, %400 : vector<2x128xf32>
    %402 = vector.extract_strided_slice %401 {offsets = [0, 0], sizes = [2, 32], strides = [1, 1]} : vector<2x128xf32> to vector<2x32xf32>
    %403 = arith.negf %402 : vector<2x32xf32>
    %404 = math.exp %403 : vector<2x32xf32>
    %cst_72 = arith.constant 1.000000e+00 : f32
    %405 = vector.broadcast %cst_72 : f32 to vector<2x32xf32>
    %406 = arith.addf %405, %404 : vector<2x32xf32>
    %407 = arith.divf %405, %406 : vector<2x32xf32>
    %408 = vector.extract_strided_slice %401 {offsets = [0, 32], sizes = [2, 32], strides = [1, 1]} : vector<2x128xf32> to vector<2x32xf32>
    %409 = arith.negf %408 : vector<2x32xf32>
    %410 = math.exp %409 : vector<2x32xf32>
    %cst_73 = arith.constant 1.000000e+00 : f32
    %411 = vector.broadcast %cst_73 : f32 to vector<2x32xf32>
    %412 = arith.addf %411, %410 : vector<2x32xf32>
    %413 = arith.divf %411, %412 : vector<2x32xf32>
    %414 = vector.extract_strided_slice %401 {offsets = [0, 64], sizes = [2, 32], strides = [1, 1]} : vector<2x128xf32> to vector<2x32xf32>
    %415 = math.tanh %414 : vector<2x32xf32>
    %416 = vector.extract_strided_slice %401 {offsets = [0, 96], sizes = [2, 32], strides = [1, 1]} : vector<2x128xf32> to vector<2x32xf32>
    %417 = arith.negf %416 : vector<2x32xf32>
    %418 = math.exp %417 : vector<2x32xf32>
    %cst_74 = arith.constant 1.000000e+00 : f32
    %419 = vector.broadcast %cst_74 : f32 to vector<2x32xf32>
    %420 = arith.addf %419, %418 : vector<2x32xf32>
    %421 = arith.divf %419, %420 : vector<2x32xf32>
    %422 = arith.mulf %413, %396 : vector<2x32xf32>
    %423 = arith.mulf %407, %415 : vector<2x32xf32>
    %424 = arith.addf %422, %423 : vector<2x32xf32>
    %425 = math.tanh %424 : vector<2x32xf32>
    %426 = arith.mulf %421, %425 : vector<2x32xf32>
    %427 = vector.extract_strided_slice %256 {offsets = [12, 0], sizes = [2, 128], strides = [1, 1]} : vector<16x128xf32> to vector<2x128xf32>
    %cst_75 = arith.constant dense<0.000000e+00> : vector<2x128xf32>
    %428 = tpu.matmul %426, %251, %cst_75 {dimension_numbers = #tpu.dot_dimension_numbers<[1], [0], [0], [1], [0, 0, 1, 1], [], []>} : vector<2x32xf32>, vector<32x128xf32>, vector<2x128xf32> -> vector<2x128xf32>
    %429 = arith.addf %427, %428 : vector<2x128xf32>
    %430 = vector.extract_strided_slice %429 {offsets = [0, 0], sizes = [2, 32], strides = [1, 1]} : vector<2x128xf32> to vector<2x32xf32>
    %431 = arith.negf %430 : vector<2x32xf32>
    %432 = math.exp %431 : vector<2x32xf32>
    %cst_76 = arith.constant 1.000000e+00 : f32
    %433 = vector.broadcast %cst_76 : f32 to vector<2x32xf32>
    %434 = arith.addf %433, %432 : vector<2x32xf32>
    %435 = arith.divf %433, %434 : vector<2x32xf32>
    %436 = vector.extract_strided_slice %429 {offsets = [0, 32], sizes = [2, 32], strides = [1, 1]} : vector<2x128xf32> to vector<2x32xf32>
    %437 = arith.negf %436 : vector<2x32xf32>
    %438 = math.exp %437 : vector<2x32xf32>
    %cst_77 = arith.constant 1.000000e+00 : f32
    %439 = vector.broadcast %cst_77 : f32 to vector<2x32xf32>
    %440 = arith.addf %439, %438 : vector<2x32xf32>
    %441 = arith.divf %439, %440 : vector<2x32xf32>
    %442 = vector.extract_strided_slice %429 {offsets = [0, 64], sizes = [2, 32], strides = [1, 1]} : vector<2x128xf32> to vector<2x32xf32>
    %443 = math.tanh %442 : vector<2x32xf32>
    %444 = vector.extract_strided_slice %429 {offsets = [0, 96], sizes = [2, 32], strides = [1, 1]} : vector<2x128xf32> to vector<2x32xf32>
    %445 = arith.negf %444 : vector<2x32xf32>
    %446 = math.exp %445 : vector<2x32xf32>
    %cst_78 = arith.constant 1.000000e+00 : f32
    %447 = vector.broadcast %cst_78 : f32 to vector<2x32xf32>
    %448 = arith.addf %447, %446 : vector<2x32xf32>
    %449 = arith.divf %447, %448 : vector<2x32xf32>
    %450 = arith.mulf %441, %424 : vector<2x32xf32>
    %451 = arith.mulf %435, %443 : vector<2x32xf32>
    %452 = arith.addf %450, %451 : vector<2x32xf32>
    %453 = math.tanh %452 : vector<2x32xf32>
    %454 = arith.mulf %449, %453 : vector<2x32xf32>
    %455 = vector.extract_strided_slice %256 {offsets = [14, 0], sizes = [2, 128], strides = [1, 1]} : vector<16x128xf32> to vector<2x128xf32>
    %cst_79 = arith.constant dense<0.000000e+00> : vector<2x128xf32>
    %456 = tpu.matmul %454, %251, %cst_79 {dimension_numbers = #tpu.dot_dimension_numbers<[1], [0], [0], [1], [0, 0, 1, 1], [], []>} : vector<2x32xf32>, vector<32x128xf32>, vector<2x128xf32> -> vector<2x128xf32>
    %457 = arith.addf %455, %456 : vector<2x128xf32>
    %458 = vector.extract_strided_slice %457 {offsets = [0, 0], sizes = [2, 32], strides = [1, 1]} : vector<2x128xf32> to vector<2x32xf32>
    %459 = arith.negf %458 : vector<2x32xf32>
    %460 = math.exp %459 : vector<2x32xf32>
    %cst_80 = arith.constant 1.000000e+00 : f32
    %461 = vector.broadcast %cst_80 : f32 to vector<2x32xf32>
    %462 = arith.addf %461, %460 : vector<2x32xf32>
    %463 = arith.divf %461, %462 : vector<2x32xf32>
    %464 = vector.extract_strided_slice %457 {offsets = [0, 32], sizes = [2, 32], strides = [1, 1]} : vector<2x128xf32> to vector<2x32xf32>
    %465 = arith.negf %464 : vector<2x32xf32>
    %466 = math.exp %465 : vector<2x32xf32>
    %cst_81 = arith.constant 1.000000e+00 : f32
    %467 = vector.broadcast %cst_81 : f32 to vector<2x32xf32>
    %468 = arith.addf %467, %466 : vector<2x32xf32>
    %469 = arith.divf %467, %468 : vector<2x32xf32>
    %470 = vector.extract_strided_slice %457 {offsets = [0, 64], sizes = [2, 32], strides = [1, 1]} : vector<2x128xf32> to vector<2x32xf32>
    %471 = math.tanh %470 : vector<2x32xf32>
    %472 = vector.extract_strided_slice %457 {offsets = [0, 96], sizes = [2, 32], strides = [1, 1]} : vector<2x128xf32> to vector<2x32xf32>
    %473 = arith.negf %472 : vector<2x32xf32>
    %474 = math.exp %473 : vector<2x32xf32>
    %cst_82 = arith.constant 1.000000e+00 : f32
    %475 = vector.broadcast %cst_82 : f32 to vector<2x32xf32>
    %476 = arith.addf %475, %474 : vector<2x32xf32>
    %477 = arith.divf %475, %476 : vector<2x32xf32>
    %478 = arith.mulf %469, %452 : vector<2x32xf32>
    %479 = arith.mulf %463, %471 : vector<2x32xf32>
    %480 = arith.addf %478, %479 : vector<2x32xf32>
    %481 = math.tanh %480 : vector<2x32xf32>
    %482 = arith.mulf %477, %481 : vector<2x32xf32>
    %c0_83 = arith.constant 0 : index
    %c0_84 = arith.constant 0 : index
    %c0_85 = arith.constant 0 : index
    %483 = vector.load %arg1[%c0_83, %c0_84, %c0_85] : memref<2x8x8xf32, #tpu.memory_space<vmem>>, vector<2x8x8xf32>
    %484 = vector.extract_strided_slice %483 {offsets = [0, 0, 0], sizes = [2, 1, 8], strides = [1, 1, 1]} : vector<2x8x8xf32> to vector<2x1x8xf32>
    %485 = vector.shape_cast %484 : vector<2x1x8xf32> to vector<2x8xf32>
    %486 = vector.extract_strided_slice %483 {offsets = [0, 1, 0], sizes = [2, 1, 8], strides = [1, 1, 1]} : vector<2x8x8xf32> to vector<2x1x8xf32>
    %487 = vector.shape_cast %486 : vector<2x1x8xf32> to vector<2x8xf32>
    %488 = vector.extract_strided_slice %483 {offsets = [0, 2, 0], sizes = [2, 1, 8], strides = [1, 1, 1]} : vector<2x8x8xf32> to vector<2x1x8xf32>
    %489 = vector.shape_cast %488 : vector<2x1x8xf32> to vector<2x8xf32>
    %490 = vector.extract_strided_slice %483 {offsets = [0, 3, 0], sizes = [2, 1, 8], strides = [1, 1, 1]} : vector<2x8x8xf32> to vector<2x1x8xf32>
    %491 = vector.shape_cast %490 : vector<2x1x8xf32> to vector<2x8xf32>
    %492 = vector.extract_strided_slice %483 {offsets = [0, 4, 0], sizes = [2, 1, 8], strides = [1, 1, 1]} : vector<2x8x8xf32> to vector<2x1x8xf32>
    %493 = vector.shape_cast %492 : vector<2x1x8xf32> to vector<2x8xf32>
    %494 = vector.extract_strided_slice %483 {offsets = [0, 5, 0], sizes = [2, 1, 8], strides = [1, 1, 1]} : vector<2x8x8xf32> to vector<2x1x8xf32>
    %495 = vector.shape_cast %494 : vector<2x1x8xf32> to vector<2x8xf32>
    %496 = vector.extract_strided_slice %483 {offsets = [0, 6, 0], sizes = [2, 1, 8], strides = [1, 1, 1]} : vector<2x8x8xf32> to vector<2x1x8xf32>
    %497 = vector.shape_cast %496 : vector<2x1x8xf32> to vector<2x8xf32>
    %498 = vector.extract_strided_slice %483 {offsets = [0, 7, 0], sizes = [2, 1, 8], strides = [1, 1, 1]} : vector<2x8x8xf32> to vector<2x1x8xf32>
    %499 = vector.shape_cast %498 : vector<2x1x8xf32> to vector<2x8xf32>
    %c0_86 = arith.constant 0 : index
    %c0_87 = arith.constant 0 : index
    %500 = vector.load %arg8[%c0_86, %c0_87] : memref<8x128xf32, #tpu.memory_space<vmem>>, vector<8x128xf32>
    %c0_88 = arith.constant 0 : index
    %c0_89 = arith.constant 0 : index
    %501 = vector.load %arg9[%c0_88, %c0_89] : memref<32x128xf32, #tpu.memory_space<vmem>>, vector<32x128xf32>
    %c0_90 = arith.constant 0 : index
    %c0_91 = arith.constant 0 : index
    %502 = vector.load %arg10[%c0_90, %c0_91] : memref<1x128xf32, #tpu.memory_space<vmem>>, vector<1x128xf32>
    %503 = tpu.concatenate %485, %487, %489, %491, %493, %495, %497, %499 in 0 : vector<2x8xf32>, vector<2x8xf32>, vector<2x8xf32>, vector<2x8xf32>, vector<2x8xf32>, vector<2x8xf32>, vector<2x8xf32>, vector<2x8xf32> -> vector<16x8xf32>
    %cst_92 = arith.constant dense<0.000000e+00> : vector<16x128xf32>
    %504 = tpu.matmul %503, %500, %cst_92 {dimension_numbers = #tpu.dot_dimension_numbers<[1], [0], [0], [1], [0, 0, 1, 1], [], []>} : vector<16x8xf32>, vector<8x128xf32>, vector<16x128xf32> -> vector<16x128xf32>
    %505 = vector.broadcast %502 : vector<1x128xf32> to vector<16x128xf32>
    %506 = arith.addf %504, %505 : vector<16x128xf32>
    %cst_93 = arith.constant 0.000000e+00 : f32
    %507 = vector.broadcast %cst_93 : f32 to vector<2x32xf32>
    %cst_94 = arith.constant 0.000000e+00 : f32
    %508 = vector.broadcast %cst_94 : f32 to vector<2x32xf32>
    %509 = vector.extract_strided_slice %506 {offsets = [0, 0], sizes = [2, 128], strides = [1, 1]} : vector<16x128xf32> to vector<2x128xf32>
    %cst_95 = arith.constant dense<0.000000e+00> : vector<2x128xf32>
    %510 = tpu.matmul %507, %501, %cst_95 {dimension_numbers = #tpu.dot_dimension_numbers<[1], [0], [0], [1], [0, 0, 1, 1], [], []>} : vector<2x32xf32>, vector<32x128xf32>, vector<2x128xf32> -> vector<2x128xf32>
    %511 = arith.addf %509, %510 : vector<2x128xf32>
    %512 = vector.extract_strided_slice %511 {offsets = [0, 0], sizes = [2, 32], strides = [1, 1]} : vector<2x128xf32> to vector<2x32xf32>
    %513 = arith.negf %512 : vector<2x32xf32>
    %514 = math.exp %513 : vector<2x32xf32>
    %cst_96 = arith.constant 1.000000e+00 : f32
    %515 = vector.broadcast %cst_96 : f32 to vector<2x32xf32>
    %516 = arith.addf %515, %514 : vector<2x32xf32>
    %517 = arith.divf %515, %516 : vector<2x32xf32>
    %518 = vector.extract_strided_slice %511 {offsets = [0, 32], sizes = [2, 32], strides = [1, 1]} : vector<2x128xf32> to vector<2x32xf32>
    %519 = arith.negf %518 : vector<2x32xf32>
    %520 = math.exp %519 : vector<2x32xf32>
    %cst_97 = arith.constant 1.000000e+00 : f32
    %521 = vector.broadcast %cst_97 : f32 to vector<2x32xf32>
    %522 = arith.addf %521, %520 : vector<2x32xf32>
    %523 = arith.divf %521, %522 : vector<2x32xf32>
    %524 = vector.extract_strided_slice %511 {offsets = [0, 64], sizes = [2, 32], strides = [1, 1]} : vector<2x128xf32> to vector<2x32xf32>
    %525 = math.tanh %524 : vector<2x32xf32>
    %526 = vector.extract_strided_slice %511 {offsets = [0, 96], sizes = [2, 32], strides = [1, 1]} : vector<2x128xf32> to vector<2x32xf32>
    %527 = arith.negf %526 : vector<2x32xf32>
    %528 = math.exp %527 : vector<2x32xf32>
    %cst_98 = arith.constant 1.000000e+00 : f32
    %529 = vector.broadcast %cst_98 : f32 to vector<2x32xf32>
    %530 = arith.addf %529, %528 : vector<2x32xf32>
    %531 = arith.divf %529, %530 : vector<2x32xf32>
    %532 = arith.mulf %523, %508 : vector<2x32xf32>
    %533 = arith.mulf %517, %525 : vector<2x32xf32>
    %534 = arith.addf %532, %533 : vector<2x32xf32>
    %535 = math.tanh %534 : vector<2x32xf32>
    %536 = arith.mulf %531, %535 : vector<2x32xf32>
    %537 = vector.extract_strided_slice %506 {offsets = [2, 0], sizes = [2, 128], strides = [1, 1]} : vector<16x128xf32> to vector<2x128xf32>
    %cst_99 = arith.constant dense<0.000000e+00> : vector<2x128xf32>
    %538 = tpu.matmul %536, %501, %cst_99 {dimension_numbers = #tpu.dot_dimension_numbers<[1], [0], [0], [1], [0, 0, 1, 1], [], []>} : vector<2x32xf32>, vector<32x128xf32>, vector<2x128xf32> -> vector<2x128xf32>
    %539 = arith.addf %537, %538 : vector<2x128xf32>
    %540 = vector.extract_strided_slice %539 {offsets = [0, 0], sizes = [2, 32], strides = [1, 1]} : vector<2x128xf32> to vector<2x32xf32>
    %541 = arith.negf %540 : vector<2x32xf32>
    %542 = math.exp %541 : vector<2x32xf32>
    %cst_100 = arith.constant 1.000000e+00 : f32
    %543 = vector.broadcast %cst_100 : f32 to vector<2x32xf32>
    %544 = arith.addf %543, %542 : vector<2x32xf32>
    %545 = arith.divf %543, %544 : vector<2x32xf32>
    %546 = vector.extract_strided_slice %539 {offsets = [0, 32], sizes = [2, 32], strides = [1, 1]} : vector<2x128xf32> to vector<2x32xf32>
    %547 = arith.negf %546 : vector<2x32xf32>
    %548 = math.exp %547 : vector<2x32xf32>
    %cst_101 = arith.constant 1.000000e+00 : f32
    %549 = vector.broadcast %cst_101 : f32 to vector<2x32xf32>
    %550 = arith.addf %549, %548 : vector<2x32xf32>
    %551 = arith.divf %549, %550 : vector<2x32xf32>
    %552 = vector.extract_strided_slice %539 {offsets = [0, 64], sizes = [2, 32], strides = [1, 1]} : vector<2x128xf32> to vector<2x32xf32>
    %553 = math.tanh %552 : vector<2x32xf32>
    %554 = vector.extract_strided_slice %539 {offsets = [0, 96], sizes = [2, 32], strides = [1, 1]} : vector<2x128xf32> to vector<2x32xf32>
    %555 = arith.negf %554 : vector<2x32xf32>
    %556 = math.exp %555 : vector<2x32xf32>
    %cst_102 = arith.constant 1.000000e+00 : f32
    %557 = vector.broadcast %cst_102 : f32 to vector<2x32xf32>
    %558 = arith.addf %557, %556 : vector<2x32xf32>
    %559 = arith.divf %557, %558 : vector<2x32xf32>
    %560 = arith.mulf %551, %534 : vector<2x32xf32>
    %561 = arith.mulf %545, %553 : vector<2x32xf32>
    %562 = arith.addf %560, %561 : vector<2x32xf32>
    %563 = math.tanh %562 : vector<2x32xf32>
    %564 = arith.mulf %559, %563 : vector<2x32xf32>
    %565 = vector.extract_strided_slice %506 {offsets = [4, 0], sizes = [2, 128], strides = [1, 1]} : vector<16x128xf32> to vector<2x128xf32>
    %cst_103 = arith.constant dense<0.000000e+00> : vector<2x128xf32>
    %566 = tpu.matmul %564, %501, %cst_103 {dimension_numbers = #tpu.dot_dimension_numbers<[1], [0], [0], [1], [0, 0, 1, 1], [], []>} : vector<2x32xf32>, vector<32x128xf32>, vector<2x128xf32> -> vector<2x128xf32>
    %567 = arith.addf %565, %566 : vector<2x128xf32>
    %568 = vector.extract_strided_slice %567 {offsets = [0, 0], sizes = [2, 32], strides = [1, 1]} : vector<2x128xf32> to vector<2x32xf32>
    %569 = arith.negf %568 : vector<2x32xf32>
    %570 = math.exp %569 : vector<2x32xf32>
    %cst_104 = arith.constant 1.000000e+00 : f32
    %571 = vector.broadcast %cst_104 : f32 to vector<2x32xf32>
    %572 = arith.addf %571, %570 : vector<2x32xf32>
    %573 = arith.divf %571, %572 : vector<2x32xf32>
    %574 = vector.extract_strided_slice %567 {offsets = [0, 32], sizes = [2, 32], strides = [1, 1]} : vector<2x128xf32> to vector<2x32xf32>
    %575 = arith.negf %574 : vector<2x32xf32>
    %576 = math.exp %575 : vector<2x32xf32>
    %cst_105 = arith.constant 1.000000e+00 : f32
    %577 = vector.broadcast %cst_105 : f32 to vector<2x32xf32>
    %578 = arith.addf %577, %576 : vector<2x32xf32>
    %579 = arith.divf %577, %578 : vector<2x32xf32>
    %580 = vector.extract_strided_slice %567 {offsets = [0, 64], sizes = [2, 32], strides = [1, 1]} : vector<2x128xf32> to vector<2x32xf32>
    %581 = math.tanh %580 : vector<2x32xf32>
    %582 = vector.extract_strided_slice %567 {offsets = [0, 96], sizes = [2, 32], strides = [1, 1]} : vector<2x128xf32> to vector<2x32xf32>
    %583 = arith.negf %582 : vector<2x32xf32>
    %584 = math.exp %583 : vector<2x32xf32>
    %cst_106 = arith.constant 1.000000e+00 : f32
    %585 = vector.broadcast %cst_106 : f32 to vector<2x32xf32>
    %586 = arith.addf %585, %584 : vector<2x32xf32>
    %587 = arith.divf %585, %586 : vector<2x32xf32>
    %588 = arith.mulf %579, %562 : vector<2x32xf32>
    %589 = arith.mulf %573, %581 : vector<2x32xf32>
    %590 = arith.addf %588, %589 : vector<2x32xf32>
    %591 = math.tanh %590 : vector<2x32xf32>
    %592 = arith.mulf %587, %591 : vector<2x32xf32>
    %593 = vector.extract_strided_slice %506 {offsets = [6, 0], sizes = [2, 128], strides = [1, 1]} : vector<16x128xf32> to vector<2x128xf32>
    %cst_107 = arith.constant dense<0.000000e+00> : vector<2x128xf32>
    %594 = tpu.matmul %592, %501, %cst_107 {dimension_numbers = #tpu.dot_dimension_numbers<[1], [0], [0], [1], [0, 0, 1, 1], [], []>} : vector<2x32xf32>, vector<32x128xf32>, vector<2x128xf32> -> vector<2x128xf32>
    %595 = arith.addf %593, %594 : vector<2x128xf32>
    %596 = vector.extract_strided_slice %595 {offsets = [0, 0], sizes = [2, 32], strides = [1, 1]} : vector<2x128xf32> to vector<2x32xf32>
    %597 = arith.negf %596 : vector<2x32xf32>
    %598 = math.exp %597 : vector<2x32xf32>
    %cst_108 = arith.constant 1.000000e+00 : f32
    %599 = vector.broadcast %cst_108 : f32 to vector<2x32xf32>
    %600 = arith.addf %599, %598 : vector<2x32xf32>
    %601 = arith.divf %599, %600 : vector<2x32xf32>
    %602 = vector.extract_strided_slice %595 {offsets = [0, 32], sizes = [2, 32], strides = [1, 1]} : vector<2x128xf32> to vector<2x32xf32>
    %603 = arith.negf %602 : vector<2x32xf32>
    %604 = math.exp %603 : vector<2x32xf32>
    %cst_109 = arith.constant 1.000000e+00 : f32
    %605 = vector.broadcast %cst_109 : f32 to vector<2x32xf32>
    %606 = arith.addf %605, %604 : vector<2x32xf32>
    %607 = arith.divf %605, %606 : vector<2x32xf32>
    %608 = vector.extract_strided_slice %595 {offsets = [0, 64], sizes = [2, 32], strides = [1, 1]} : vector<2x128xf32> to vector<2x32xf32>
    %609 = math.tanh %608 : vector<2x32xf32>
    %610 = vector.extract_strided_slice %595 {offsets = [0, 96], sizes = [2, 32], strides = [1, 1]} : vector<2x128xf32> to vector<2x32xf32>
    %611 = arith.negf %610 : vector<2x32xf32>
    %612 = math.exp %611 : vector<2x32xf32>
    %cst_110 = arith.constant 1.000000e+00 : f32
    %613 = vector.broadcast %cst_110 : f32 to vector<2x32xf32>
    %614 = arith.addf %613, %612 : vector<2x32xf32>
    %615 = arith.divf %613, %614 : vector<2x32xf32>
    %616 = arith.mulf %607, %590 : vector<2x32xf32>
    %617 = arith.mulf %601, %609 : vector<2x32xf32>
    %618 = arith.addf %616, %617 : vector<2x32xf32>
    %619 = math.tanh %618 : vector<2x32xf32>
    %620 = arith.mulf %615, %619 : vector<2x32xf32>
    %621 = vector.extract_strided_slice %506 {offsets = [8, 0], sizes = [2, 128], strides = [1, 1]} : vector<16x128xf32> to vector<2x128xf32>
    %cst_111 = arith.constant dense<0.000000e+00> : vector<2x128xf32>
    %622 = tpu.matmul %620, %501, %cst_111 {dimension_numbers = #tpu.dot_dimension_numbers<[1], [0], [0], [1], [0, 0, 1, 1], [], []>} : vector<2x32xf32>, vector<32x128xf32>, vector<2x128xf32> -> vector<2x128xf32>
    %623 = arith.addf %621, %622 : vector<2x128xf32>
    %624 = vector.extract_strided_slice %623 {offsets = [0, 0], sizes = [2, 32], strides = [1, 1]} : vector<2x128xf32> to vector<2x32xf32>
    %625 = arith.negf %624 : vector<2x32xf32>
    %626 = math.exp %625 : vector<2x32xf32>
    %cst_112 = arith.constant 1.000000e+00 : f32
    %627 = vector.broadcast %cst_112 : f32 to vector<2x32xf32>
    %628 = arith.addf %627, %626 : vector<2x32xf32>
    %629 = arith.divf %627, %628 : vector<2x32xf32>
    %630 = vector.extract_strided_slice %623 {offsets = [0, 32], sizes = [2, 32], strides = [1, 1]} : vector<2x128xf32> to vector<2x32xf32>
    %631 = arith.negf %630 : vector<2x32xf32>
    %632 = math.exp %631 : vector<2x32xf32>
    %cst_113 = arith.constant 1.000000e+00 : f32
    %633 = vector.broadcast %cst_113 : f32 to vector<2x32xf32>
    %634 = arith.addf %633, %632 : vector<2x32xf32>
    %635 = arith.divf %633, %634 : vector<2x32xf32>
    %636 = vector.extract_strided_slice %623 {offsets = [0, 64], sizes = [2, 32], strides = [1, 1]} : vector<2x128xf32> to vector<2x32xf32>
    %637 = math.tanh %636 : vector<2x32xf32>
    %638 = vector.extract_strided_slice %623 {offsets = [0, 96], sizes = [2, 32], strides = [1, 1]} : vector<2x128xf32> to vector<2x32xf32>
    %639 = arith.negf %638 : vector<2x32xf32>
    %640 = math.exp %639 : vector<2x32xf32>
    %cst_114 = arith.constant 1.000000e+00 : f32
    %641 = vector.broadcast %cst_114 : f32 to vector<2x32xf32>
    %642 = arith.addf %641, %640 : vector<2x32xf32>
    %643 = arith.divf %641, %642 : vector<2x32xf32>
    %644 = arith.mulf %635, %618 : vector<2x32xf32>
    %645 = arith.mulf %629, %637 : vector<2x32xf32>
    %646 = arith.addf %644, %645 : vector<2x32xf32>
    %647 = math.tanh %646 : vector<2x32xf32>
    %648 = arith.mulf %643, %647 : vector<2x32xf32>
    %649 = vector.extract_strided_slice %506 {offsets = [10, 0], sizes = [2, 128], strides = [1, 1]} : vector<16x128xf32> to vector<2x128xf32>
    %cst_115 = arith.constant dense<0.000000e+00> : vector<2x128xf32>
    %650 = tpu.matmul %648, %501, %cst_115 {dimension_numbers = #tpu.dot_dimension_numbers<[1], [0], [0], [1], [0, 0, 1, 1], [], []>} : vector<2x32xf32>, vector<32x128xf32>, vector<2x128xf32> -> vector<2x128xf32>
    %651 = arith.addf %649, %650 : vector<2x128xf32>
    %652 = vector.extract_strided_slice %651 {offsets = [0, 0], sizes = [2, 32], strides = [1, 1]} : vector<2x128xf32> to vector<2x32xf32>
    %653 = arith.negf %652 : vector<2x32xf32>
    %654 = math.exp %653 : vector<2x32xf32>
    %cst_116 = arith.constant 1.000000e+00 : f32
    %655 = vector.broadcast %cst_116 : f32 to vector<2x32xf32>
    %656 = arith.addf %655, %654 : vector<2x32xf32>
    %657 = arith.divf %655, %656 : vector<2x32xf32>
    %658 = vector.extract_strided_slice %651 {offsets = [0, 32], sizes = [2, 32], strides = [1, 1]} : vector<2x128xf32> to vector<2x32xf32>
    %659 = arith.negf %658 : vector<2x32xf32>
    %660 = math.exp %659 : vector<2x32xf32>
    %cst_117 = arith.constant 1.000000e+00 : f32
    %661 = vector.broadcast %cst_117 : f32 to vector<2x32xf32>
    %662 = arith.addf %661, %660 : vector<2x32xf32>
    %663 = arith.divf %661, %662 : vector<2x32xf32>
    %664 = vector.extract_strided_slice %651 {offsets = [0, 64], sizes = [2, 32], strides = [1, 1]} : vector<2x128xf32> to vector<2x32xf32>
    %665 = math.tanh %664 : vector<2x32xf32>
    %666 = vector.extract_strided_slice %651 {offsets = [0, 96], sizes = [2, 32], strides = [1, 1]} : vector<2x128xf32> to vector<2x32xf32>
    %667 = arith.negf %666 : vector<2x32xf32>
    %668 = math.exp %667 : vector<2x32xf32>
    %cst_118 = arith.constant 1.000000e+00 : f32
    %669 = vector.broadcast %cst_118 : f32 to vector<2x32xf32>
    %670 = arith.addf %669, %668 : vector<2x32xf32>
    %671 = arith.divf %669, %670 : vector<2x32xf32>
    %672 = arith.mulf %663, %646 : vector<2x32xf32>
    %673 = arith.mulf %657, %665 : vector<2x32xf32>
    %674 = arith.addf %672, %673 : vector<2x32xf32>
    %675 = math.tanh %674 : vector<2x32xf32>
    %676 = arith.mulf %671, %675 : vector<2x32xf32>
    %677 = vector.extract_strided_slice %506 {offsets = [12, 0], sizes = [2, 128], strides = [1, 1]} : vector<16x128xf32> to vector<2x128xf32>
    %cst_119 = arith.constant dense<0.000000e+00> : vector<2x128xf32>
    %678 = tpu.matmul %676, %501, %cst_119 {dimension_numbers = #tpu.dot_dimension_numbers<[1], [0], [0], [1], [0, 0, 1, 1], [], []>} : vector<2x32xf32>, vector<32x128xf32>, vector<2x128xf32> -> vector<2x128xf32>
    %679 = arith.addf %677, %678 : vector<2x128xf32>
    %680 = vector.extract_strided_slice %679 {offsets = [0, 0], sizes = [2, 32], strides = [1, 1]} : vector<2x128xf32> to vector<2x32xf32>
    %681 = arith.negf %680 : vector<2x32xf32>
    %682 = math.exp %681 : vector<2x32xf32>
    %cst_120 = arith.constant 1.000000e+00 : f32
    %683 = vector.broadcast %cst_120 : f32 to vector<2x32xf32>
    %684 = arith.addf %683, %682 : vector<2x32xf32>
    %685 = arith.divf %683, %684 : vector<2x32xf32>
    %686 = vector.extract_strided_slice %679 {offsets = [0, 32], sizes = [2, 32], strides = [1, 1]} : vector<2x128xf32> to vector<2x32xf32>
    %687 = arith.negf %686 : vector<2x32xf32>
    %688 = math.exp %687 : vector<2x32xf32>
    %cst_121 = arith.constant 1.000000e+00 : f32
    %689 = vector.broadcast %cst_121 : f32 to vector<2x32xf32>
    %690 = arith.addf %689, %688 : vector<2x32xf32>
    %691 = arith.divf %689, %690 : vector<2x32xf32>
    %692 = vector.extract_strided_slice %679 {offsets = [0, 64], sizes = [2, 32], strides = [1, 1]} : vector<2x128xf32> to vector<2x32xf32>
    %693 = math.tanh %692 : vector<2x32xf32>
    %694 = vector.extract_strided_slice %679 {offsets = [0, 96], sizes = [2, 32], strides = [1, 1]} : vector<2x128xf32> to vector<2x32xf32>
    %695 = arith.negf %694 : vector<2x32xf32>
    %696 = math.exp %695 : vector<2x32xf32>
    %cst_122 = arith.constant 1.000000e+00 : f32
    %697 = vector.broadcast %cst_122 : f32 to vector<2x32xf32>
    %698 = arith.addf %697, %696 : vector<2x32xf32>
    %699 = arith.divf %697, %698 : vector<2x32xf32>
    %700 = arith.mulf %691, %674 : vector<2x32xf32>
    %701 = arith.mulf %685, %693 : vector<2x32xf32>
    %702 = arith.addf %700, %701 : vector<2x32xf32>
    %703 = math.tanh %702 : vector<2x32xf32>
    %704 = arith.mulf %699, %703 : vector<2x32xf32>
    %705 = vector.extract_strided_slice %506 {offsets = [14, 0], sizes = [2, 128], strides = [1, 1]} : vector<16x128xf32> to vector<2x128xf32>
    %cst_123 = arith.constant dense<0.000000e+00> : vector<2x128xf32>
    %706 = tpu.matmul %704, %501, %cst_123 {dimension_numbers = #tpu.dot_dimension_numbers<[1], [0], [0], [1], [0, 0, 1, 1], [], []>} : vector<2x32xf32>, vector<32x128xf32>, vector<2x128xf32> -> vector<2x128xf32>
    %707 = arith.addf %705, %706 : vector<2x128xf32>
    %708 = vector.extract_strided_slice %707 {offsets = [0, 0], sizes = [2, 32], strides = [1, 1]} : vector<2x128xf32> to vector<2x32xf32>
    %709 = arith.negf %708 : vector<2x32xf32>
    %710 = math.exp %709 : vector<2x32xf32>
    %cst_124 = arith.constant 1.000000e+00 : f32
    %711 = vector.broadcast %cst_124 : f32 to vector<2x32xf32>
    %712 = arith.addf %711, %710 : vector<2x32xf32>
    %713 = arith.divf %711, %712 : vector<2x32xf32>
    %714 = vector.extract_strided_slice %707 {offsets = [0, 32], sizes = [2, 32], strides = [1, 1]} : vector<2x128xf32> to vector<2x32xf32>
    %715 = arith.negf %714 : vector<2x32xf32>
    %716 = math.exp %715 : vector<2x32xf32>
    %cst_125 = arith.constant 1.000000e+00 : f32
    %717 = vector.broadcast %cst_125 : f32 to vector<2x32xf32>
    %718 = arith.addf %717, %716 : vector<2x32xf32>
    %719 = arith.divf %717, %718 : vector<2x32xf32>
    %720 = vector.extract_strided_slice %707 {offsets = [0, 64], sizes = [2, 32], strides = [1, 1]} : vector<2x128xf32> to vector<2x32xf32>
    %721 = math.tanh %720 : vector<2x32xf32>
    %722 = vector.extract_strided_slice %707 {offsets = [0, 96], sizes = [2, 32], strides = [1, 1]} : vector<2x128xf32> to vector<2x32xf32>
    %723 = arith.negf %722 : vector<2x32xf32>
    %724 = math.exp %723 : vector<2x32xf32>
    %cst_126 = arith.constant 1.000000e+00 : f32
    %725 = vector.broadcast %cst_126 : f32 to vector<2x32xf32>
    %726 = arith.addf %725, %724 : vector<2x32xf32>
    %727 = arith.divf %725, %726 : vector<2x32xf32>
    %728 = arith.mulf %719, %702 : vector<2x32xf32>
    %729 = arith.mulf %713, %721 : vector<2x32xf32>
    %730 = arith.addf %728, %729 : vector<2x32xf32>
    %731 = math.tanh %730 : vector<2x32xf32>
    %732 = arith.mulf %727, %731 : vector<2x32xf32>
    %c0_127 = arith.constant 0 : index
    %c0_128 = arith.constant 0 : index
    %733 = vector.load %arg11[%c0_127, %c0_128] : memref<32x128xf32, #tpu.memory_space<vmem>>, vector<32x128xf32>
    %c0_129 = arith.constant 0 : index
    %c0_130 = arith.constant 0 : index
    %734 = vector.load %arg12[%c0_129, %c0_130] : memref<32x128xf32, #tpu.memory_space<vmem>>, vector<32x128xf32>
    %c0_131 = arith.constant 0 : index
    %c0_132 = arith.constant 0 : index
    %735 = vector.load %arg13[%c0_131, %c0_132] : memref<1x128xf32, #tpu.memory_space<vmem>>, vector<1x128xf32>
    %736 = tpu.concatenate %536, %564, %592, %620, %648, %676, %704, %732 in 0 : vector<2x32xf32>, vector<2x32xf32>, vector<2x32xf32>, vector<2x32xf32>, vector<2x32xf32>, vector<2x32xf32>, vector<2x32xf32>, vector<2x32xf32> -> vector<16x32xf32>
    %cst_133 = arith.constant dense<0.000000e+00> : vector<16x128xf32>
    %737 = tpu.matmul %736, %733, %cst_133 {dimension_numbers = #tpu.dot_dimension_numbers<[1], [0], [0], [1], [0, 0, 1, 1], [], []>} : vector<16x32xf32>, vector<32x128xf32>, vector<16x128xf32> -> vector<16x128xf32>
    %738 = vector.broadcast %735 : vector<1x128xf32> to vector<16x128xf32>
    %739 = arith.addf %737, %738 : vector<16x128xf32>
    %cst_134 = arith.constant 0.000000e+00 : f32
    %740 = vector.broadcast %cst_134 : f32 to vector<2x32xf32>
    %cst_135 = arith.constant 0.000000e+00 : f32
    %741 = vector.broadcast %cst_135 : f32 to vector<2x32xf32>
    %742 = vector.extract_strided_slice %739 {offsets = [0, 0], sizes = [2, 128], strides = [1, 1]} : vector<16x128xf32> to vector<2x128xf32>
    %cst_136 = arith.constant dense<0.000000e+00> : vector<2x128xf32>
    %743 = tpu.matmul %740, %734, %cst_136 {dimension_numbers = #tpu.dot_dimension_numbers<[1], [0], [0], [1], [0, 0, 1, 1], [], []>} : vector<2x32xf32>, vector<32x128xf32>, vector<2x128xf32> -> vector<2x128xf32>
    %744 = arith.addf %742, %743 : vector<2x128xf32>
    %745 = vector.extract_strided_slice %744 {offsets = [0, 0], sizes = [2, 32], strides = [1, 1]} : vector<2x128xf32> to vector<2x32xf32>
    %746 = arith.negf %745 : vector<2x32xf32>
    %747 = math.exp %746 : vector<2x32xf32>
    %cst_137 = arith.constant 1.000000e+00 : f32
    %748 = vector.broadcast %cst_137 : f32 to vector<2x32xf32>
    %749 = arith.addf %748, %747 : vector<2x32xf32>
    %750 = arith.divf %748, %749 : vector<2x32xf32>
    %751 = vector.extract_strided_slice %744 {offsets = [0, 32], sizes = [2, 32], strides = [1, 1]} : vector<2x128xf32> to vector<2x32xf32>
    %752 = arith.negf %751 : vector<2x32xf32>
    %753 = math.exp %752 : vector<2x32xf32>
    %cst_138 = arith.constant 1.000000e+00 : f32
    %754 = vector.broadcast %cst_138 : f32 to vector<2x32xf32>
    %755 = arith.addf %754, %753 : vector<2x32xf32>
    %756 = arith.divf %754, %755 : vector<2x32xf32>
    %757 = vector.extract_strided_slice %744 {offsets = [0, 64], sizes = [2, 32], strides = [1, 1]} : vector<2x128xf32> to vector<2x32xf32>
    %758 = math.tanh %757 : vector<2x32xf32>
    %759 = vector.extract_strided_slice %744 {offsets = [0, 96], sizes = [2, 32], strides = [1, 1]} : vector<2x128xf32> to vector<2x32xf32>
    %760 = arith.negf %759 : vector<2x32xf32>
    %761 = math.exp %760 : vector<2x32xf32>
    %cst_139 = arith.constant 1.000000e+00 : f32
    %762 = vector.broadcast %cst_139 : f32 to vector<2x32xf32>
    %763 = arith.addf %762, %761 : vector<2x32xf32>
    %764 = arith.divf %762, %763 : vector<2x32xf32>
    %765 = arith.mulf %756, %741 : vector<2x32xf32>
    %766 = arith.mulf %750, %758 : vector<2x32xf32>
    %767 = arith.addf %765, %766 : vector<2x32xf32>
    %768 = math.tanh %767 : vector<2x32xf32>
    %769 = arith.mulf %764, %768 : vector<2x32xf32>
    %770 = vector.extract_strided_slice %739 {offsets = [2, 0], sizes = [2, 128], strides = [1, 1]} : vector<16x128xf32> to vector<2x128xf32>
    %cst_140 = arith.constant dense<0.000000e+00> : vector<2x128xf32>
    %771 = tpu.matmul %769, %734, %cst_140 {dimension_numbers = #tpu.dot_dimension_numbers<[1], [0], [0], [1], [0, 0, 1, 1], [], []>} : vector<2x32xf32>, vector<32x128xf32>, vector<2x128xf32> -> vector<2x128xf32>
    %772 = arith.addf %770, %771 : vector<2x128xf32>
    %773 = vector.extract_strided_slice %772 {offsets = [0, 0], sizes = [2, 32], strides = [1, 1]} : vector<2x128xf32> to vector<2x32xf32>
    %774 = arith.negf %773 : vector<2x32xf32>
    %775 = math.exp %774 : vector<2x32xf32>
    %cst_141 = arith.constant 1.000000e+00 : f32
    %776 = vector.broadcast %cst_141 : f32 to vector<2x32xf32>
    %777 = arith.addf %776, %775 : vector<2x32xf32>
    %778 = arith.divf %776, %777 : vector<2x32xf32>
    %779 = vector.extract_strided_slice %772 {offsets = [0, 32], sizes = [2, 32], strides = [1, 1]} : vector<2x128xf32> to vector<2x32xf32>
    %780 = arith.negf %779 : vector<2x32xf32>
    %781 = math.exp %780 : vector<2x32xf32>
    %cst_142 = arith.constant 1.000000e+00 : f32
    %782 = vector.broadcast %cst_142 : f32 to vector<2x32xf32>
    %783 = arith.addf %782, %781 : vector<2x32xf32>
    %784 = arith.divf %782, %783 : vector<2x32xf32>
    %785 = vector.extract_strided_slice %772 {offsets = [0, 64], sizes = [2, 32], strides = [1, 1]} : vector<2x128xf32> to vector<2x32xf32>
    %786 = math.tanh %785 : vector<2x32xf32>
    %787 = vector.extract_strided_slice %772 {offsets = [0, 96], sizes = [2, 32], strides = [1, 1]} : vector<2x128xf32> to vector<2x32xf32>
    %788 = arith.negf %787 : vector<2x32xf32>
    %789 = math.exp %788 : vector<2x32xf32>
    %cst_143 = arith.constant 1.000000e+00 : f32
    %790 = vector.broadcast %cst_143 : f32 to vector<2x32xf32>
    %791 = arith.addf %790, %789 : vector<2x32xf32>
    %792 = arith.divf %790, %791 : vector<2x32xf32>
    %793 = arith.mulf %784, %767 : vector<2x32xf32>
    %794 = arith.mulf %778, %786 : vector<2x32xf32>
    %795 = arith.addf %793, %794 : vector<2x32xf32>
    %796 = math.tanh %795 : vector<2x32xf32>
    %797 = arith.mulf %792, %796 : vector<2x32xf32>
    %798 = vector.extract_strided_slice %739 {offsets = [4, 0], sizes = [2, 128], strides = [1, 1]} : vector<16x128xf32> to vector<2x128xf32>
    %cst_144 = arith.constant dense<0.000000e+00> : vector<2x128xf32>
    %799 = tpu.matmul %797, %734, %cst_144 {dimension_numbers = #tpu.dot_dimension_numbers<[1], [0], [0], [1], [0, 0, 1, 1], [], []>} : vector<2x32xf32>, vector<32x128xf32>, vector<2x128xf32> -> vector<2x128xf32>
    %800 = arith.addf %798, %799 : vector<2x128xf32>
    %801 = vector.extract_strided_slice %800 {offsets = [0, 0], sizes = [2, 32], strides = [1, 1]} : vector<2x128xf32> to vector<2x32xf32>
    %802 = arith.negf %801 : vector<2x32xf32>
    %803 = math.exp %802 : vector<2x32xf32>
    %cst_145 = arith.constant 1.000000e+00 : f32
    %804 = vector.broadcast %cst_145 : f32 to vector<2x32xf32>
    %805 = arith.addf %804, %803 : vector<2x32xf32>
    %806 = arith.divf %804, %805 : vector<2x32xf32>
    %807 = vector.extract_strided_slice %800 {offsets = [0, 32], sizes = [2, 32], strides = [1, 1]} : vector<2x128xf32> to vector<2x32xf32>
    %808 = arith.negf %807 : vector<2x32xf32>
    %809 = math.exp %808 : vector<2x32xf32>
    %cst_146 = arith.constant 1.000000e+00 : f32
    %810 = vector.broadcast %cst_146 : f32 to vector<2x32xf32>
    %811 = arith.addf %810, %809 : vector<2x32xf32>
    %812 = arith.divf %810, %811 : vector<2x32xf32>
    %813 = vector.extract_strided_slice %800 {offsets = [0, 64], sizes = [2, 32], strides = [1, 1]} : vector<2x128xf32> to vector<2x32xf32>
    %814 = math.tanh %813 : vector<2x32xf32>
    %815 = vector.extract_strided_slice %800 {offsets = [0, 96], sizes = [2, 32], strides = [1, 1]} : vector<2x128xf32> to vector<2x32xf32>
    %816 = arith.negf %815 : vector<2x32xf32>
    %817 = math.exp %816 : vector<2x32xf32>
    %cst_147 = arith.constant 1.000000e+00 : f32
    %818 = vector.broadcast %cst_147 : f32 to vector<2x32xf32>
    %819 = arith.addf %818, %817 : vector<2x32xf32>
    %820 = arith.divf %818, %819 : vector<2x32xf32>
    %821 = arith.mulf %812, %795 : vector<2x32xf32>
    %822 = arith.mulf %806, %814 : vector<2x32xf32>
    %823 = arith.addf %821, %822 : vector<2x32xf32>
    %824 = math.tanh %823 : vector<2x32xf32>
    %825 = arith.mulf %820, %824 : vector<2x32xf32>
    %826 = vector.extract_strided_slice %739 {offsets = [6, 0], sizes = [2, 128], strides = [1, 1]} : vector<16x128xf32> to vector<2x128xf32>
    %cst_148 = arith.constant dense<0.000000e+00> : vector<2x128xf32>
    %827 = tpu.matmul %825, %734, %cst_148 {dimension_numbers = #tpu.dot_dimension_numbers<[1], [0], [0], [1], [0, 0, 1, 1], [], []>} : vector<2x32xf32>, vector<32x128xf32>, vector<2x128xf32> -> vector<2x128xf32>
    %828 = arith.addf %826, %827 : vector<2x128xf32>
    %829 = vector.extract_strided_slice %828 {offsets = [0, 0], sizes = [2, 32], strides = [1, 1]} : vector<2x128xf32> to vector<2x32xf32>
    %830 = arith.negf %829 : vector<2x32xf32>
    %831 = math.exp %830 : vector<2x32xf32>
    %cst_149 = arith.constant 1.000000e+00 : f32
    %832 = vector.broadcast %cst_149 : f32 to vector<2x32xf32>
    %833 = arith.addf %832, %831 : vector<2x32xf32>
    %834 = arith.divf %832, %833 : vector<2x32xf32>
    %835 = vector.extract_strided_slice %828 {offsets = [0, 32], sizes = [2, 32], strides = [1, 1]} : vector<2x128xf32> to vector<2x32xf32>
    %836 = arith.negf %835 : vector<2x32xf32>
    %837 = math.exp %836 : vector<2x32xf32>
    %cst_150 = arith.constant 1.000000e+00 : f32
    %838 = vector.broadcast %cst_150 : f32 to vector<2x32xf32>
    %839 = arith.addf %838, %837 : vector<2x32xf32>
    %840 = arith.divf %838, %839 : vector<2x32xf32>
    %841 = vector.extract_strided_slice %828 {offsets = [0, 64], sizes = [2, 32], strides = [1, 1]} : vector<2x128xf32> to vector<2x32xf32>
    %842 = math.tanh %841 : vector<2x32xf32>
    %843 = vector.extract_strided_slice %828 {offsets = [0, 96], sizes = [2, 32], strides = [1, 1]} : vector<2x128xf32> to vector<2x32xf32>
    %844 = arith.negf %843 : vector<2x32xf32>
    %845 = math.exp %844 : vector<2x32xf32>
    %cst_151 = arith.constant 1.000000e+00 : f32
    %846 = vector.broadcast %cst_151 : f32 to vector<2x32xf32>
    %847 = arith.addf %846, %845 : vector<2x32xf32>
    %848 = arith.divf %846, %847 : vector<2x32xf32>
    %849 = arith.mulf %840, %823 : vector<2x32xf32>
    %850 = arith.mulf %834, %842 : vector<2x32xf32>
    %851 = arith.addf %849, %850 : vector<2x32xf32>
    %852 = math.tanh %851 : vector<2x32xf32>
    %853 = arith.mulf %848, %852 : vector<2x32xf32>
    %854 = vector.extract_strided_slice %739 {offsets = [8, 0], sizes = [2, 128], strides = [1, 1]} : vector<16x128xf32> to vector<2x128xf32>
    %cst_152 = arith.constant dense<0.000000e+00> : vector<2x128xf32>
    %855 = tpu.matmul %853, %734, %cst_152 {dimension_numbers = #tpu.dot_dimension_numbers<[1], [0], [0], [1], [0, 0, 1, 1], [], []>} : vector<2x32xf32>, vector<32x128xf32>, vector<2x128xf32> -> vector<2x128xf32>
    %856 = arith.addf %854, %855 : vector<2x128xf32>
    %857 = vector.extract_strided_slice %856 {offsets = [0, 0], sizes = [2, 32], strides = [1, 1]} : vector<2x128xf32> to vector<2x32xf32>
    %858 = arith.negf %857 : vector<2x32xf32>
    %859 = math.exp %858 : vector<2x32xf32>
    %cst_153 = arith.constant 1.000000e+00 : f32
    %860 = vector.broadcast %cst_153 : f32 to vector<2x32xf32>
    %861 = arith.addf %860, %859 : vector<2x32xf32>
    %862 = arith.divf %860, %861 : vector<2x32xf32>
    %863 = vector.extract_strided_slice %856 {offsets = [0, 32], sizes = [2, 32], strides = [1, 1]} : vector<2x128xf32> to vector<2x32xf32>
    %864 = arith.negf %863 : vector<2x32xf32>
    %865 = math.exp %864 : vector<2x32xf32>
    %cst_154 = arith.constant 1.000000e+00 : f32
    %866 = vector.broadcast %cst_154 : f32 to vector<2x32xf32>
    %867 = arith.addf %866, %865 : vector<2x32xf32>
    %868 = arith.divf %866, %867 : vector<2x32xf32>
    %869 = vector.extract_strided_slice %856 {offsets = [0, 64], sizes = [2, 32], strides = [1, 1]} : vector<2x128xf32> to vector<2x32xf32>
    %870 = math.tanh %869 : vector<2x32xf32>
    %871 = vector.extract_strided_slice %856 {offsets = [0, 96], sizes = [2, 32], strides = [1, 1]} : vector<2x128xf32> to vector<2x32xf32>
    %872 = arith.negf %871 : vector<2x32xf32>
    %873 = math.exp %872 : vector<2x32xf32>
    %cst_155 = arith.constant 1.000000e+00 : f32
    %874 = vector.broadcast %cst_155 : f32 to vector<2x32xf32>
    %875 = arith.addf %874, %873 : vector<2x32xf32>
    %876 = arith.divf %874, %875 : vector<2x32xf32>
    %877 = arith.mulf %868, %851 : vector<2x32xf32>
    %878 = arith.mulf %862, %870 : vector<2x32xf32>
    %879 = arith.addf %877, %878 : vector<2x32xf32>
    %880 = math.tanh %879 : vector<2x32xf32>
    %881 = arith.mulf %876, %880 : vector<2x32xf32>
    %882 = vector.extract_strided_slice %739 {offsets = [10, 0], sizes = [2, 128], strides = [1, 1]} : vector<16x128xf32> to vector<2x128xf32>
    %cst_156 = arith.constant dense<0.000000e+00> : vector<2x128xf32>
    %883 = tpu.matmul %881, %734, %cst_156 {dimension_numbers = #tpu.dot_dimension_numbers<[1], [0], [0], [1], [0, 0, 1, 1], [], []>} : vector<2x32xf32>, vector<32x128xf32>, vector<2x128xf32> -> vector<2x128xf32>
    %884 = arith.addf %882, %883 : vector<2x128xf32>
    %885 = vector.extract_strided_slice %884 {offsets = [0, 0], sizes = [2, 32], strides = [1, 1]} : vector<2x128xf32> to vector<2x32xf32>
    %886 = arith.negf %885 : vector<2x32xf32>
    %887 = math.exp %886 : vector<2x32xf32>
    %cst_157 = arith.constant 1.000000e+00 : f32
    %888 = vector.broadcast %cst_157 : f32 to vector<2x32xf32>
    %889 = arith.addf %888, %887 : vector<2x32xf32>
    %890 = arith.divf %888, %889 : vector<2x32xf32>
    %891 = vector.extract_strided_slice %884 {offsets = [0, 32], sizes = [2, 32], strides = [1, 1]} : vector<2x128xf32> to vector<2x32xf32>
    %892 = arith.negf %891 : vector<2x32xf32>
    %893 = math.exp %892 : vector<2x32xf32>
    %cst_158 = arith.constant 1.000000e+00 : f32
    %894 = vector.broadcast %cst_158 : f32 to vector<2x32xf32>
    %895 = arith.addf %894, %893 : vector<2x32xf32>
    %896 = arith.divf %894, %895 : vector<2x32xf32>
    %897 = vector.extract_strided_slice %884 {offsets = [0, 64], sizes = [2, 32], strides = [1, 1]} : vector<2x128xf32> to vector<2x32xf32>
    %898 = math.tanh %897 : vector<2x32xf32>
    %899 = vector.extract_strided_slice %884 {offsets = [0, 96], sizes = [2, 32], strides = [1, 1]} : vector<2x128xf32> to vector<2x32xf32>
    %900 = arith.negf %899 : vector<2x32xf32>
    %901 = math.exp %900 : vector<2x32xf32>
    %cst_159 = arith.constant 1.000000e+00 : f32
    %902 = vector.broadcast %cst_159 : f32 to vector<2x32xf32>
    %903 = arith.addf %902, %901 : vector<2x32xf32>
    %904 = arith.divf %902, %903 : vector<2x32xf32>
    %905 = arith.mulf %896, %879 : vector<2x32xf32>
    %906 = arith.mulf %890, %898 : vector<2x32xf32>
    %907 = arith.addf %905, %906 : vector<2x32xf32>
    %908 = math.tanh %907 : vector<2x32xf32>
    %909 = arith.mulf %904, %908 : vector<2x32xf32>
    %910 = vector.extract_strided_slice %739 {offsets = [12, 0], sizes = [2, 128], strides = [1, 1]} : vector<16x128xf32> to vector<2x128xf32>
    %cst_160 = arith.constant dense<0.000000e+00> : vector<2x128xf32>
    %911 = tpu.matmul %909, %734, %cst_160 {dimension_numbers = #tpu.dot_dimension_numbers<[1], [0], [0], [1], [0, 0, 1, 1], [], []>} : vector<2x32xf32>, vector<32x128xf32>, vector<2x128xf32> -> vector<2x128xf32>
    %912 = arith.addf %910, %911 : vector<2x128xf32>
    %913 = vector.extract_strided_slice %912 {offsets = [0, 0], sizes = [2, 32], strides = [1, 1]} : vector<2x128xf32> to vector<2x32xf32>
    %914 = arith.negf %913 : vector<2x32xf32>
    %915 = math.exp %914 : vector<2x32xf32>
    %cst_161 = arith.constant 1.000000e+00 : f32
    %916 = vector.broadcast %cst_161 : f32 to vector<2x32xf32>
    %917 = arith.addf %916, %915 : vector<2x32xf32>
    %918 = arith.divf %916, %917 : vector<2x32xf32>
    %919 = vector.extract_strided_slice %912 {offsets = [0, 32], sizes = [2, 32], strides = [1, 1]} : vector<2x128xf32> to vector<2x32xf32>
    %920 = arith.negf %919 : vector<2x32xf32>
    %921 = math.exp %920 : vector<2x32xf32>
    %cst_162 = arith.constant 1.000000e+00 : f32
    %922 = vector.broadcast %cst_162 : f32 to vector<2x32xf32>
    %923 = arith.addf %922, %921 : vector<2x32xf32>
    %924 = arith.divf %922, %923 : vector<2x32xf32>
    %925 = vector.extract_strided_slice %912 {offsets = [0, 64], sizes = [2, 32], strides = [1, 1]} : vector<2x128xf32> to vector<2x32xf32>
    %926 = math.tanh %925 : vector<2x32xf32>
    %927 = vector.extract_strided_slice %912 {offsets = [0, 96], sizes = [2, 32], strides = [1, 1]} : vector<2x128xf32> to vector<2x32xf32>
    %928 = arith.negf %927 : vector<2x32xf32>
    %929 = math.exp %928 : vector<2x32xf32>
    %cst_163 = arith.constant 1.000000e+00 : f32
    %930 = vector.broadcast %cst_163 : f32 to vector<2x32xf32>
    %931 = arith.addf %930, %929 : vector<2x32xf32>
    %932 = arith.divf %930, %931 : vector<2x32xf32>
    %933 = arith.mulf %924, %907 : vector<2x32xf32>
    %934 = arith.mulf %918, %926 : vector<2x32xf32>
    %935 = arith.addf %933, %934 : vector<2x32xf32>
    %936 = math.tanh %935 : vector<2x32xf32>
    %937 = arith.mulf %932, %936 : vector<2x32xf32>
    %938 = vector.extract_strided_slice %739 {offsets = [14, 0], sizes = [2, 128], strides = [1, 1]} : vector<16x128xf32> to vector<2x128xf32>
    %cst_164 = arith.constant dense<0.000000e+00> : vector<2x128xf32>
    %939 = tpu.matmul %937, %734, %cst_164 {dimension_numbers = #tpu.dot_dimension_numbers<[1], [0], [0], [1], [0, 0, 1, 1], [], []>} : vector<2x32xf32>, vector<32x128xf32>, vector<2x128xf32> -> vector<2x128xf32>
    %940 = arith.addf %938, %939 : vector<2x128xf32>
    %941 = vector.extract_strided_slice %940 {offsets = [0, 0], sizes = [2, 32], strides = [1, 1]} : vector<2x128xf32> to vector<2x32xf32>
    %942 = arith.negf %941 : vector<2x32xf32>
    %943 = math.exp %942 : vector<2x32xf32>
    %cst_165 = arith.constant 1.000000e+00 : f32
    %944 = vector.broadcast %cst_165 : f32 to vector<2x32xf32>
    %945 = arith.addf %944, %943 : vector<2x32xf32>
    %946 = arith.divf %944, %945 : vector<2x32xf32>
    %947 = vector.extract_strided_slice %940 {offsets = [0, 32], sizes = [2, 32], strides = [1, 1]} : vector<2x128xf32> to vector<2x32xf32>
    %948 = arith.negf %947 : vector<2x32xf32>
    %949 = math.exp %948 : vector<2x32xf32>
    %cst_166 = arith.constant 1.000000e+00 : f32
    %950 = vector.broadcast %cst_166 : f32 to vector<2x32xf32>
    %951 = arith.addf %950, %949 : vector<2x32xf32>
    %952 = arith.divf %950, %951 : vector<2x32xf32>
    %953 = vector.extract_strided_slice %940 {offsets = [0, 64], sizes = [2, 32], strides = [1, 1]} : vector<2x128xf32> to vector<2x32xf32>
    %954 = math.tanh %953 : vector<2x32xf32>
    %955 = vector.extract_strided_slice %940 {offsets = [0, 96], sizes = [2, 32], strides = [1, 1]} : vector<2x128xf32> to vector<2x32xf32>
    %956 = arith.negf %955 : vector<2x32xf32>
    %957 = math.exp %956 : vector<2x32xf32>
    %cst_167 = arith.constant 1.000000e+00 : f32
    %958 = vector.broadcast %cst_167 : f32 to vector<2x32xf32>
    %959 = arith.addf %958, %957 : vector<2x32xf32>
    %960 = arith.divf %958, %959 : vector<2x32xf32>
    %961 = arith.mulf %952, %935 : vector<2x32xf32>
    %962 = arith.mulf %946, %954 : vector<2x32xf32>
    %963 = arith.addf %961, %962 : vector<2x32xf32>
    %964 = math.tanh %963 : vector<2x32xf32>
    %965 = arith.mulf %960, %964 : vector<2x32xf32>
    %c0_168 = arith.constant 0 : index
    %c0_169 = arith.constant 0 : index
    %966 = vector.load %arg14[%c0_168, %c0_169] : memref<64x64xf32, #tpu.memory_space<vmem>>, vector<64x64xf32>
    %967 = vector.extract_strided_slice %966 {offsets = [0, 0], sizes = [32, 64], strides = [1, 1]} : vector<64x64xf32> to vector<32x64xf32>
    %cst_170 = arith.constant dense<0.000000e+00> : vector<2x64xf32>
    %968 = tpu.matmul %482, %967, %cst_170 {dimension_numbers = #tpu.dot_dimension_numbers<[1], [0], [0], [1], [0, 0, 1, 1], [], []>} : vector<2x32xf32>, vector<32x64xf32>, vector<2x64xf32> -> vector<2x64xf32>
    %969 = vector.extract_strided_slice %966 {offsets = [32, 0], sizes = [32, 64], strides = [1, 1]} : vector<64x64xf32> to vector<32x64xf32>
    %cst_171 = arith.constant dense<0.000000e+00> : vector<2x64xf32>
    %970 = tpu.matmul %965, %969, %cst_171 {dimension_numbers = #tpu.dot_dimension_numbers<[1], [0], [0], [1], [0, 0, 1, 1], [], []>} : vector<2x32xf32>, vector<32x64xf32>, vector<2x64xf32> -> vector<2x64xf32>
    %971 = arith.addf %968, %970 : vector<2x64xf32>
    %c0_172 = arith.constant 0 : index
    %c0_173 = arith.constant 0 : index
    %972 = vector.load %arg15[%c0_172, %c0_173] : memref<1x64xf32, #tpu.memory_space<vmem>>, vector<1x64xf32>
    %973 = vector.broadcast %972 : vector<1x64xf32> to vector<2x64xf32>
    %974 = arith.addf %971, %973 : vector<2x64xf32>
    %cst_174 = arith.constant 0.000000e+00 : f32
    %975 = vector.broadcast %cst_174 : f32 to vector<2x64xf32>
    %976 = arith.maximumf %974, %975 : vector<2x64xf32>
    %c0_175 = arith.constant 0 : index
    %c0_176 = arith.constant 0 : index
    %977 = vector.load %arg16[%c0_175, %c0_176] : memref<64x32xf32, #tpu.memory_space<vmem>>, vector<64x32xf32>
    %cst_177 = arith.constant dense<0.000000e+00> : vector<2x32xf32>
    %978 = tpu.matmul %976, %977, %cst_177 {dimension_numbers = #tpu.dot_dimension_numbers<[1], [0], [0], [1], [0, 0, 1, 1], [], []>} : vector<2x64xf32>, vector<64x32xf32>, vector<2x32xf32> -> vector<2x32xf32>
    %c0_178 = arith.constant 0 : index
    %c0_179 = arith.constant 0 : index
    %979 = vector.load %arg17[%c0_178, %c0_179] : memref<1x32xf32, #tpu.memory_space<vmem>>, vector<1x32xf32>
    %980 = vector.broadcast %979 : vector<1x32xf32> to vector<2x32xf32>
    %981 = arith.addf %978, %980 : vector<2x32xf32>
    %cst_180 = arith.constant 0.000000e+00 : f32
    %982 = vector.broadcast %cst_180 : f32 to vector<2x32xf32>
    %983 = arith.maximumf %981, %982 : vector<2x32xf32>
    %c0_181 = arith.constant 0 : index
    %c0_182 = arith.constant 0 : index
    %984 = vector.load %arg18[%c0_181, %c0_182] : memref<32x1xf32, #tpu.memory_space<vmem>>, vector<32x1xf32>
    %cst_183 = arith.constant dense<0.000000e+00> : vector<2x1xf32>
    %985 = tpu.matmul %983, %984, %cst_183 {dimension_numbers = #tpu.dot_dimension_numbers<[1], [0], [0], [1], [0, 0, 1, 1], [], []>} : vector<2x32xf32>, vector<32x1xf32>, vector<2x1xf32> -> vector<2x1xf32>
    %c0_184 = arith.constant 0 : index
    %c0_185 = arith.constant 0 : index
    %986 = vector.load %arg19[%c0_184, %c0_185] : memref<1x1xf32, #tpu.memory_space<vmem>>, vector<1x1xf32>
    %987 = vector.broadcast %986 : vector<1x1xf32> to vector<2x1xf32>
    %988 = arith.addf %985, %987 : vector<2x1xf32>
    %c0_186 = arith.constant 0 : index
    %c0_187 = arith.constant 0 : index
    %989 = vector.load %arg20[%c0_186, %c0_187] : memref<2x1xf32, #tpu.memory_space<vmem>>, vector<2x1xf32>
    tpu.vector_store %arg20[%c0_186, %c0_187], %988 {strides = array<i32>} : memref<2x1xf32, #tpu.memory_space<vmem>>, vector<2x1xf32>,
    return
  }
}

</mosaic_0001>

<bundles_post_ra>
// kernel: tpu_custom_call.1
= control target key start
LH: loop header
LB: loop body
LE: loop exit
PB: predicated region body
PF: predicated region fallthrough
CT: control target
= control target key end

     0   :  { %s6659_s0 = inlined_call_operand.hbm [shape: f32[2,8,16], index: 0, kind: input, shape index: {}]   ;;  %s6660_s1 = inlined_call_operand.hbm [shape: f32[2,8,8], index: 1, kind: input, shape index: {}]   ;;  %s6661_s2 = inlined_call_operand.hbm [shape: f32[16,128], index: 2, kind: input, shape index: {}]   ;;  %s6662_s3 = inlined_call_operand.vmem [shape: f32[32,128], index: 3, kind: input, shape index: {}]   ;;  %s6663_s4 = inlined_call_operand.hbm [shape: f32[1,128], index: 4, kind: input, shape index: {}]   ;;  %s6664_s5 = inlined_call_operand.vmem [shape: f32[32,128], index: 5, kind: input, shape index: {}]   ;;  %s6665_s6 = inlined_call_operand.hbm [shape: f32[32,128], index: 6, kind: input, shape index: {}]   ;;  %s6666_s7 = inlined_call_operand.hbm [shape: f32[1,128], index: 7, kind: input, shape index: {}]   ;;  %s6667_s8 = inlined_call_operand.hbm [shape: f32[8,128], index: 8, kind: input, shape index: {}]   ;;  %s6668_s9 = inlined_call_operand.hbm [shape: f32[32,128], index: 9, kind: input, shape index: {}]   ;;  %s6669_s10 = inlined_call_operand.hbm [shape: f32[1,128], index: 10, kind: input, shape index: {}]   ;;  %s6670_s11 = inlined_call_operand.hbm [shape: f32[32,128], index: 11, kind: input, shape index: {}]   ;;  %s6671_s12 = inlined_call_operand.hbm [shape: f32[32,128], index: 12, kind: input, shape index: {}]   ;;  %s6672_s13 = inlined_call_operand.hbm [shape: f32[1,128], index: 13, kind: input, shape index: {}]   ;;  %s6673_s14 = inlined_call_operand.vmem [shape: f32[64,64], index: 14, kind: input, shape index: {}]   ;;  %s6674_s15 = inlined_call_operand.hbm [shape: f32[1,64], index: 15, kind: input, shape index: {}]   ;;  %s6675_s16 = inlined_call_operand.vmem [shape: f32[64,32], index: 16, kind: input, shape index: {}]   ;;  %s6676_s17 = inlined_call_operand.vmem [shape: f32[1,32], index: 17, kind: input, shape index: {}]   ;;  %s6677_s18 = inlined_call_operand.vmem [shape: f32[32,1], index: 18, kind: input, shape index: {}]   ;;  %s6678_s19 = inlined_call_operand.<no memory space> [shape: f32[1,1], index: 19, kind: input, shape index: {}]   ;;  %s6679_s20 = inlined_call_operand.vmem [shape: f32[2,1], index: 20, kind: output, shape index: {}]  }
   0x1   :  { %6681 = sst [smem:[#allocation30_spill]] %s6659_s0  ;;  %v25_v0 = vstv %s6678_s19 }
   0x2   :  { %6682 = sst [smem:[#allocation31_spill]] %s6660_s1  ;;  %26 = vst [vmem:[#allocation2] sm:$0x1] %v25_v0 }
   0x3   :  { %6683 = sst [smem:[#allocation32_spill]] %s6661_s2 }
   0x4   :  { %6684 = sst [smem:[#allocation33_spill]] %s6662_s3 }
   0x5   :  { %6685 = sst [smem:[#allocation34_spill]] %s6663_s4 }
   0x6   :  { %27 = vsyncpa [#allocation4], 0 }
   0x7   :  { %28 = vsyncpa [#allocation6], 0 }
   0x8   :  { %29 = vsyncpa [#allocation9], 0 }
   0x9   :  { %30 = vsyncpa [#allocation12], 0 }
   0xa   :  { %31 = vsyncpa [#allocation15], 0 }
   0xb   :  { %32 = vsyncpa [#allocation18], 0 }
   0xc   :  { %33 = vsyncpa [#allocation21], 0  ;;  %s5704_s23 = smov [#allocation5]   ;;  %s5705_s2 = smov [#allocation8]  }
   0xd   :  { %s51_s24 = sshll.u32 %s5704_s23, 4  ;;  %s78_s25 = sshll.u32 %s5705_s2, 4  ;;  %s52_s24 = int_to_ptr.vmem [resolvable:$true] %s51_s24  ;;  %s79_s25 = int_to_ptr.vmem [resolvable:$true] %s78_s25 }
   0xe   :  { %s5438_s3 = scalar_lea.vmem %s52_s24, 256  ;;  %p5443_p1 = scmp.lt.s32.totalorder %s52_s24, %s52_s24 }
   0xf   :  { %p5439_p0 = scmp.ne.s32.totalorder %s52_s24, %s5438_s3  ;;  %p5444_p2 = scmp.lt.s32.totalorder %s5438_s3, %s5438_s3 }
  0x11   :  { %p5445_p3 = por %p5444_p2, %p5443_p1 }
  0x13   :  { %p5446_p4 = pnand %p5445_p3, %p5439_p0 }
  0x15   :  { %5449 = shalt.err (!%p5446_p4)
}
  0x16   :  { %s5706_s19 = smov 128   ;;  %s5707_s26 = smov 8  }
  0x17   :  { %s6686_s4 = sld [smem:[#allocation31_spill]]  ;;  %s5458_s29 = scalar_lea.vmem %s79_s25, 16 }
  0x18   :  { %p5459_p5 = scmp.ne.s32.totalorder %s79_s25, %s5458_s29  ;;  %s5462_s30 = scalar_lea.vmem %s79_s25, 32 }
  0x19   :  { %p5463_p6 = scmp.lt.s32.totalorder %s79_s25, %s79_s25  ;;  %p5464_p7 = scmp.lt.s32.totalorder %s5462_s30, %s5458_s29 }
  0x1b   :  { %p5465_p8 = por %p5464_p7, %p5463_p6 }
  0x1d   :  { %57 = dma.hbm_to_vmem [thread:$0]  %s6686_s4, 256, %s52_s24, [#allocation6], %s5706_s19, %s5706_s19, %s5707_s26  }
  0x1e   :  { %p5466_p9 = pnand %p5465_p8, %p5459_p5 }
  0x20   :  { %5469 = shalt.err (!%p5466_p9)
}
  0x21   :  { %s6687_s1 = sld [smem:[#allocation34_spill]]  ;;  %s5708_s22 = smov [#allocation11]  }
  0x22   :  { %s102_s23 = sshll.u32 %s5708_s22, 4  ;;  %s5709_s2 = smov [#allocation14]   ;;  %s103_s23 = int_to_ptr.vmem [resolvable:$true] %s102_s23 }
  0x23   :  { %s121_s3 = sshll.u32 %s5709_s2, 4  ;;  %s5478_s27 = scalar_lea.vmem %s103_s23, 16  ;;  %s122_s3 = int_to_ptr.vmem [resolvable:$true] %s121_s3 }
  0x24   :  { %p5479_p10 = scmp.ne.s32.totalorder %s103_s23, %s5478_s27  ;;  %s5482_s24 = scalar_lea.vmem %s103_s23, 32 }
  0x25   :  { %p5483_p11 = scmp.lt.s32.totalorder %s103_s23, %s103_s23  ;;  %p5484_p12 = scmp.lt.s32.totalorder %s5482_s24, %s5478_s27 }
  0x27   :  { %81 = dma.hbm_to_vmem [thread:$0]  %s6687_s1, 16, %s79_s25, [#allocation9]  }
  0x28   :  { %p5485_p13 = por %p5484_p12, %p5483_p11 }
  0x2a   :  { %p5486_p0 = pnand %p5485_p13, %p5479_p10 }
  0x2c   :  { %5489 = shalt.err (!%p5486_p0)
}
  0x2d   :  { %105 = dma.hbm_to_vmem [thread:$0]  %s6666_s7, 16, %s103_s23, [#allocation12]  }
  0x2e   :  { %s5498_s29 = scalar_lea.vmem %s122_s3, 512  ;;  %p5503_p2 = scmp.lt.s32.totalorder %s122_s3, %s122_s3 }
  0x2f   :  { %p5499_p1 = scmp.ne.s32.totalorder %s122_s3, %s5498_s29  ;;  %p5504_p3 = scmp.lt.s32.totalorder %s5498_s29, %s5498_s29 }
  0x31   :  { %p5505_p4 = por %p5504_p3, %p5503_p2 }
  0x33   :  { %p5506_p5 = pnand %p5505_p4, %p5499_p1 }
  0x35   :  { %5509 = shalt.err (!%p5506_p5)
}
  0x36   :  { %127 = dma.hbm_to_vmem [thread:$0]  %s6668_s9, 512, %s122_s3, [#allocation15], %s5706_s19, %s5706_s19, %s5707_s26  }
  0x37   :  { %s5710_s0 = smov [#allocation17]   ;;  %s5711_s1 = smov [#allocation20]  }
  0x38   :  { %s143_s21 = sshll.u32 %s5710_s0, 4  ;;  %s168_s22 = sshll.u32 %s5711_s1, 4  ;;  %s144_s21 = int_to_ptr.vmem [resolvable:$true] %s143_s21  ;;  %s169_s22 = int_to_ptr.vmem [resolvable:$true] %s168_s22 }
  0x39   :  { %s5518_s7 = scalar_lea.vmem %s144_s21, 512  ;;  %p5523_p7 = scmp.lt.s32.totalorder %s144_s21, %s144_s21 }
  0x3a   :  { %p5519_p6 = scmp.ne.s32.totalorder %s144_s21, %s5518_s7  ;;  %p5524_p8 = scmp.lt.s32.totalorder %s5518_s7, %s5518_s7 }
  0x3c   :  { %p5525_p9 = por %p5524_p8, %p5523_p7 }
  0x3e   :  { %p5526_p10 = pnand %p5525_p9, %p5519_p6 }
  0x40   :  { %5529 = shalt.err (!%p5526_p10)
}
  0x41   :  { %149 = dma.hbm_to_vmem [thread:$0]  %s6670_s11, 512, %s144_s21, [#allocation18], %s5706_s19, %s5706_s19, %s5707_s26  }
  0x42   :  { %s5538_s9 = scalar_lea.vmem %s169_s22, 16  ;;  %s5542_s3 = scalar_lea.vmem %s169_s22, 32 }
  0x43   :  { %p5539_p11 = scmp.ne.s32.totalorder %s169_s22, %s5538_s9  ;;  %p5543_p12 = scmp.lt.s32.totalorder %s169_s22, %s169_s22 }
  0x44   :  { %p5544_p13 = scmp.lt.s32.totalorder %s5542_s3, %s5538_s9 }
  0x46   :  { %p5545_p0 = por %p5544_p13, %p5543_p12 }
  0x48   :  { %p5546_p1 = pnand %p5545_p0, %p5539_p11 }
  0x4a   :  { %5549 = shalt.err (!%p5546_p1)
}
  0x4b   :  { %171 = dma.hbm_to_vmem [thread:$0]  %s6672_s13, 16, %s169_s22, [#allocation21]  }
  0x4c   :  { %s5712_s28 = smov [#allocation3]   ;;  %s5713_s29 = smov [#allocation7]  }
  0x4d   :  { %s39_s4 = sshll.u32 %s5712_s28, 4  ;;  %s63_s25 = sshll.u32 %s5713_s29, 4  ;;  %s40_s4 = int_to_ptr.vmem [resolvable:$true] %s39_s4  ;;  %s64_s25 = int_to_ptr.vmem [resolvable:$true] %s63_s25 }
  0x4e   :  { %s5558_s30 = scalar_lea.vmem %s40_s4, 256  ;;  %p5563_p3 = scmp.lt.s32.totalorder %s40_s4, %s40_s4 }
  0x4f   :  { %p5559_p2 = scmp.ne.s32.totalorder %s40_s4, %s5558_s30  ;;  %p5564_p4 = scmp.lt.s32.totalorder %s5558_s30, %s5558_s30 }
  0x51   :  { %p5565_p5 = por %p5564_p4, %p5563_p3 }
  0x53   :  { %p5566_p6 = pnand %p5565_p5, %p5559_p2 }
  0x55   :  { %5569 = shalt.err (!%p5566_p6)
}
  0x56   :  { %s6688_s21 = sld [smem:[#allocation30_spill]]  ;;  %s5578_s13 = scalar_lea.vmem %s64_s25, 256 }
  0x57   :  { %p5579_p7 = scmp.ne.s32.totalorder %s64_s25, %s5578_s13  ;;  %p5583_p8 = scmp.lt.s32.totalorder %s64_s25, %s64_s25 }
  0x58   :  { %p5584_p9 = scmp.lt.s32.totalorder %s5578_s13, %s5578_s13 }
  0x5a   :  { %p5585_p10 = por %p5584_p9, %p5583_p8 }
  0x5c   :  { %45 = dma.hbm_to_vmem [thread:$0]  %s6688_s21, 256, %s40_s4, [#allocation4], %s5706_s19, %s5706_s19, %s5707_s26  }
  0x5d   :  { %p5586_p11 = pnand %p5585_p10, %p5579_p7 }
  0x5f   :  { %5589 = shalt.err (!%p5586_p11)
}
  0x60   :  { %s6689_s7 = sld [smem:[#allocation32_spill]]  ;;  %s5714_s23 = smov [#allocation10]  }
  0x61   :  { %s89_s2 = sshll.u32 %s5714_s23, 4  ;;  %s5715_s9 = smov [#allocation13]   ;;  %s90_s2 = int_to_ptr.vmem [resolvable:$true] %s89_s2 }
  0x62   :  { %s112_s3 = sshll.u32 %s5715_s9, 4  ;;  %s5598_s27 = scalar_lea.vmem %s90_s2, 512  ;;  %s113_s3 = int_to_ptr.vmem [resolvable:$true] %s112_s3 }
  0x63   :  { %p5599_p12 = scmp.ne.s32.totalorder %s90_s2, %s5598_s27  ;;  %p5603_p13 = scmp.lt.s32.totalorder %s90_s2, %s90_s2 }
  0x64   :  { %p5604_p0 = scmp.lt.s32.totalorder %s5598_s27, %s5598_s27 }
  0x66   :  { %69 = dma.hbm_to_vmem [thread:$0]  %s6689_s7, 256, %s64_s25, [#allocation6], %s5706_s19, %s5706_s19, %s5707_s26  }
  0x67   :  { %p5605_p1 = por %p5604_p0, %p5603_p13 }
  0x69   :  { %p5606_p2 = pnand %p5605_p1, %p5599_p12 }
  0x6b   :  { %5609 = shalt.err (!%p5606_p2)
}
  0x6c   :  { %95 = dma.hbm_to_vmem [thread:$0]  %s6665_s6, 512, %s90_s2, [#allocation9], %s5706_s19, %s5706_s19, %s5707_s26  }
  0x6d   :  { %s5618_s4 = scalar_lea.vmem %s113_s3, 128  ;;  %p5623_p4 = scmp.lt.s32.totalorder %s113_s3, %s113_s3 }
  0x6e   :  { %p5619_p3 = scmp.ne.s32.totalorder %s113_s3, %s5618_s4  ;;  %p5624_p5 = scmp.lt.s32.totalorder %s5618_s4, %s5618_s4 }
  0x70   :  { %p5625_p6 = por %p5624_p5, %p5623_p4 }
  0x72   :  { %p5626_p7 = pnand %p5625_p6, %p5619_p3 }
  0x74   :  { %5629 = shalt.err (!%p5626_p7)
}
  0x75   :  { %115 = dma.hbm_to_vmem [thread:$0]  %s6667_s8, 128, %s113_s3, [#allocation12]  }
  0x76   :  { %s5716_s30 = smov [#allocation16]   ;;  %s5717_s0 = smov [#allocation19]  }
  0x77   :  { %s134_s11 = sshll.u32 %s5716_s30, 4  ;;  %s155_s21 = sshll.u32 %s5717_s0, 4  ;;  %s135_s11 = int_to_ptr.vmem [resolvable:$true] %s134_s11  ;;  %s156_s21 = int_to_ptr.vmem [resolvable:$true] %s155_s21 }
  0x78   :  { %s5638_s13 = scalar_lea.vmem %s135_s11, 16  ;;  %s5642_s6 = scalar_lea.vmem %s135_s11, 32 }
  0x79   :  { %p5639_p8 = scmp.ne.s32.totalorder %s135_s11, %s5638_s13  ;;  %p5643_p9 = scmp.lt.s32.totalorder %s135_s11, %s135_s11 }
  0x7a   :  { %p5644_p10 = scmp.lt.s32.totalorder %s5642_s6, %s5638_s13 }
  0x7c   :  { %p5645_p11 = por %p5644_p10, %p5643_p9 }
  0x7e   :  { %p5646_p12 = pnand %p5645_p11, %p5639_p8 }
  0x80   :  { %5649 = shalt.err (!%p5646_p12)
}
  0x81   :  { %137 = dma.hbm_to_vmem [thread:$0]  %s6669_s10, 16, %s135_s11, [#allocation15]  }
  0x82   :  { %s5658_s7 = scalar_lea.vmem %s156_s21, 512  ;;  %p5663_p0 = scmp.lt.s32.totalorder %s156_s21, %s156_s21 }
  0x83   :  { %p5659_p13 = scmp.ne.s32.totalorder %s156_s21, %s5658_s7  ;;  %p5664_p1 = scmp.lt.s32.totalorder %s5658_s7, %s5658_s7 }
  0x85   :  { %p5665_p2 = por %p5664_p1, %p5663_p0 }
  0x87   :  { %p5666_p3 = pnand %p5665_p2, %p5659_p13 }
  0x89   :  { %5669 = shalt.err (!%p5666_p3)
}
  0x8a   :  { %161 = dma.hbm_to_vmem [thread:$0]  %s6671_s12, 512, %s156_s21, [#allocation18], %s5706_s19, %s5706_s19, %s5707_s26  }
  0x8b   :  { %s5718_s2 = smov [#allocation22]  }
  0x8c   :  { %s180_s9 = sshll.u32 %s5718_s2, 4  ;;  %s181_s9 = int_to_ptr.vmem [resolvable:$true] %s180_s9 }
  0x8d   :  { %s5678_s3 = scalar_lea.vmem %s181_s9, 16  ;;  %s5682_s10 = scalar_lea.vmem %s181_s9, 32 }
  0x8e   :  { %p5679_p4 = scmp.ne.s32.totalorder %s181_s9, %s5678_s3  ;;  %p5683_p5 = scmp.lt.s32.totalorder %s181_s9, %s181_s9 }
  0x8f   :  { %p5684_p6 = scmp.lt.s32.totalorder %s5682_s10, %s5678_s3 }
  0x91   :  { %p5685_p7 = por %p5684_p6, %p5683_p5 }
  0x93   :  { %p5686_p8 = pnand %p5685_p7, %p5679_p4 }
  0x95   :  { %5689 = shalt.err (!%p5686_p8)
}
  0x96   :  { %183 = dma.hbm_to_vmem [thread:$0]  %s6674_s15, 16, %s181_s9, [#allocation21]  }
  0x97   :  { %5690 = dma.done.wait [#allocation4], 256  }
  0x98   :  { %5691 = vsyncadd [#allocation4], 4294967040 }
  0x99   :  { %5692 = dma.done.wait [#allocation6], 512  }
  0x9a   :  { %5693 = vsyncadd [#allocation6], 4294966784 }
  0x9b   :  { %5694 = dma.done.wait [#allocation9], 528  }
  0x9c   :  { %5695 = vsyncadd [#allocation9], 4294966768 }
  0x9d   :  { %5696 = dma.done.wait [#allocation12], 144  }
  0x9e   :  { %5697 = vsyncadd [#allocation12], 4294967152 }
  0x9f   :  { %5698 = dma.done.wait [#allocation15], 528  }
  0xa0   :  { %5699 = vsyncadd [#allocation15], 4294966768 }
  0xa1   :  { %5700 = dma.done.wait [#allocation18], 1024  }
  0xa2   :  { %5701 = vsyncadd [#allocation18], 4294966272 }
  0xa3   :  { %5702 = dma.done.wait [#allocation21], 32  }
  0xa4   :  { %5703 = vsyncadd [#allocation21], 4294967264  ;;  %v5719_v1 = vmov 0.0   ;;  %vm5720_vm0 = vmmov 0   ;;  %vm243_vm1 = vcmask 1041409   ;;  %vm248_vm2 = vcmask 1043459  }
  0xa5   :  { %4724 = vmatprep.subr.mxu1 %v5719_v1  ;;  %4732 = vmatprep.mubr.msk.f32.mxu1 %vm5720_vm0, %v5719_v1  ;;  %s6690_s19 = sld [smem:[#allocation33_spill]]  ;;  %v234_v3 = vld [vmem:[#allocation7 + $0x8] sm:$0xff]  ;;  %vm253_vm3 = vcmask 1045509   ;;  %vm258_vm4 = vcmask 1047559   ;;  %vm276_vm5 = vcmask 1041408   ;;  %v233_v5 = vld [vmem:[#allocation7] sm:$0xff] }
  0xa6   :  { %4717 = vmatprep.subr.mxu0 %v234_v3  ;;  %v231_v6 = vld [vmem:[#allocation3] sm:$0xff]  ;;  %v232_v7 = vld [vmem:[#allocation3 + $0x8] sm:$0xff]  ;;  %vm278_vm6 = vcmask 1043456   ;;  %vm280_vm7 = vcmask 1045504   ;;  %vm291_vm8 = vcmask 130048   ;;  %s5721_s11 = smov 64  }
  0xa7   :  { %4718 = vmatpush3.msra.mxu0 %v234_v3  ;;  %v242_v8 = vrot.slane %v232_v7, 7  ;;  %v246_v9 = vrot.slane %v231_v6, 7  ;;  %v247_v10 = vrot.slane %v232_v7, 6  ;;  %v251_v11 = vrot.slane %v231_v6, 6  ;;  %v4435_v39 = vld [vmem:[#allocation8] ss:$0 sm:$0xff] }
  0xa8   :  { %4719 = vmatprep.subr.mxu0 %v233_v5  ;;  %v252_v13 = vrot.slane %v232_v7, 5  ;;  %v256_v14 = vrot.slane %v231_v6, 5  ;;  %v257_v15 = vrot.slane %v232_v7, 4  ;;  %v261_v16 = vrot.slane %v231_v6, 4  ;;  %s5722_s0 = smov 32  }
  0xa9   :  { %4720 = vmatpush3.msra.mxu0 %v233_v5  ;;  %v244_v17 = vsel %vm243_vm1, %v242_v8, %v231_v6  ;;  %v249_v18 = vsel %vm248_vm2, %v247_v10, %v246_v9  ;;  %v262_v19 = vrot.slane %v232_v7, 3  ;;  %v265_v20 = vrot.slane %v231_v6, 3 }
  0xaa   :  { %v254_v22 = vsel %vm253_vm3, %v252_v13, %v251_v11  ;;  %v259_v23 = vsel %vm258_vm4, %v257_v15, %v256_v14  ;;  %v277_v24 = vsel %vm276_vm5, %v244_v17, %v249_v18  ;;  %v266_v25 = vrot.slane %v232_v7, 2  ;;  %4735 = vmatprep.subr.mxu0 %v5719_v1 }
  0xab   :  { %v5897_v2 = vld [vmem:[%s6690_s19 + $0x18] sm:$0xff]  ;;  %v5902_v4 = vld [vmem:[%s6690_s19 + $0x10] sm:$0xff]  ;;  %v5909_v12 = vld [vmem:[%s6690_s19 + $0x8] sm:$0xff]  ;;  %v279_v26 = vsel %vm278_vm6, %v277_v24, %v254_v22  ;;  %v263_v27 = vsel %vm243_vm1, %v262_v19, %v261_v16  ;;  %v269_v28 = vrot.slane %v231_v6, 2  ;;  %v270_v29 = vrot.slane %v232_v7, 1 }
  0xac   :  { %4725 = vmatpush3.msra.mxu1 %v5897_v2  ;;  %v5918_v21 = vld [vmem:[%s6690_s19] sm:$0xff]  ;;  %v281_v30 = vsel %vm280_vm7, %v279_v26, %v259_v23  ;;  %v267_v31 = vsel %vm248_vm2, %v266_v25, %v265_v20  ;;  %v273_v32 = vrot.slane %v231_v6, 1  ;;  %vm373_vm9 = vcmask 261120  }
  0xad   :  { %4726 = vmatprep.subr.mxu1 %v5719_v1  ;;  %4721 = vmatprep.mubr.msk.f32.mxu0 %vm291_vm8, %v281_v30  ;;  %v271_v33 = vsel %vm253_vm3, %v270_v29, %v269_v28  ;;  %v282_v34 = vsel %vm276_vm5, %v263_v27, %v267_v31  ;;  %vm2213_vm10 = vcmask 64512   ;;  %vm4263_vm11 = vcmask 523264  }
  0xae   :  { %4727 = vmatpush3.msra.mxu1 %v5902_v4  ;;  %v274_v35 = vsel %vm258_vm4, %v232_v7, %v273_v32  ;;  %v283_v36 = vsel %vm278_vm6, %v282_v34, %v271_v33  ;;  %vm4422_vm12 = vcmask 1024  }
  0xaf   :  { %4728 = vmatprep.subr.mxu1 %v5719_v1  ;;  %v284_v37 = vsel %vm280_vm7, %v283_v36, %v274_v35 }
  0xb0   :  { %4729 = vmatpush3.msra.mxu1 %v5909_v12  ;;  %4722 = vmatmul.mubr.msk.f32.vlgmr.msra.gmra.mxu0 %vm291_vm8, %v284_v37 }
  0xb1   :  { %4730 = vmatprep.subr.mxu1 %v5719_v1  ;;  %4736 = vmatpush3.msra.mxu0 %v5897_v2 }
  0xb2   :  { %4731 = vmatpush3.msra.mxu1 %v5918_v21  ;;  %4743 = vmatprep.mubr.msk.f32.mxu0 %vm5720_vm0, %v5719_v1 }
  0xb3   :  { %4733 = vmatmul.mubr.f32.vlgmr.msra.gmra.mxu1 %v5719_v1  ;;  %4746 = vmatprep.subr.mxu1 %v5719_v1 }
  0xb4   :  { %4754 = vmatprep.mubr.msk.f32.mxu1 %vm5720_vm0, %v5719_v1  ;;  %4747 = vmatpush3.msra.mxu1 %v5897_v2 }
  0xb5   :  { %4748 = vmatprep.subr.mxu1 %v5719_v1  ;;  %4737 = vmatprep.subr.mxu0 %v5719_v1 }
  0xb6   :  { %4749 = vmatpush3.msra.mxu1 %v5902_v4  ;;  %4738 = vmatpush3.msra.mxu0 %v5902_v4 }
  0xb7   :  { %4750 = vmatprep.subr.mxu1 %v5719_v1  ;;  %4739 = vmatprep.subr.mxu0 %v5719_v1 }
  0xb8   :  { %4751 = vmatpush3.msra.mxu1 %v5909_v12  ;;  %4740 = vmatpush3.msra.mxu0 %v5909_v12 }
  0xb9   :  { %4752 = vmatprep.subr.mxu1 %v5719_v1  ;;  %4741 = vmatprep.subr.mxu0 %v5719_v1 }
  0xba   :  { %4753 = vmatpush3.msra.mxu1 %v5918_v21  ;;  %4742 = vmatpush3.msra.mxu0 %v5918_v21 }
  0xbb   :  { %4768 = vmatprep.subr.mxu1 %v5719_v1  ;;  %4757 = vmatprep.subr.mxu0 %v5719_v1 }
 0x170   :  { %v4723_v41 = vpop.f32.mrf.mxu0 }
 0x171   :  { %v5960_v42 = vadd.f32 %v4723_v41, %v4435_v39 }
 0x172   :  { %v364_v43 = vpop.f32.mrf.mxu0 }
 0x173   :  { %v443_v38 = vpop.f32.mrf.mxu1  ;;  %v5962_v44 = vadd.f32 %v4435_v39, %v364_v43 }
 0x175   :  { %v4734_v40 = vpop.f32.mrf.mxu1  ;;  %v447_v45 = vadd.f32 %v443_v38, %v5962_v44 }
 0x177   :  { %5174 = vtanh.f32 %v447_v45  ;;  %v4438_v47 = vmul.f32 -1.442695, %v447_v45 }
 0x179   :  { %5176 = vpow2.f32 %v4438_v47 }
 0x184   :  { %v5175_v46 = vpop.eup %5174 }
 0x185   :  { %457 = vrot.lane.b32.xlu0 %v5175_v46, %s5721_s11 }
 0x186   :  { %v5177_v48 = vpop.eup %5176 }
 0x187   :  { %v451_v49 = vadd.f32 1.0, %v5177_v48 }
 0x189   :  { %5178 = vrcp.f32 %v451_v49 }
 0x196   :  { %v5179_v50 = vpop.eup %5178 }
 0x197   :  { %v455_v53 = vmul.f32 0.0, %v5179_v50 }
 0x1f7   :  { %v458_v51 = vpop.permute.xlu0 %457 }
 0x1f8   :  { %v460_v52 = vmul.f32 %v5179_v50, %v458_v51 }
 0x1fa   :  { %462 = vrot.lane.b32.xlu0 %v460_v52, %s5722_s0 }
 0x26c   :  { %v463_v54 = vpop.permute.xlu0 %462 }
 0x26d   :  { %v465_v55 = vadd.f32 %v463_v54, %v455_v53 }
 0x26f   :  { %5180 = vtanh.f32 %v465_v55  ;;  %v559_v10 = vrot.slane %v465_v55, 6 }
 0x27c   :  { %v5181_v56 = vpop.eup %5180 }
 0x27d   :  { %468 = vrot.lane.b32.xlu1 %v5181_v56, %s5721_s11 }
 0x2ef   :  { %v469_v57 = vpop.permute.xlu1 %468 }
 0x2f0   :  { %v5968_v58 = vmul.f32 %v5179_v50, %v469_v57 }
 0x2f2   :  { %473 = vrot.lane.b32.xlu1 %v5968_v58, %s5722_s0 }
 0x364   :  { %v474_v59 = vpop.permute.xlu1 %473 }
 0x365   :  { %4744 = vmatmul.mubr.msk.f32.vlgmr.msra.gmra.mxu0 %vm373_vm9, %v474_v59 }
 0x366   :  { %4758 = vmatpush3.msra.mxu0 %v5897_v2  ;;  %4765 = vmatprep.mubr.msk.f32.mxu0 %vm5720_vm0, %v5719_v1 }
 0x367   :  { %4759 = vmatprep.subr.mxu0 %v5719_v1 }
 0x368   :  { %4760 = vmatpush3.msra.mxu0 %v5902_v4 }
 0x369   :  { %4761 = vmatprep.subr.mxu0 %v5719_v1 }
 0x36a   :  { %4762 = vmatpush3.msra.mxu0 %v5909_v12 }
 0x36b   :  { %4763 = vmatprep.subr.mxu0 %v5719_v1 }
 0x36c   :  { %4764 = vmatpush3.msra.mxu0 %v5918_v21 }
 0x36d   :  { %4779 = vmatprep.subr.mxu0 %v5719_v1 }
 0x425   :  { %v543_v60 = vpop.f32.mrf.mxu0 }
 0x426   :  { %v548_v61 = vrot.slane %v543_v60, 6 }
 0x427   :  { %v4745_v62 = vpop.f32.mrf.mxu0 }
 0x428   :  { %v550_v63 = vadd.f32 %v548_v61, %v5962_v44 }
 0x42a   :  { %5182 = vtanh.f32 %v550_v63  ;;  %v4440_v3 = vmul.f32 -1.442695, %v550_v63 }
 0x42c   :  { %5184 = vpow2.f32 %v4440_v3 }
 0x437   :  { %v5183_v0 = vpop.eup %5182 }
 0x438   :  { %563 = vrot.lane.b32.xlu0 %v5183_v0, %s5721_s11 }
 0x439   :  { %v5185_v5 = vpop.eup %5184 }
 0x43a   :  { %v554_v6 = vadd.f32 1.0, %v5185_v5 }
 0x43c   :  { %5186 = vrcp.f32 %v554_v6 }
 0x449   :  { %v5187_v7 = vpop.eup %5186 }
 0x44a   :  { %v561_v11 = vmul.f32 %v5187_v7, %v559_v10 }
 0x4aa   :  { %v564_v8 = vpop.permute.xlu0 %563 }
 0x4ab   :  { %v566_v9 = vmul.f32 %v5187_v7, %v564_v8 }
 0x4ad   :  { %568 = vrot.lane.b32.xlu1 %v566_v9, %s5722_s0 }
 0x51f   :  { %v569_v13 = vpop.permute.xlu1 %568 }
 0x520   :  { %v571_v14 = vadd.f32 %v569_v13, %v561_v11 }
 0x522   :  { %5188 = vtanh.f32 %v571_v14  ;;  %v666_v32 = vrot.slane %v571_v14, 6 }
 0x52f   :  { %v5189_v15 = vpop.eup %5188 }
 0x530   :  { %574 = vrot.lane.b32.xlu0 %v5189_v15, %s5721_s11 }
 0x5a2   :  { %v575_v16 = vpop.permute.xlu0 %574 }
 0x5a3   :  { %v577_v17 = vmul.f32 %v5187_v7, %v575_v16 }
 0x5a5   :  { %v579_v18 = vrot.slane %v577_v17, 2  ;;  %v1225_v39 = vsel %vm276_vm5, %v5968_v58, %v577_v17 }
 0x5a7   :  { %580 = vrot.lane.b32.xlu1 %v579_v18, %s5722_s0 }
 0x619   :  { %v581_v19 = vpop.permute.xlu1 %580 }
 0x61a   :  { %4755 = vmatmul.mubr.msk.f32.vlgmr.msra.gmra.mxu1 %vm373_vm9, %v581_v19 }
 0x61b   :  { %4769 = vmatpush3.msra.mxu1 %v5897_v2  ;;  %4776 = vmatprep.mubr.msk.f32.mxu1 %vm5720_vm0, %v5719_v1 }
 0x61c   :  { %4770 = vmatprep.subr.mxu1 %v5719_v1 }
 0x61d   :  { %4771 = vmatpush3.msra.mxu1 %v5902_v4 }
 0x61e   :  { %4772 = vmatprep.subr.mxu1 %v5719_v1 }
 0x61f   :  { %4773 = vmatpush3.msra.mxu1 %v5909_v12 }
 0x620   :  { %4774 = vmatprep.subr.mxu1 %v5719_v1 }
 0x621   :  { %4775 = vmatpush3.msra.mxu1 %v5918_v21 }
 0x622   :  { %4790 = vmatprep.subr.mxu1 %v5719_v1 }
 0x6da   :  { %v650_v20 = vpop.f32.mrf.mxu1 }
 0x6db   :  { %v655_v22 = vrot.slane %v650_v20, 4 }
 0x6dc   :  { %v4756_v23 = vpop.f32.mrf.mxu1 }
 0x6dd   :  { %v657_v24 = vadd.f32 %v655_v22, %v5962_v44 }
 0x6df   :  { %5190 = vtanh.f32 %v657_v24  ;;  %v4442_v26 = vmul.f32 -1.442695, %v657_v24 }
 0x6e1   :  { %5192 = vpow2.f32 %v4442_v26 }
 0x6ec   :  { %v5191_v25 = vpop.eup %5190 }
 0x6ed   :  { %670 = vrot.lane.b32.xlu0 %v5191_v25, %s5721_s11 }
 0x6ee   :  { %v5193_v27 = vpop.eup %5192 }
 0x6ef   :  { %v661_v28 = vadd.f32 1.0, %v5193_v27 }
 0x6f1   :  { %5194 = vrcp.f32 %v661_v28 }
 0x6fe   :  { %v5195_v29 = vpop.eup %5194 }
 0x6ff   :  { %v668_v33 = vmul.f32 %v5195_v29, %v666_v32 }
 0x75f   :  { %v671_v30 = vpop.permute.xlu0 %670 }
 0x760   :  { %v673_v31 = vmul.f32 %v5195_v29, %v671_v30 }
 0x762   :  { %675 = vrot.lane.b32.xlu1 %v673_v31, %s5722_s0 }
 0x7d4   :  { %v676_v34 = vpop.permute.xlu1 %675 }
 0x7d5   :  { %v678_v35 = vadd.f32 %v676_v34, %v668_v33 }
 0x7d7   :  { %5196 = vtanh.f32 %v678_v35  ;;  %v773_v56 = vrot.slane %v678_v35, 6 }
 0x7e4   :  { %v5197_v36 = vpop.eup %5196 }
 0x7e5   :  { %681 = vrot.lane.b32.xlu0 %v5197_v36, %s5721_s11 }
 0x857   :  { %v682_v37 = vpop.permute.xlu0 %681 }
 0x858   :  { %v684_v38 = vmul.f32 %v5195_v29, %v682_v37 }
 0x85a   :  { %v686_v40 = vrot.slane %v684_v38, 4  ;;  %v1226_v41 = vsel %vm278_vm6, %v1225_v39, %v684_v38 }
 0x85c   :  { %687 = vrot.lane.b32.xlu1 %v686_v40, %s5722_s0 }
 0x8ce   :  { %v688_v43 = vpop.permute.xlu1 %687 }
 0x8cf   :  { %4766 = vmatmul.mubr.msk.f32.vlgmr.msra.gmra.mxu0 %vm373_vm9, %v688_v43 }
 0x8d0   :  { %4780 = vmatpush3.msra.mxu0 %v5897_v2  ;;  %4787 = vmatprep.mubr.msk.f32.mxu0 %vm5720_vm0, %v5719_v1 }
 0x8d1   :  { %4781 = vmatprep.subr.mxu0 %v5719_v1 }
 0x8d2   :  { %4782 = vmatpush3.msra.mxu0 %v5902_v4 }
 0x8d3   :  { %4783 = vmatprep.subr.mxu0 %v5719_v1 }
 0x8d4   :  { %4784 = vmatpush3.msra.mxu0 %v5909_v12 }
 0x8d5   :  { %4785 = vmatprep.subr.mxu0 %v5719_v1 }
 0x8d6   :  { %4786 = vmatpush3.msra.mxu0 %v5918_v21 }
 0x8d7   :  { %4801 = vmatprep.subr.mxu0 %v5719_v1 }
 0x98f   :  { %v757_v45 = vpop.f32.mrf.mxu0 }
 0x990   :  { %v762_v46 = vrot.slane %v757_v45, 2 }
 0x991   :  { %v4767_v47 = vpop.f32.mrf.mxu0 }
 0x992   :  { %v764_v48 = vadd.f32 %v762_v46, %v5962_v44 }
 0x994   :  { %5198 = vtanh.f32 %v764_v48  ;;  %v4444_v50 = vmul.f32 -1.442695, %v764_v48 }
 0x996   :  { %5200 = vpow2.f32 %v4444_v50 }
 0x9a1   :  { %v5199_v49 = vpop.eup %5198 }
 0x9a2   :  { %777 = vrot.lane.b32.xlu0 %v5199_v49, %s5721_s11 }
 0x9a3   :  { %v5201_v51 = vpop.eup %5200 }
 0x9a4   :  { %v768_v52 = vadd.f32 1.0, %v5201_v51 }
 0x9a6   :  { %5202 = vrcp.f32 %v768_v52 }
 0x9b3   :  { %v5203_v53 = vpop.eup %5202 }
 0x9b4   :  { %v775_v57 = vmul.f32 %v5203_v53, %v773_v56 }
 0xa14   :  { %v778_v54 = vpop.permute.xlu0 %777 }
 0xa15   :  { %v780_v55 = vmul.f32 %v5203_v53, %v778_v54 }
 0xa17   :  { %782 = vrot.lane.b32.xlu1 %v780_v55, %s5722_s0 }
 0xa89   :  { %v783_v58 = vpop.permute.xlu1 %782 }
 0xa8a   :  { %v785_v59 = vadd.f32 %v783_v58, %v775_v57 }
 0xa8c   :  { %5204 = vtanh.f32 %v785_v59  ;;  %v877_v15 = vrot.slane %v785_v59, 6 }
 0xa99   :  { %v5205_v44 = vpop.eup %5204 }
 0xa9a   :  { %788 = vrot.lane.b32.xlu0 %v5205_v44, %s5721_s11 }
 0xb0c   :  { %v789_v60 = vpop.permute.xlu0 %788 }
 0xb0d   :  { %v791_v61 = vmul.f32 %v5203_v53, %v789_v60 }
 0xb0f   :  { %v793_v62 = vrot.slane %v791_v61, 6  ;;  %v6023_v63 = vsel %vm280_vm7, %v1226_v41, %v791_v61 }
 0xb11   :  { %794 = vrot.lane.b32.xlu1 %v793_v62, %s5722_s0 }
 0xb83   :  { %v795_v0 = vpop.permute.xlu1 %794 }
 0xb84   :  { %4777 = vmatmul.mubr.msk.f32.vlgmr.msra.gmra.mxu1 %vm373_vm9, %v795_v0 }
 0xb85   :  { %4791 = vmatpush3.msra.mxu1 %v5897_v2  ;;  %4798 = vmatprep.mubr.msk.f32.mxu1 %vm5720_vm0, %v5719_v1 }
 0xb86   :  { %4792 = vmatprep.subr.mxu1 %v5719_v1 }
 0xb87   :  { %4793 = vmatpush3.msra.mxu1 %v5902_v4 }
 0xb88   :  { %4794 = vmatprep.subr.mxu1 %v5719_v1 }
 0xb89   :  { %4795 = vmatpush3.msra.mxu1 %v5909_v12 }
 0xb8a   :  { %4796 = vmatprep.subr.mxu1 %v5719_v1 }
 0xb8b   :  { %4797 = vmatpush3.msra.mxu1 %v5918_v21 }
 0xc44   :  { %v864_v3 = vpop.f32.mrf.mxu1 }
 0xc45   :  { %v868_v5 = vadd.f32 %v864_v3, %v5960_v42 }
 0xc46   :  { %v4778_v6 = vpop.f32.mrf.mxu1 }
 0xc47   :  { %5206 = vtanh.f32 %v868_v5  ;;  %v4446_v8 = vmul.f32 -1.442695, %v868_v5 }
 0xc49   :  { %5208 = vpow2.f32 %v4446_v8 }
 0xc54   :  { %v5207_v7 = vpop.eup %5206 }
 0xc55   :  { %881 = vrot.lane.b32.xlu0 %v5207_v7, %s5721_s11 }
 0xc56   :  { %v5209_v9 = vpop.eup %5208 }
 0xc57   :  { %v872_v10 = vadd.f32 1.0, %v5209_v9 }
 0xc59   :  { %5210 = vrcp.f32 %v872_v10 }
 0xc66   :  { %v5211_v11 = vpop.eup %5210 }
 0xc67   :  { %v879_v16 = vmul.f32 %v5211_v11, %v877_v15 }
 0xcc7   :  { %v882_v13 = vpop.permute.xlu0 %881 }
 0xcc8   :  { %v884_v14 = vmul.f32 %v5211_v11, %v882_v13 }
 0xcca   :  { %886 = vrot.lane.b32.xlu1 %v884_v14, %s5722_s0 }
 0xd3c   :  { %v887_v17 = vpop.permute.xlu1 %886 }
 0xd3d   :  { %v889_v18 = vadd.f32 %v887_v17, %v879_v16 }
 0xd3f   :  { %5212 = vtanh.f32 %v889_v18 }
 0xd4c   :  { %v5213_v19 = vpop.eup %5212 }
 0xd4d   :  { %892 = vrot.lane.b32.xlu0 %v5213_v19, %s5721_s11  ;;  %v1219_v19 = vld [vmem:[%s6664_s5 + $0x18] sm:$0xff] }
 0xd4e   :  { %4812 = vmatprep.subr.mxu1 %v1219_v19 }
 0xdbf   :  { %v893_v20 = vpop.permute.xlu0 %892 }
 0xdc0   :  { %v6040_v22 = vmul.f32 %v5211_v11, %v893_v20  ;;  %v1218_v20 = vld [vmem:[%s6664_s5 + $0x10] sm:$0xff] }
 0xdc2   :  { %897 = vrot.lane.b32.xlu1 %v6040_v22, %s5722_s0 }
 0xe34   :  { %v898_v23 = vpop.permute.xlu1 %897 }
 0xe35   :  { %4788 = vmatmul.mubr.msk.f32.vlgmr.msra.gmra.mxu0 %vm373_vm9, %v898_v23  ;;  %v1217_v23 = vld [vmem:[%s6664_s5 + $0x8] sm:$0xff] }
 0xe36   :  { %4802 = vmatpush3.msra.mxu0 %v5897_v2  ;;  %4809 = vmatprep.mubr.msk.f32.mxu0 %vm5720_vm0, %v5719_v1 }
 0xe37   :  { %4803 = vmatprep.subr.mxu0 %v5719_v1 }
 0xe38   :  { %4804 = vmatpush3.msra.mxu0 %v5902_v4 }
 0xe39   :  { %4805 = vmatprep.subr.mxu0 %v5719_v1 }
 0xe3a   :  { %4806 = vmatpush3.msra.mxu0 %v5909_v12 }
 0xe3b   :  { %4807 = vmatprep.subr.mxu0 %v5719_v1 }
 0xe3c   :  { %4808 = vmatpush3.msra.mxu0 %v5918_v21  ;;  %v983_v21 = vrot.slane %v889_v18, 6 }
 0xe3d   :  { %4823 = vmatprep.subr.mxu0 %v5719_v1 }
 0xef5   :  { %v967_v24 = vpop.f32.mrf.mxu0 }
 0xef6   :  { %v972_v25 = vrot.slane %v967_v24, 6  ;;  %v6095_v24 = vld [vmem:[#allocation10 + $0x8] sm:$0xff] }
 0xef7   :  { %v4789_v2 = vpop.f32.mrf.mxu0 }
 0xef8   :  { %v974_v26 = vadd.f32 %v972_v25, %v5960_v42  ;;  %v1216_v25 = vld [vmem:[%s6664_s5] sm:$0xff] }
 0xefa   :  { %5214 = vtanh.f32 %v974_v26  ;;  %v4448_v4 = vmul.f32 -1.442695, %v974_v26  ;;  %v6106_v26 = vld [vmem:[#allocation10] sm:$0xff] }
 0xefc   :  { %5216 = vpow2.f32 %v4448_v4 }
 0xf07   :  { %v5215_v27 = vpop.eup %5214 }
 0xf08   :  { %987 = vrot.lane.b32.xlu0 %v5215_v27, %s5721_s11 }
 0xf09   :  { %v5217_v28 = vpop.eup %5216 }
 0xf0a   :  { %v978_v29 = vadd.f32 1.0, %v5217_v28 }
 0xf0c   :  { %5218 = vrcp.f32 %v978_v29 }
 0xf19   :  { %v5219_v12 = vpop.eup %5218 }
 0xf1a   :  { %v985_v32 = vmul.f32 %v5219_v12, %v983_v21 }
 0xf7a   :  { %v988_v30 = vpop.permute.xlu0 %987 }
 0xf7b   :  { %v990_v31 = vmul.f32 %v5219_v12, %v988_v30 }
 0xf7d   :  { %992 = vrot.lane.b32.xlu1 %v990_v31, %s5722_s0  ;;  %v4453_v31 = vld [vmem:[#allocation11] ss:$0 sm:$0xff] }
 0xfef   :  { %v993_v33 = vpop.permute.xlu1 %992 }
 0xff0   :  { %v995_v34 = vadd.f32 %v993_v33, %v985_v32 }
 0xff2   :  { %5220 = vtanh.f32 %v995_v34  ;;  %v1090_v53 = vrot.slane %v995_v34, 6 }
 0xfff   :  { %v5221_v35 = vpop.eup %5220 }
0x1000   :  { %998 = vrot.lane.b32.xlu0 %v5221_v35, %s5721_s11 }
0x1072   :  { %v999_v36 = vpop.permute.xlu0 %998 }
0x1073   :  { %v1001_v37 = vmul.f32 %v5219_v12, %v999_v36 }
0x1075   :  { %v1003_v38 = vrot.slane %v1001_v37, 2  ;;  %v1228_v44 = vsel %vm276_vm5, %v6040_v22, %v1001_v37  ;;  %v6086_v22 = vld [vmem:[#allocation10 + $0x18] sm:$0xff] }
0x1077   :  { %1004 = vrot.lane.b32.xlu1 %v1003_v38, %s5722_s0 }
0x10e9   :  { %v1005_v39 = vpop.permute.xlu1 %1004 }
0x10ea   :  { %4799 = vmatmul.mubr.msk.f32.vlgmr.msra.gmra.mxu1 %vm373_vm9, %v1005_v39 }
0x10eb   :  { %4813 = vmatpush3.msra.mxu1 %v1219_v19 }
0x10ec   :  { %4814 = vmatprep.subr.mxu1 %v1218_v20 }
0x10ed   :  { %4815 = vmatpush3.msra.mxu1 %v1218_v20 }
0x10ee   :  { %4816 = vmatprep.subr.mxu1 %v1217_v23 }
0x10ef   :  { %4817 = vmatpush3.msra.mxu1 %v1217_v23 }
0x10f0   :  { %4818 = vmatprep.subr.mxu1 %v1216_v25 }
0x10f1   :  { %4819 = vmatpush3.msra.mxu1 %v1216_v25 }
0x10f2   :  { %4834 = vmatprep.subr.mxu1 %v5719_v1 }
0x11aa   :  { %v1074_v40 = vpop.f32.mrf.mxu1 }
0x11ab   :  { %v1079_v41 = vrot.slane %v1074_v40, 4 }
0x11ac   :  { %v4800_v43 = vpop.f32.mrf.mxu1 }
0x11ad   :  { %v1081_v45 = vadd.f32 %v1079_v41, %v5960_v42 }
0x11af   :  { %5222 = vtanh.f32 %v1081_v45  ;;  %v4450_v47 = vmul.f32 -1.442695, %v1081_v45 }
0x11b1   :  { %5224 = vpow2.f32 %v4450_v47 }
0x11bc   :  { %v5223_v46 = vpop.eup %5222 }
0x11bd   :  { %1094 = vrot.lane.b32.xlu0 %v5223_v46, %s5721_s11 }
0x11be   :  { %v5225_v48 = vpop.eup %5224 }
0x11bf   :  { %v1085_v49 = vadd.f32 1.0, %v5225_v48 }
0x11c1   :  { %5226 = vrcp.f32 %v1085_v49 }
0x11ce   :  { %v5227_v50 = vpop.eup %5226 }
0x11cf   :  { %v1092_v54 = vmul.f32 %v5227_v50, %v1090_v53 }
0x122f   :  { %v1095_v51 = vpop.permute.xlu0 %1094 }
0x1230   :  { %v1097_v52 = vmul.f32 %v5227_v50, %v1095_v51 }
0x1232   :  { %1099 = vrot.lane.b32.xlu1 %v1097_v52, %s5722_s0 }
0x12a4   :  { %v1100_v55 = vpop.permute.xlu1 %1099 }
0x12a5   :  { %v1102_v56 = vadd.f32 %v1100_v55, %v1092_v54 }
0x12a7   :  { %5228 = vtanh.f32 %v1102_v56  ;;  %v1197_v15 = vrot.slane %v1102_v56, 6 }
0x12b4   :  { %v5229_v57 = vpop.eup %5228 }
0x12b5   :  { %1105 = vrot.lane.b32.xlu0 %v5229_v57, %s5721_s11 }
0x1327   :  { %v1106_v58 = vpop.permute.xlu0 %1105 }
0x1328   :  { %v1108_v59 = vmul.f32 %v5227_v50, %v1106_v58 }
0x132a   :  { %v1110_v60 = vrot.slane %v1108_v59, 4  ;;  %v6068_v61 = vsel %vm278_vm6, %v1228_v44, %v1108_v59 }
0x132c   :  { %1111 = vrot.lane.b32.xlu1 %v1110_v60, %s5722_s0 }
0x139e   :  { %v1112_v62 = vpop.permute.xlu1 %1111 }
0x139f   :  { %4810 = vmatmul.mubr.msk.f32.vlgmr.msra.gmra.mxu0 %vm373_vm9, %v1112_v62 }
0x13a0   :  { %4831 = vmatprep.mubr.msk.f32.mxu0 %vm5720_vm0, %v5719_v1  ;;  %4824 = vmatpush3.msra.mxu0 %v6086_v22 }
0x13a1   :  { %4825 = vmatprep.subr.mxu0 %v5719_v1 }
0x145f   :  { %v1181_v0 = vpop.f32.mrf.mxu0 }
0x1460   :  { %v1186_v3 = vrot.slane %v1181_v0, 2 }
0x1461   :  { %v4811_v5 = vpop.f32.mrf.mxu0 }
0x1462   :  { %v1188_v6 = vadd.f32 %v1186_v3, %v5960_v42 }
0x1464   :  { %5230 = vtanh.f32 %v1188_v6  ;;  %v4452_v8 = vmul.f32 -1.442695, %v1188_v6 }
0x1466   :  { %5232 = vpow2.f32 %v4452_v8 }
0x1471   :  { %v5231_v7 = vpop.eup %5230 }
0x1472   :  { %1201 = vrot.lane.b32.xlu0 %v5231_v7, %s5721_s11 }
0x1473   :  { %v5233_v9 = vpop.eup %5232 }
0x1474   :  { %v1192_v10 = vadd.f32 1.0, %v5233_v9 }
0x1476   :  { %5234 = vrcp.f32 %v1192_v10 }
0x1483   :  { %v5235_v11 = vpop.eup %5234 }
0x1484   :  { %v1199_v16 = vmul.f32 %v5235_v11, %v1197_v15 }
0x14e4   :  { %v1202_v13 = vpop.permute.xlu0 %1201 }
0x14e5   :  { %v1204_v14 = vmul.f32 %v5235_v11, %v1202_v13 }
0x14e7   :  { %1206 = vrot.lane.b32.xlu1 %v1204_v14, %s5722_s0 }
0x14eb   :  { %1239 = vrot.lane.b32.xlu1 %v6023_v63, %s5722_s0  ;;  %v6089_v63 = vld [vmem:[#allocation10 + $0x10] sm:$0xff] }
0x14ec   :  { %4826 = vmatpush3.msra.mxu0 %v6089_v63 }
0x14ed   :  { %4827 = vmatprep.subr.mxu0 %v5719_v1 }
0x14ee   :  { %4828 = vmatpush3.msra.mxu0 %v6095_v24 }
0x14ef   :  { %4829 = vmatprep.subr.mxu0 %v5719_v1 }
0x14f0   :  { %4830 = vmatpush3.msra.mxu0 %v6106_v26 }
0x14f1   :  { %4832 = vmatmul.mubr.f32.vlgmr.msra.gmra.mxu0 %v5719_v1  ;;  %4845 = vmatprep.subr.mxu0 %v5719_v1 }
0x14f2   :  { %4846 = vmatpush3.msra.mxu0 %v6086_v22  ;;  %4853 = vmatprep.mubr.msk.f32.mxu0 %vm5720_vm0, %v5719_v1 }
0x14f3   :  { %4847 = vmatprep.subr.mxu0 %v5719_v1 }
0x14f4   :  { %4848 = vmatpush3.msra.mxu0 %v6089_v63 }
0x14f5   :  { %4849 = vmatprep.subr.mxu0 %v5719_v1 }
0x14f6   :  { %4850 = vmatpush3.msra.mxu0 %v6095_v24 }
0x14f7   :  { %4851 = vmatprep.subr.mxu0 %v5719_v1 }
0x14f8   :  { %4852 = vmatpush3.msra.mxu0 %v6106_v26 }
0x14f9   :  { %4867 = vmatprep.subr.mxu0 %v5719_v1 }
0x1559   :  { %v1207_v42 = vpop.permute.xlu1 %1206 }
0x155a   :  { %v1209_v17 = vadd.f32 %v1207_v42, %v1199_v16 }
0x155c   :  { %5236 = vtanh.f32 %v1209_v17 }
0x155d   :  { %v1240_v18 = vpop.permute.xlu1 %1239 }
0x155e   :  { %4820 = vmatprep.mubr.msk.f32.mxu1 %vm373_vm9, %v1240_v18 }
0x1569   :  { %v5237_v2 = vpop.eup %5236 }
0x156a   :  { %1212 = vrot.lane.b32.xlu0 %v5237_v2, %s5721_s11 }
0x15b1   :  { %v1388_v12 = vpop.f32.mrf.mxu0 }
0x15b3   :  { %v4833_v30 = vpop.f32.mrf.mxu0 }
0x15dc   :  { %v1213_v27 = vpop.permute.xlu0 %1212 }
0x15dd   :  { %v1215_v4 = vmul.f32 %v5235_v11, %v1213_v27 }
0x15df   :  { %v1230_v28 = vsel %vm280_vm7, %v6068_v61, %v1215_v4 }
0x15e0   :  { %1241 = vrot.lane.b32.xlu0 %v1230_v28, %s5722_s0 }
0x1652   :  { %v1242_v29 = vpop.permute.xlu0 %1241 }
0x1653   :  { %4821 = vmatmul.mubr.msk.f32.vlgmr.msra.gmra.mxu1 %vm373_vm9, %v1242_v29 }
0x1654   :  { %4835 = vmatpush3.msra.mxu1 %v6086_v22  ;;  %4842 = vmatprep.mubr.msk.f32.mxu1 %vm5720_vm0, %v5719_v1 }
0x1655   :  { %4836 = vmatprep.subr.mxu1 %v5719_v1 }
0x1656   :  { %4837 = vmatpush3.msra.mxu1 %v6089_v63 }
0x1657   :  { %4838 = vmatprep.subr.mxu1 %v5719_v1 }
0x1658   :  { %4839 = vmatpush3.msra.mxu1 %v6095_v24 }
0x1659   :  { %4840 = vmatprep.subr.mxu1 %v5719_v1 }
0x165a   :  { %4841 = vmatpush3.msra.mxu1 %v6106_v26 }
0x165b   :  { %4856 = vmatprep.subr.mxu1 %v5719_v1 }
0x1713   :  { %v4822_v21 = vpop.f32.mrf.mxu1 }
0x1714   :  { %v6135_v32 = vadd.f32 %v4822_v21, %v4453_v31 }
0x1715   :  { %v1313_v33 = vpop.f32.mrf.mxu1 }
0x1716   :  { %v6137_v34 = vadd.f32 %v4453_v31, %v1313_v33 }
0x1718   :  { %v1392_v35 = vadd.f32 %v1388_v12, %v6137_v34 }
0x171a   :  { %5238 = vtanh.f32 %v1392_v35  ;;  %v4456_v37 = vmul.f32 -1.442695, %v1392_v35 }
0x171c   :  { %5240 = vpow2.f32 %v4456_v37 }
0x1727   :  { %v5239_v36 = vpop.eup %5238 }
0x1728   :  { %1402 = vrot.lane.b32.xlu1 %v5239_v36, %s5721_s11 }
0x1729   :  { %v5241_v38 = vpop.eup %5240 }
0x172a   :  { %v1396_v39 = vadd.f32 1.0, %v5241_v38 }
0x172c   :  { %5242 = vrcp.f32 %v1396_v39 }
0x1739   :  { %v5243_v40 = vpop.eup %5242 }
0x173a   :  { %v1400_v45 = vmul.f32 0.0, %v5243_v40 }
0x179a   :  { %v1403_v41 = vpop.permute.xlu1 %1402 }
0x179b   :  { %v1405_v43 = vmul.f32 %v5243_v40, %v1403_v41 }
0x179d   :  { %1407 = vrot.lane.b32.xlu0 %v1405_v43, %s5722_s0 }
0x180f   :  { %v1408_v46 = vpop.permute.xlu0 %1407 }
0x1810   :  { %v1410_v47 = vadd.f32 %v1408_v46, %v1400_v45 }
0x1812   :  { %5244 = vtanh.f32 %v1410_v47  ;;  %v1504_v62 = vrot.slane %v1410_v47, 6 }
0x181f   :  { %v5245_v48 = vpop.eup %5244 }
0x1820   :  { %1413 = vrot.lane.b32.xlu1 %v5245_v48, %s5721_s11 }
0x1892   :  { %v1414_v49 = vpop.permute.xlu1 %1413 }
0x1893   :  { %v1416_v50 = vmul.f32 %v5243_v40, %v1414_v49 }
0x1895   :  { %1418 = vrot.lane.b32.xlu0 %v1416_v50, %s5722_s0 }
0x1907   :  { %v1419_v51 = vpop.permute.xlu0 %1418 }
0x1908   :  { %4843 = vmatmul.mubr.msk.f32.vlgmr.msra.gmra.mxu1 %vm373_vm9, %v1419_v51 }
0x1909   :  { %4857 = vmatpush3.msra.mxu1 %v6086_v22  ;;  %4864 = vmatprep.mubr.msk.f32.mxu1 %vm5720_vm0, %v5719_v1 }
0x190a   :  { %4858 = vmatprep.subr.mxu1 %v5719_v1 }
0x190b   :  { %4859 = vmatpush3.msra.mxu1 %v6089_v63 }
0x190c   :  { %4860 = vmatprep.subr.mxu1 %v5719_v1 }
0x190d   :  { %4861 = vmatpush3.msra.mxu1 %v6095_v24 }
0x190e   :  { %4862 = vmatprep.subr.mxu1 %v5719_v1 }
0x190f   :  { %4863 = vmatpush3.msra.mxu1 %v6106_v26 }
0x1910   :  { %4878 = vmatprep.subr.mxu1 %v5719_v1 }
0x19c8   :  { %v1488_v52 = vpop.f32.mrf.mxu1 }
0x19c9   :  { %v1493_v53 = vrot.slane %v1488_v52, 6 }
0x19ca   :  { %v4844_v54 = vpop.f32.mrf.mxu1 }
0x19cb   :  { %v1495_v55 = vadd.f32 %v1493_v53, %v6137_v34 }
0x19cd   :  { %5246 = vtanh.f32 %v1495_v55  ;;  %v4458_v57 = vmul.f32 -1.442695, %v1495_v55 }
0x19cf   :  { %5248 = vpow2.f32 %v4458_v57 }
0x19da   :  { %v5247_v56 = vpop.eup %5246 }
0x19db   :  { %1508 = vrot.lane.b32.xlu1 %v5247_v56, %s5721_s11 }
0x19dc   :  { %v5249_v58 = vpop.eup %5248 }
0x19dd   :  { %v1499_v59 = vadd.f32 1.0, %v5249_v58 }
0x19df   :  { %5250 = vrcp.f32 %v1499_v59 }
0x19ec   :  { %v5251_v44 = vpop.eup %5250 }
0x19ed   :  { %v1506_v0 = vmul.f32 %v5251_v44, %v1504_v62 }
0x1a4d   :  { %v1509_v60 = vpop.permute.xlu1 %1508 }
0x1a4e   :  { %v1511_v61 = vmul.f32 %v5251_v44, %v1509_v60 }
0x1a50   :  { %1513 = vrot.lane.b32.xlu0 %v1511_v61, %s5722_s0 }
0x1ac2   :  { %v1514_v3 = vpop.permute.xlu0 %1513 }
0x1ac3   :  { %v1516_v5 = vadd.f32 %v1514_v3, %v1506_v0 }
0x1ac5   :  { %5252 = vtanh.f32 %v1516_v5  ;;  %v1611_v25 = vrot.slane %v1516_v5, 6 }
0x1ad2   :  { %v5253_v6 = vpop.eup %5252 }
0x1ad3   :  { %1519 = vrot.lane.b32.xlu1 %v5253_v6, %s5721_s11 }
0x1b45   :  { %v1520_v7 = vpop.permute.xlu1 %1519 }
0x1b46   :  { %v1522_v8 = vmul.f32 %v5251_v44, %v1520_v7 }
0x1b48   :  { %v1524_v9 = vrot.slane %v1522_v8, 2 }
0x1b4a   :  { %1525 = vrot.lane.b32.xlu0 %v1524_v9, %s5722_s0 }
0x1bbc   :  { %v1526_v10 = vpop.permute.xlu0 %1525 }
0x1bbd   :  { %4854 = vmatmul.mubr.msk.f32.vlgmr.msra.gmra.mxu0 %vm373_vm9, %v1526_v10 }
0x1bbe   :  { %4868 = vmatpush3.msra.mxu0 %v6086_v22  ;;  %4875 = vmatprep.mubr.msk.f32.mxu0 %vm5720_vm0, %v5719_v1 }
0x1bbf   :  { %4869 = vmatprep.subr.mxu0 %v5719_v1 }
0x1bc0   :  { %4870 = vmatpush3.msra.mxu0 %v6089_v63 }
0x1bc1   :  { %4871 = vmatprep.subr.mxu0 %v5719_v1 }
0x1bc2   :  { %4872 = vmatpush3.msra.mxu0 %v6095_v24 }
0x1bc3   :  { %4873 = vmatprep.subr.mxu0 %v5719_v1 }
0x1bc4   :  { %4874 = vmatpush3.msra.mxu0 %v6106_v26 }
0x1bc5   :  { %4889 = vmatprep.subr.mxu0 %v5719_v1 }
0x1c7d   :  { %v1595_v11 = vpop.f32.mrf.mxu0 }
0x1c7e   :  { %v1600_v13 = vrot.slane %v1595_v11, 4 }
0x1c7f   :  { %v4855_v14 = vpop.f32.mrf.mxu0 }
0x1c80   :  { %v1602_v15 = vadd.f32 %v1600_v13, %v6137_v34 }
0x1c82   :  { %5254 = vtanh.f32 %v1602_v15  ;;  %v4460_v42 = vmul.f32 -1.442695, %v1602_v15 }
0x1c84   :  { %5256 = vpow2.f32 %v4460_v42 }
0x1c8f   :  { %v5255_v16 = vpop.eup %5254 }
0x1c90   :  { %1615 = vrot.lane.b32.xlu1 %v5255_v16, %s5721_s11 }
0x1c91   :  { %v5257_v17 = vpop.eup %5256 }
0x1c92   :  { %v1606_v18 = vadd.f32 1.0, %v5257_v17 }
0x1c94   :  { %5258 = vrcp.f32 %v1606_v18 }
0x1ca1   :  { %v5259_v19 = vpop.eup %5258 }
0x1ca2   :  { %v1613_v2 = vmul.f32 %v5259_v19, %v1611_v25  ;;  %v2163_v25 = vld [vmem:[#allocation13] sm:$0xff] }
0x1d02   :  { %v1616_v20 = vpop.permute.xlu1 %1615 }
0x1d03   :  { %v1618_v23 = vmul.f32 %v5259_v19, %v1616_v20 }
0x1d05   :  { %1620 = vrot.lane.b32.xlu0 %v1618_v23, %s5722_s0 }
0x1d77   :  { %v1621_v27 = vpop.permute.xlu0 %1620 }
0x1d78   :  { %v1623_v4 = vadd.f32 %v1621_v27, %v1613_v2 }
0x1d7a   :  { %5260 = vtanh.f32 %v1623_v4  ;;  %v1718_v46 = vrot.slane %v1623_v4, 6 }
0x1d87   :  { %v5261_v28 = vpop.eup %5260 }
0x1d88   :  { %1626 = vrot.lane.b32.xlu1 %v5261_v28, %s5721_s11 }
0x1dfa   :  { %v1627_v29 = vpop.permute.xlu1 %1626 }
0x1dfb   :  { %v1629_v12 = vmul.f32 %v5259_v19, %v1627_v29  ;;  %v2161_v29 = vld [vmem:[#allocation5] sm:$0xff] }
0x1dfd   :  { %v1631_v30 = vrot.slane %v1629_v12, 4  ;;  %v2162_v12 = vld [vmem:[#allocation5 + $0x8] sm:$0xff] }
0x1dff   :  { %1632 = vrot.lane.b32.xlu0 %v1631_v30, %s5722_s0  ;;  %v2171_v30 = vrot.slane %v2162_v12, 7 }
0x1e71   :  { %v1633_v31 = vpop.permute.xlu0 %1632 }
0x1e72   :  { %4865 = vmatmul.mubr.msk.f32.vlgmr.msra.gmra.mxu1 %vm373_vm9, %v1633_v31  ;;  %v2174_v31 = vrot.slane %v2161_v29, 7 }
0x1e73   :  { %4879 = vmatpush3.msra.mxu1 %v6086_v22  ;;  %4886 = vmatprep.mubr.msk.f32.mxu1 %vm5720_vm0, %v5719_v1 }
0x1e74   :  { %4880 = vmatprep.subr.mxu1 %v5719_v1 }
0x1e75   :  { %4881 = vmatpush3.msra.mxu1 %v6089_v63 }
0x1e76   :  { %4882 = vmatprep.subr.mxu1 %v5719_v1 }
0x1e77   :  { %4883 = vmatpush3.msra.mxu1 %v6095_v24 }
0x1e78   :  { %4884 = vmatprep.subr.mxu1 %v5719_v1 }
0x1e79   :  { %4885 = vmatpush3.msra.mxu1 %v6106_v26 }
0x1e7a   :  { %4900 = vmatprep.subr.mxu1 %v5719_v1 }
0x1f32   :  { %v1702_v21 = vpop.f32.mrf.mxu1 }
0x1f33   :  { %v1707_v33 = vrot.slane %v1702_v21, 2  ;;  %v2175_v21 = vrot.slane %v2162_v12, 6 }
0x1f34   :  { %v4866_v35 = vpop.f32.mrf.mxu1 }
0x1f35   :  { %v1709_v36 = vadd.f32 %v1707_v33, %v6137_v34  ;;  %v2178_v33 = vrot.slane %v2161_v29, 6  ;;  %v2179_v35 = vrot.slane %v2162_v12, 5 }
0x1f37   :  { %5262 = vtanh.f32 %v1709_v36  ;;  %v4462_v38 = vmul.f32 -1.442695, %v1709_v36  ;;  %v2186_v36 = vrot.slane %v2161_v29, 4 }
0x1f39   :  { %5264 = vpow2.f32 %v4462_v38  ;;  %v2190_v38 = vrot.slane %v2161_v29, 3 }
0x1f44   :  { %v5263_v37 = vpop.eup %5262 }
0x1f45   :  { %1722 = vrot.lane.b32.xlu1 %v5263_v37, %s5721_s11  ;;  %v2187_v37 = vrot.slane %v2162_v12, 3 }
0x1f46   :  { %v5265_v39 = vpop.eup %5264 }
0x1f47   :  { %v1713_v40 = vadd.f32 1.0, %v5265_v39  ;;  %v2191_v39 = vrot.slane %v2162_v12, 2 }
0x1f49   :  { %5266 = vrcp.f32 %v1713_v40  ;;  %v2172_v40 = vsel %vm243_vm1, %v2171_v30, %v2161_v29 }
0x1f56   :  { %v5267_v41 = vpop.eup %5266 }
0x1f57   :  { %v1720_v47 = vmul.f32 %v5267_v41, %v1718_v46  ;;  %v2194_v46 = vrot.slane %v2161_v29, 2 }
0x1fb7   :  { %v1723_v43 = vpop.permute.xlu1 %1722 }
0x1fb8   :  { %v1725_v45 = vmul.f32 %v5267_v41, %v1723_v43  ;;  %v2182_v43 = vrot.slane %v2161_v29, 5 }
0x1fba   :  { %1727 = vrot.lane.b32.xlu0 %v1725_v45, %s5722_s0  ;;  %v2183_v45 = vrot.slane %v2162_v12, 4 }
0x202c   :  { %v1728_v48 = vpop.permute.xlu0 %1727 }
0x202d   :  { %v1730_v49 = vadd.f32 %v1728_v48, %v1720_v47  ;;  %v2195_v47 = vrot.slane %v2162_v12, 1  ;;  %v2180_v48 = vsel %vm253_vm3, %v2179_v35, %v2178_v33 }
0x202f   :  { %5268 = vtanh.f32 %v1730_v49  ;;  %v1822_v0 = vrot.slane %v1730_v49, 6 }
0x203c   :  { %v5269_v34 = vpop.eup %5268 }
0x203d   :  { %1733 = vrot.lane.b32.xlu1 %v5269_v34, %s5721_s11  ;;  %v2188_v34 = vsel %vm243_vm1, %v2187_v37, %v2186_v36 }
0x20af   :  { %v1734_v50 = vpop.permute.xlu1 %1733 }
0x20b0   :  { %v1736_v51 = vmul.f32 %v5267_v41, %v1734_v50  ;;  %v2176_v41 = vsel %vm248_vm2, %v2175_v21, %v2174_v31  ;;  %v2192_v50 = vsel %vm248_vm2, %v2191_v39, %v2190_v38 }
0x20b1   :  { %v2201_v49 = vsel %vm276_vm5, %v2172_v40, %v2176_v41 }
0x20b2   :  { %v1738_v52 = vrot.slane %v1736_v51, 6  ;;  %v2198_v51 = vrot.slane %v2161_v29, 1 }
0x20b4   :  { %1739 = vrot.lane.b32.xlu0 %v1738_v52, %s5722_s0  ;;  %v2184_v52 = vsel %vm258_vm4, %v2183_v45, %v2182_v43 }
0x2126   :  { %v1740_v53 = vpop.permute.xlu0 %1739 }
0x2127   :  { %4876 = vmatmul.mubr.msk.f32.vlgmr.msra.gmra.mxu0 %vm373_vm9, %v1740_v53  ;;  %v2202_v53 = vsel %vm278_vm6, %v2201_v49, %v2180_v48 }
0x2128   :  { %4890 = vmatpush3.msra.mxu0 %v6086_v22  ;;  %4897 = vmatprep.mubr.msk.f32.mxu0 %vm5720_vm0, %v5719_v1 }
0x2129   :  { %4891 = vmatprep.subr.mxu0 %v5719_v1 }
0x212a   :  { %4892 = vmatpush3.msra.mxu0 %v6089_v63 }
0x212b   :  { %4893 = vmatprep.subr.mxu0 %v5719_v1 }
0x212c   :  { %4894 = vmatpush3.msra.mxu0 %v6095_v24 }
0x212d   :  { %4895 = vmatprep.subr.mxu0 %v5719_v1 }
0x212e   :  { %4896 = vmatpush3.msra.mxu0 %v6106_v26 }
0x212f   :  { %4911 = vmatprep.subr.mxu0 %v2163_v25 }
0x21e7   :  { %v1809_v54 = vpop.f32.mrf.mxu0 }
0x21e8   :  { %v1813_v55 = vadd.f32 %v1809_v54, %v6135_v32  ;;  %v2196_v54 = vsel %vm253_vm3, %v2195_v47, %v2194_v46 }
0x21e9   :  { %v4877_v56 = vpop.f32.mrf.mxu0 }
0x21ea   :  { %5270 = vtanh.f32 %v1813_v55  ;;  %v4464_v58 = vmul.f32 -1.442695, %v1813_v55  ;;  %v2204_v55 = vsel %vm276_vm5, %v2188_v34, %v2192_v50  ;;  %v2203_v56 = vsel %vm280_vm7, %v2202_v53, %v2184_v52 }
0x21ec   :  { %5272 = vpow2.f32 %v4464_v58  ;;  %v2205_v58 = vsel %vm278_vm6, %v2204_v55, %v2196_v54 }
0x21f7   :  { %v5271_v57 = vpop.eup %5270 }
0x21f8   :  { %1826 = vrot.lane.b32.xlu1 %v5271_v57, %s5721_s11  ;;  %v2199_v57 = vsel %vm258_vm4, %v2162_v12, %v2198_v51 }
0x21f9   :  { %v5273_v59 = vpop.eup %5272 }
0x21fa   :  { %v1817_v44 = vadd.f32 1.0, %v5273_v59 }
0x21fc   :  { %5274 = vrcp.f32 %v1817_v44  ;;  %v2206_v44 = vsel %vm280_vm7, %v2205_v58, %v2199_v57 }
0x2209   :  { %v5275_v60 = vpop.eup %5274 }
0x220a   :  { %v1824_v3 = vmul.f32 %v5275_v60, %v1822_v0  ;;  %v6254_v0 = vld [vmem:[#allocation14] sm:$0xff] }
0x226a   :  { %v1827_v61 = vpop.permute.xlu1 %1826 }
0x226b   :  { %v1829_v62 = vmul.f32 %v5275_v60, %v1827_v61  ;;  %v6244_v61 = vld [vmem:[#allocation14 + $0x10] sm:$0xff] }
0x226d   :  { %1831 = vrot.lane.b32.xlu0 %v1829_v62, %s5722_s0  ;;  %v6250_v62 = vld [vmem:[#allocation14 + $0x8] sm:$0xff] }
0x22df   :  { %v1832_v5 = vpop.permute.xlu0 %1831 }
0x22e0   :  { %v1834_v6 = vadd.f32 %v1832_v5, %v1824_v3 }
0x22e2   :  { %5276 = vtanh.f32 %v1834_v6 }
0x22ef   :  { %v5277_v7 = vpop.eup %5276 }
0x22f0   :  { %1837 = vrot.lane.b32.xlu1 %v5277_v7, %s5721_s11  ;;  %v4471_v7 = vld [vmem:[#allocation16] ss:$0 sm:$0xff] }
0x2362   :  { %v1838_v8 = vpop.permute.xlu1 %1837 }
0x2363   :  { %v1840_v9 = vmul.f32 %v5275_v60, %v1838_v8  ;;  %v6242_v60 = vld [vmem:[#allocation14 + $0x18] sm:$0xff] }
0x2365   :  { %1842 = vrot.lane.b32.xlu0 %v1840_v9, %s5722_s0 }
0x23d7   :  { %v1843_v10 = vpop.permute.xlu0 %1842 }
0x23d8   :  { %4887 = vmatmul.mubr.msk.f32.vlgmr.msra.gmra.mxu1 %vm373_vm9, %v1843_v10 }
0x23d9   :  { %4901 = vmatpush3.msra.mxu1 %v6086_v22  ;;  %4908 = vmatprep.mubr.msk.f32.mxu1 %vm5720_vm0, %v5719_v1 }
0x23da   :  { %4902 = vmatprep.subr.mxu1 %v5719_v1 }
0x23db   :  { %4903 = vmatpush3.msra.mxu1 %v6089_v63 }
0x23dc   :  { %4904 = vmatprep.subr.mxu1 %v5719_v1 }
0x23dd   :  { %4905 = vmatpush3.msra.mxu1 %v6095_v24 }
0x23de   :  { %4906 = vmatprep.subr.mxu1 %v5719_v1 }
0x23df   :  { %4907 = vmatpush3.msra.mxu1 %v6106_v26  ;;  %v1928_v26 = vrot.slane %v1834_v6, 6 }
0x23e0   :  { %4927 = vmatprep.subr.mxu1 %v5719_v1 }
0x2498   :  { %v1912_v11 = vpop.f32.mrf.mxu1 }
0x2499   :  { %v1917_v13 = vrot.slane %v1912_v11, 6 }
0x249a   :  { %v4888_v22 = vpop.f32.mrf.mxu1 }
0x249b   :  { %v1919_v14 = vadd.f32 %v1917_v13, %v6135_v32 }
0x249d   :  { %5278 = vtanh.f32 %v1919_v14  ;;  %v4466_v63 = vmul.f32 -1.442695, %v1919_v14 }
0x249f   :  { %5280 = vpow2.f32 %v4466_v63 }
0x24aa   :  { %v5279_v15 = vpop.eup %5278 }
0x24ab   :  { %1932 = vrot.lane.b32.xlu1 %v5279_v15, %s5721_s11 }
0x24ac   :  { %v5281_v16 = vpop.eup %5280 }
0x24ad   :  { %v1923_v42 = vadd.f32 1.0, %v5281_v16 }
0x24af   :  { %5282 = vrcp.f32 %v1923_v42 }
0x24bc   :  { %v5283_v24 = vpop.eup %5282 }
0x24bd   :  { %v1930_v19 = vmul.f32 %v5283_v24, %v1928_v26 }
0x251d   :  { %v1933_v17 = vpop.permute.xlu1 %1932 }
0x251e   :  { %v1935_v18 = vmul.f32 %v5283_v24, %v1933_v17 }
0x2520   :  { %1937 = vrot.lane.b32.xlu0 %v1935_v18, %s5722_s0 }
0x2592   :  { %v1938_v20 = vpop.permute.xlu0 %1937 }
0x2593   :  { %v6221_v23 = vadd.f32 %v1938_v20, %v1930_v19 }
0x2595   :  { %5284 = vtanh.f32 %v6221_v23  ;;  %v2035_v29 = vrot.slane %v6221_v23, 6 }
0x25a2   :  { %v5285_v2 = vpop.eup %5284 }
0x25a3   :  { %1943 = vrot.lane.b32.xlu1 %v5285_v2, %s5721_s11 }
0x2615   :  { %v1944_v27 = vpop.permute.xlu1 %1943 }
0x2616   :  { %v1946_v4 = vmul.f32 %v5283_v24, %v1944_v27 }
0x2618   :  { %v1948_v28 = vrot.slane %v1946_v4, 2 }
0x261a   :  { %1949 = vrot.lane.b32.xlu0 %v1948_v28, %s5722_s0 }
0x268c   :  { %v1950_v59 = vpop.permute.xlu0 %1949 }
0x268d   :  { %4898 = vmatmul.mubr.msk.f32.vlgmr.msra.gmra.mxu0 %vm373_vm9, %v1950_v59 }
0x268e   :  { %4912 = vmatpush3.msra.mxu0 %v2163_v25  ;;  %4913 = vmatprep.mubr.msk.f32.mxu0 %vm2213_vm10, %v2203_v56 }
0x268f   :  { %4916 = vmatprep.subr.mxu0 %v5719_v1 }
0x2691   :  { %4914 = vmatmul.mubr.msk.f32.vlgmr.msra.gmra.mxu0 %vm2213_vm10, %v2206_v44 }
0x2692   :  { %4917 = vmatpush3.msra.mxu0 %v6242_v60  ;;  %4924 = vmatprep.mubr.msk.f32.mxu0 %vm5720_vm0, %v5719_v1 }
0x2693   :  { %4918 = vmatprep.subr.mxu0 %v5719_v1 }
0x2694   :  { %4919 = vmatpush3.msra.mxu0 %v6244_v61 }
0x2695   :  { %4920 = vmatprep.subr.mxu0 %v5719_v1 }
0x2696   :  { %4921 = vmatpush3.msra.mxu0 %v6250_v62 }
0x2697   :  { %4922 = vmatprep.subr.mxu0 %v5719_v1 }
0x2698   :  { %4923 = vmatpush3.msra.mxu0 %v6254_v0 }
0x2699   :  { %4925 = vmatmul.mubr.f32.vlgmr.msra.gmra.mxu0 %v5719_v1  ;;  %4938 = vmatprep.subr.mxu0 %v5719_v1 }
0x269a   :  { %4939 = vmatpush3.msra.mxu0 %v6242_v60  ;;  %4946 = vmatprep.mubr.msk.f32.mxu0 %vm5720_vm0, %v5719_v1 }
0x269b   :  { %4940 = vmatprep.subr.mxu0 %v5719_v1 }
0x269c   :  { %4941 = vmatpush3.msra.mxu0 %v6244_v61 }
0x269d   :  { %4942 = vmatprep.subr.mxu0 %v5719_v1 }
0x269e   :  { %4943 = vmatpush3.msra.mxu0 %v6250_v62 }
0x269f   :  { %4944 = vmatprep.subr.mxu0 %v5719_v1 }
0x26a0   :  { %4945 = vmatpush3.msra.mxu0 %v6254_v0 }
0x26a1   :  { %4960 = vmatprep.subr.mxu0 %v5719_v1 }
0x274d   :  { %v2019_v3 = vpop.f32.mrf.mxu0 }
0x274e   :  { %v2024_v5 = vrot.slane %v2019_v3, 4 }
0x274f   :  { %v4899_v6 = vpop.f32.mrf.mxu0 }
0x2750   :  { %v2026_v8 = vadd.f32 %v2024_v5, %v6135_v32 }
0x2751   :  { %v4915_v9 = vpop.f32.mrf.mxu0 }
0x2752   :  { %5286 = vtanh.f32 %v2026_v8  ;;  %v6272_v10 = vadd.f32 %v4915_v9, %v4471_v7  ;;  %v4468_v42 = vmul.f32 -1.442695, %v2026_v8 }
0x2753   :  { %v2286_v11 = vpop.f32.mrf.mxu0 }
0x2754   :  { %v6274_v13 = vadd.f32 %v4471_v7, %v2286_v11 }
0x2759   :  { %v2361_v22 = vpop.f32.mrf.mxu0 }
0x275a   :  { %v2365_v14 = vadd.f32 %v2361_v22, %v6274_v13 }
0x275b   :  { %v4926_v15 = vpop.f32.mrf.mxu0 }
0x275c   :  { %5288 = vtanh.f32 %v2365_v14  ;;  %v4474_v24 = vmul.f32 -1.442695, %v2365_v14 }
0x275d   :  { %5290 = vpow2.f32 %v4468_v42 }
0x275e   :  { %5292 = vpow2.f32 %v4474_v24 }
0x275f   :  { %v5287_v63 = vpop.eup %5286 }
0x2760   :  { %2039 = vrot.lane.b32.xlu1 %v5287_v63, %s5721_s11 }
0x2769   :  { %v5289_v16 = vpop.eup %5288 }
0x276a   :  { %2375 = vrot.lane.b32.xlu0 %v5289_v16, %s5721_s11  ;;  %v5291_v17 = vpop.eup %5290 }
0x276b   :  { %v2030_v18 = vadd.f32 1.0, %v5291_v17  ;;  %v5293_v26 = vpop.eup %5292 }
0x276c   :  { %v2369_v19 = vadd.f32 1.0, %v5293_v26 }
0x276d   :  { %5294 = vrcp.f32 %v2030_v18 }
0x276e   :  { %5296 = vrcp.f32 %v2369_v19 }
0x277a   :  { %v5295_v20 = vpop.eup %5294 }
0x277b   :  { %v5297_v27 = vpop.eup %5296  ;;  %v2037_v12 = vmul.f32 %v5295_v20, %v2035_v29 }
0x277c   :  { %v2373_v21 = vmul.f32 0.0, %v5297_v27 }
0x27d2   :  { %v2040_v25 = vpop.permute.xlu1 %2039 }
0x27d3   :  { %v2042_v2 = vmul.f32 %v5295_v20, %v2040_v25 }
0x27d5   :  { %2044 = vrot.lane.b32.xlu1 %v2042_v2, %s5722_s0 }
0x27dc   :  { %v2376_v4 = vpop.permute.xlu0 %2375 }
0x27dd   :  { %v2378_v28 = vmul.f32 %v5297_v27, %v2376_v4 }
0x27df   :  { %2380 = vrot.lane.b32.xlu0 %v2378_v28, %s5722_s0 }
0x2847   :  { %v2045_v30 = vpop.permute.xlu1 %2044 }
0x2848   :  { %v6282_v31 = vadd.f32 %v2045_v30, %v2037_v12 }
0x284a   :  { %5298 = vtanh.f32 %v6282_v31 }
0x2851   :  { %v2381_v33 = vpop.permute.xlu0 %2380 }
0x2852   :  { %v2383_v35 = vadd.f32 %v2381_v33, %v2373_v21 }
0x2854   :  { %5300 = vtanh.f32 %v2383_v35  ;;  %v2477_v58 = vrot.slane %v2383_v35, 6 }
0x2857   :  { %v5299_v36 = vpop.eup %5298 }
0x2858   :  { %2050 = vrot.lane.b32.xlu1 %v5299_v36, %s5721_s11 }
0x2861   :  { %v5301_v37 = vpop.eup %5300 }
0x2862   :  { %2386 = vrot.lane.b32.xlu0 %v5301_v37, %s5721_s11 }
0x28ca   :  { %v2051_v38 = vpop.permute.xlu1 %2050 }
0x28cb   :  { %v2053_v39 = vmul.f32 %v5295_v20, %v2051_v38 }
0x28cd   :  { %v2055_v40 = vrot.slane %v2053_v39, 4 }
0x28cf   :  { %2056 = vrot.lane.b32.xlu1 %v2055_v40, %s5722_s0 }
0x28d4   :  { %v2387_v23 = vpop.permute.xlu0 %2386 }
0x28d5   :  { %v6288_v41 = vmul.f32 %v5297_v27, %v2387_v23 }
0x28d7   :  { %2391 = vrot.lane.b32.xlu0 %v6288_v41, %s5722_s0 }
0x2941   :  { %v2057_v43 = vpop.permute.xlu1 %2056 }
0x2942   :  { %4909 = vmatmul.mubr.msk.f32.vlgmr.msra.gmra.mxu1 %vm373_vm9, %v2057_v43 }
0x2943   :  { %4928 = vmatpush3.msra.mxu1 %v6242_v60  ;;  %4935 = vmatprep.mubr.msk.f32.mxu1 %vm5720_vm0, %v5719_v1 }
0x2944   :  { %4929 = vmatprep.subr.mxu1 %v5719_v1 }
0x2945   :  { %4930 = vmatpush3.msra.mxu1 %v6244_v61 }
0x2946   :  { %4931 = vmatprep.subr.mxu1 %v5719_v1 }
0x2947   :  { %4932 = vmatpush3.msra.mxu1 %v6250_v62 }
0x2948   :  { %4933 = vmatprep.subr.mxu1 %v5719_v1 }
0x2949   :  { %4934 = vmatpush3.msra.mxu1 %v6254_v0  ;;  %v2392_v45 = vpop.permute.xlu0 %2391 }
0x294a   :  { %4936 = vmatmul.mubr.msk.f32.vlgmr.msra.gmra.mxu1 %vm373_vm9, %v2392_v45  ;;  %4949 = vmatprep.subr.mxu1 %v5719_v1 }
0x294b   :  { %4950 = vmatpush3.msra.mxu1 %v6242_v60  ;;  %4957 = vmatprep.mubr.msk.f32.mxu1 %vm5720_vm0, %v5719_v1 }
0x294c   :  { %4951 = vmatprep.subr.mxu1 %v5719_v1 }
0x294d   :  { %4952 = vmatpush3.msra.mxu1 %v6244_v61 }
0x294e   :  { %4953 = vmatprep.subr.mxu1 %v5719_v1 }
0x294f   :  { %4954 = vmatpush3.msra.mxu1 %v6250_v62 }
0x2950   :  { %4955 = vmatprep.subr.mxu1 %v5719_v1 }
0x2951   :  { %4956 = vmatpush3.msra.mxu1 %v6254_v0 }
0x2952   :  { %4971 = vmatprep.subr.mxu1 %v5719_v1 }
0x2a02   :  { %v6314_v46 = vpop.f32.mrf.mxu1 }
0x2a04   :  { %v4910_v47 = vpop.f32.mrf.mxu1 }
0x2a0a   :  { %v2461_v48 = vpop.f32.mrf.mxu1 }
0x2a0b   :  { %v2466_v49 = vrot.slane %v2461_v48, 6 }
0x2a0c   :  { %v4937_v34 = vpop.f32.mrf.mxu1 }
0x2a0d   :  { %v2468_v50 = vadd.f32 %v2466_v49, %v6274_v13 }
0x2a0f   :  { %5302 = vtanh.f32 %v2468_v50  ;;  %v4476_v52 = vmul.f32 -1.442695, %v2468_v50 }
0x2a11   :  { %5304 = vpow2.f32 %v4476_v52 }
0x2a1c   :  { %v5303_v51 = vpop.eup %5302 }
0x2a1d   :  { %2481 = vrot.lane.b32.xlu1 %v5303_v51, %s5721_s11 }
0x2a1e   :  { %v5305_v53 = vpop.eup %5304 }
0x2a1f   :  { %v2472_v54 = vadd.f32 1.0, %v5305_v53 }
0x2a21   :  { %5306 = vrcp.f32 %v2472_v54 }
0x2a2e   :  { %v5307_v55 = vpop.eup %5306 }
0x2a2f   :  { %v2479_v59 = vmul.f32 %v5307_v55, %v2477_v58 }
0x2a8f   :  { %v2482_v56 = vpop.permute.xlu1 %2481 }
0x2a90   :  { %v2484_v57 = vmul.f32 %v5307_v55, %v2482_v56 }
0x2a92   :  { %2486 = vrot.lane.b32.xlu0 %v2484_v57, %s5722_s0 }
0x2b04   :  { %v2487_v44 = vpop.permute.xlu0 %2486 }
0x2b05   :  { %v2489_v3 = vadd.f32 %v2487_v44, %v2479_v59 }
0x2b07   :  { %5308 = vtanh.f32 %v2489_v3  ;;  %v2584_v19 = vrot.slane %v2489_v3, 6 }
0x2b14   :  { %v5309_v5 = vpop.eup %5308 }
0x2b15   :  { %2492 = vrot.lane.b32.xlu1 %v5309_v5, %s5721_s11 }
0x2b87   :  { %v2493_v6 = vpop.permute.xlu1 %2492 }
0x2b88   :  { %v2495_v7 = vmul.f32 %v5307_v55, %v2493_v6 }
0x2b8a   :  { %v2497_v8 = vrot.slane %v2495_v7, 2  ;;  %v3143_v29 = vsel %vm276_vm5, %v6288_v41, %v2495_v7 }
0x2b8c   :  { %2498 = vrot.lane.b32.xlu0 %v2497_v8, %s5722_s0 }
0x2bfe   :  { %v2499_v9 = vpop.permute.xlu0 %2498 }
0x2bff   :  { %4947 = vmatmul.mubr.msk.f32.vlgmr.msra.gmra.mxu0 %vm373_vm9, %v2499_v9 }
0x2c00   :  { %4961 = vmatpush3.msra.mxu0 %v6242_v60  ;;  %4968 = vmatprep.mubr.msk.f32.mxu0 %vm5720_vm0, %v5719_v1 }
0x2c01   :  { %4962 = vmatprep.subr.mxu0 %v5719_v1 }
0x2c02   :  { %4963 = vmatpush3.msra.mxu0 %v6244_v61 }
0x2c03   :  { %4964 = vmatprep.subr.mxu0 %v5719_v1 }
0x2c04   :  { %4965 = vmatpush3.msra.mxu0 %v6250_v62 }
0x2c05   :  { %4966 = vmatprep.subr.mxu0 %v5719_v1 }
0x2c06   :  { %4967 = vmatpush3.msra.mxu0 %v6254_v0 }
0x2c07   :  { %4982 = vmatprep.subr.mxu0 %v5719_v1 }
0x2cbf   :  { %v2568_v11 = vpop.f32.mrf.mxu0 }
0x2cc0   :  { %v2573_v22 = vrot.slane %v2568_v11, 4 }
0x2cc1   :  { %v4948_v14 = vpop.f32.mrf.mxu0 }
0x2cc2   :  { %v2575_v15 = vadd.f32 %v2573_v22, %v6274_v13 }
0x2cc4   :  { %5310 = vtanh.f32 %v2575_v15  ;;  %v4478_v16 = vmul.f32 -1.442695, %v2575_v15 }
0x2cc6   :  { %5312 = vpow2.f32 %v4478_v16 }
0x2cd1   :  { %v5311_v63 = vpop.eup %5310 }
0x2cd2   :  { %2588 = vrot.lane.b32.xlu1 %v5311_v63, %s5721_s11 }
0x2cd3   :  { %v5313_v42 = vpop.eup %5312 }
0x2cd4   :  { %v2579_v24 = vadd.f32 1.0, %v5313_v42 }
0x2cd6   :  { %5314 = vrcp.f32 %v2579_v24 }
0x2ce3   :  { %v5315_v17 = vpop.eup %5314 }
0x2ce4   :  { %v2586_v20 = vmul.f32 %v5315_v17, %v2584_v19 }
0x2d44   :  { %v2589_v18 = vpop.permute.xlu1 %2588 }
0x2d45   :  { %v2591_v26 = vmul.f32 %v5315_v17, %v2589_v18 }
0x2d47   :  { %2593 = vrot.lane.b32.xlu0 %v2591_v26, %s5722_s0 }
0x2db9   :  { %v2594_v25 = vpop.permute.xlu0 %2593 }
0x2dba   :  { %v2596_v2 = vadd.f32 %v2594_v25, %v2586_v20 }
0x2dbc   :  { %5316 = vtanh.f32 %v2596_v2  ;;  %v2691_v47 = vrot.slane %v2596_v2, 6 }
0x2dc9   :  { %v5317_v27 = vpop.eup %5316 }
0x2dca   :  { %2599 = vrot.lane.b32.xlu1 %v5317_v27, %s5721_s11 }
0x2e3c   :  { %v2600_v4 = vpop.permute.xlu1 %2599 }
0x2e3d   :  { %v2602_v28 = vmul.f32 %v5315_v17, %v2600_v4 }
0x2e3f   :  { %v2604_v12 = vrot.slane %v2602_v28, 4  ;;  %v3144_v30 = vsel %vm278_vm6, %v3143_v29, %v2602_v28 }
0x2e41   :  { %2605 = vrot.lane.b32.xlu0 %v2604_v12, %s5722_s0 }
0x2eb3   :  { %v2606_v21 = vpop.permute.xlu0 %2605 }
0x2eb4   :  { %4958 = vmatmul.mubr.msk.f32.vlgmr.msra.gmra.mxu1 %vm373_vm9, %v2606_v21 }
0x2eb5   :  { %4972 = vmatpush3.msra.mxu1 %v6242_v60  ;;  %4979 = vmatprep.mubr.msk.f32.mxu1 %vm5720_vm0, %v5719_v1 }
0x2eb6   :  { %4973 = vmatprep.subr.mxu1 %v5719_v1 }
0x2eb7   :  { %4974 = vmatpush3.msra.mxu1 %v6244_v61 }
0x2eb8   :  { %4975 = vmatprep.subr.mxu1 %v5719_v1 }
0x2eb9   :  { %4976 = vmatpush3.msra.mxu1 %v6250_v62 }
0x2eba   :  { %4977 = vmatprep.subr.mxu1 %v5719_v1 }
0x2ebb   :  { %4978 = vmatpush3.msra.mxu1 %v6254_v0 }
0x2ebc   :  { %4993 = vmatprep.subr.mxu1 %v5719_v1 }
0x2f74   :  { %v2675_v33 = vpop.f32.mrf.mxu1 }
0x2f75   :  { %v2680_v35 = vrot.slane %v2675_v33, 2 }
0x2f76   :  { %v4959_v36 = vpop.f32.mrf.mxu1 }
0x2f77   :  { %v2682_v37 = vadd.f32 %v2680_v35, %v6274_v13 }
0x2f79   :  { %5318 = vtanh.f32 %v2682_v37  ;;  %v4480_v39 = vmul.f32 -1.442695, %v2682_v37 }
0x2f7b   :  { %5320 = vpow2.f32 %v4480_v39 }
0x2f86   :  { %v5319_v38 = vpop.eup %5318 }
0x2f87   :  { %2695 = vrot.lane.b32.xlu1 %v5319_v38, %s5721_s11 }
0x2f88   :  { %v5321_v40 = vpop.eup %5320 }
0x2f89   :  { %v2686_v23 = vadd.f32 1.0, %v5321_v40 }
0x2f8b   :  { %5322 = vrcp.f32 %v2686_v23 }
0x2f98   :  { %v5323_v41 = vpop.eup %5322 }
0x2f99   :  { %v2693_v48 = vmul.f32 %v5323_v41, %v2691_v47 }
0x2ff9   :  { %v2696_v43 = vpop.permute.xlu1 %2695 }
0x2ffa   :  { %v2698_v45 = vmul.f32 %v5323_v41, %v2696_v43 }
0x2ffc   :  { %2700 = vrot.lane.b32.xlu0 %v2698_v45, %s5722_s0 }
0x306e   :  { %v2701_v49 = vpop.permute.xlu0 %2700 }
0x306f   :  { %v2703_v34 = vadd.f32 %v2701_v49, %v2693_v48 }
0x3071   :  { %5324 = vtanh.f32 %v2703_v34  ;;  %v2795_v8 = vrot.slane %v2703_v34, 6 }
0x307e   :  { %v5325_v13 = vpop.eup %5324 }
0x307f   :  { %2706 = vrot.lane.b32.xlu1 %v5325_v13, %s5721_s11 }
0x30f1   :  { %v2707_v50 = vpop.permute.xlu1 %2706 }
0x30f2   :  { %v2709_v51 = vmul.f32 %v5323_v41, %v2707_v50 }
0x30f4   :  { %v2711_v52 = vrot.slane %v2709_v51, 6  ;;  %v6356_v53 = vsel %vm280_vm7, %v3144_v30, %v2709_v51 }
0x30f6   :  { %2712 = vrot.lane.b32.xlu0 %v2711_v52, %s5722_s0 }
0x3168   :  { %v2713_v54 = vpop.permute.xlu0 %2712 }
0x3169   :  { %4969 = vmatmul.mubr.msk.f32.vlgmr.msra.gmra.mxu0 %vm373_vm9, %v2713_v54 }
0x316a   :  { %4983 = vmatpush3.msra.mxu0 %v6242_v60  ;;  %4990 = vmatprep.mubr.msk.f32.mxu0 %vm5720_vm0, %v5719_v1 }
0x316b   :  { %4984 = vmatprep.subr.mxu0 %v5719_v1 }
0x316c   :  { %4985 = vmatpush3.msra.mxu0 %v6244_v61 }
0x316d   :  { %4986 = vmatprep.subr.mxu0 %v5719_v1 }
0x316e   :  { %4987 = vmatpush3.msra.mxu0 %v6250_v62 }
0x316f   :  { %4988 = vmatprep.subr.mxu0 %v5719_v1 }
0x3170   :  { %4989 = vmatpush3.msra.mxu0 %v6254_v0 }
0x3229   :  { %v2782_v55 = vpop.f32.mrf.mxu0 }
0x322a   :  { %v2786_v56 = vadd.f32 %v2782_v55, %v6272_v10 }
0x322b   :  { %v4970_v57 = vpop.f32.mrf.mxu0 }
0x322c   :  { %5326 = vtanh.f32 %v2786_v56  ;;  %v4482_v59 = vmul.f32 -1.442695, %v2786_v56 }
0x322e   :  { %5328 = vpow2.f32 %v4482_v59 }
0x3239   :  { %v5327_v58 = vpop.eup %5326 }
0x323a   :  { %2799 = vrot.lane.b32.xlu1 %v5327_v58, %s5721_s11 }
0x323b   :  { %v5329_v44 = vpop.eup %5328 }
0x323c   :  { %v2790_v3 = vadd.f32 1.0, %v5329_v44 }
0x323e   :  { %5330 = vrcp.f32 %v2790_v3 }
0x324b   :  { %v5331_v5 = vpop.eup %5330 }
0x324c   :  { %v2797_v9 = vmul.f32 %v5331_v5, %v2795_v8 }
0x32ac   :  { %v2800_v6 = vpop.permute.xlu1 %2799 }
0x32ad   :  { %v2802_v7 = vmul.f32 %v5331_v5, %v2800_v6 }
0x32af   :  { %2804 = vrot.lane.b32.xlu0 %v2802_v7, %s5722_s0 }
0x3321   :  { %v2805_v11 = vpop.permute.xlu0 %2804 }
0x3322   :  { %v2807_v22 = vadd.f32 %v2805_v11, %v2797_v9 }
0x3324   :  { %5332 = vtanh.f32 %v2807_v22 }
0x3331   :  { %v5333_v14 = vpop.eup %5332 }
0x3332   :  { %2810 = vrot.lane.b32.xlu1 %v5333_v14, %s5721_s11 }
0x33a4   :  { %v2811_v15 = vpop.permute.xlu1 %2810 }
0x33a5   :  { %v6373_v63 = vmul.f32 %v5331_v5, %v2811_v15 }
0x33a7   :  { %2815 = vrot.lane.b32.xlu0 %v6373_v63, %s5722_s0 }
0x3419   :  { %v2816_v16 = vpop.permute.xlu0 %2815 }
0x341a   :  { %4980 = vmatmul.mubr.msk.f32.vlgmr.msra.gmra.mxu1 %vm373_vm9, %v2816_v16  ;;  %v3137_v16 = vld [vmem:[#allocation17 + $0x18] sm:$0xff] }
0x341b   :  { %4994 = vmatpush3.msra.mxu1 %v6242_v60  ;;  %5001 = vmatprep.mubr.msk.f32.mxu1 %vm5720_vm0, %v5719_v1 }
0x341c   :  { %4995 = vmatprep.subr.mxu1 %v5719_v1  ;;  %5004 = vmatprep.subr.mxu0 %v3137_v16 }
0x341d   :  { %4996 = vmatpush3.msra.mxu1 %v6244_v61 }
0x341e   :  { %4997 = vmatprep.subr.mxu1 %v5719_v1 }
0x341f   :  { %4998 = vmatpush3.msra.mxu1 %v6250_v62 }
0x3420   :  { %4999 = vmatprep.subr.mxu1 %v5719_v1 }
0x3421   :  { %5000 = vmatpush3.msra.mxu1 %v6254_v0  ;;  %v2901_v0 = vrot.slane %v2807_v22, 6 }
0x3422   :  { %5015 = vmatprep.subr.mxu1 %v5719_v1 }
0x34da   :  { %v2885_v42 = vpop.f32.mrf.mxu1 }
0x34db   :  { %v2890_v24 = vrot.slane %v2885_v42, 6  ;;  %v3136_v42 = vld [vmem:[#allocation17 + $0x10] sm:$0xff] }
0x34dc   :  { %v4981_v60 = vpop.f32.mrf.mxu1 }
0x34dd   :  { %v2892_v17 = vadd.f32 %v2890_v24, %v6272_v10  ;;  %v6413_v24 = vld [vmem:[#allocation19 + $0x18] sm:$0xff]  ;;  %v6416_v60 = vld [vmem:[#allocation19 + $0x10] sm:$0xff] }
0x34df   :  { %5334 = vtanh.f32 %v2892_v17  ;;  %v4484_v61 = vmul.f32 -1.442695, %v2892_v17  ;;  %v3135_v17 = vld [vmem:[#allocation17 + $0x8] sm:$0xff] }
0x34e1   :  { %5336 = vpow2.f32 %v4484_v61 }
0x34ec   :  { %v5335_v18 = vpop.eup %5334 }
0x34ed   :  { %2905 = vrot.lane.b32.xlu1 %v5335_v18, %s5721_s11  ;;  %v3134_v18 = vld [vmem:[#allocation17] sm:$0xff] }
0x34ee   :  { %v5337_v26 = vpop.eup %5336 }
0x34ef   :  { %v2896_v19 = vadd.f32 1.0, %v5337_v26  ;;  %v6427_v26 = vld [vmem:[#allocation19] sm:$0xff] }
0x34f1   :  { %5338 = vrcp.f32 %v2896_v19 }
0x34fe   :  { %v5339_v62 = vpop.eup %5338 }
0x34ff   :  { %v2903_v2 = vmul.f32 %v5339_v62, %v2901_v0 }
0x355f   :  { %v2906_v20 = vpop.permute.xlu1 %2905 }
0x3560   :  { %v2908_v25 = vmul.f32 %v5339_v62, %v2906_v20 }
0x3562   :  { %2910 = vrot.lane.b32.xlu0 %v2908_v25, %s5722_s0 }
0x35d4   :  { %v2911_v27 = vpop.permute.xlu0 %2910 }
0x35d5   :  { %v2913_v4 = vadd.f32 %v2911_v27, %v2903_v2  ;;  %v4489_v27 = vld [vmem:[#allocation20] ss:$0 sm:$0xff] }
0x35d7   :  { %5340 = vtanh.f32 %v2913_v4  ;;  %v3008_v47 = vrot.slane %v2913_v4, 6 }
0x35e4   :  { %v5341_v28 = vpop.eup %5340 }
0x35e5   :  { %2916 = vrot.lane.b32.xlu1 %v5341_v28, %s5721_s11 }
0x3657   :  { %v2917_v29 = vpop.permute.xlu1 %2916 }
0x3658   :  { %v2919_v12 = vmul.f32 %v5339_v62, %v2917_v29 }
0x365a   :  { %v2921_v30 = vrot.slane %v2919_v12, 2  ;;  %v3146_v52 = vsel %vm276_vm5, %v6373_v63, %v2919_v12 }
0x365c   :  { %2922 = vrot.lane.b32.xlu0 %v2921_v30, %s5722_s0 }
0x36ce   :  { %v2923_v21 = vpop.permute.xlu0 %2922 }
0x36cf   :  { %4991 = vmatmul.mubr.msk.f32.vlgmr.msra.gmra.mxu0 %vm373_vm9, %v2923_v21 }
0x36d0   :  { %5005 = vmatpush3.msra.mxu0 %v3137_v16 }
0x36d1   :  { %5006 = vmatprep.subr.mxu0 %v3136_v42 }
0x36d2   :  { %5007 = vmatpush3.msra.mxu0 %v3136_v42 }
0x36d3   :  { %5008 = vmatprep.subr.mxu0 %v3135_v17 }
0x36d4   :  { %5009 = vmatpush3.msra.mxu0 %v3135_v17 }
0x36d5   :  { %5010 = vmatprep.subr.mxu0 %v3134_v18 }
0x36d6   :  { %5011 = vmatpush3.msra.mxu0 %v3134_v18 }
0x36d7   :  { %5026 = vmatprep.subr.mxu0 %v5719_v1 }
0x378f   :  { %v2992_v33 = vpop.f32.mrf.mxu0 }
0x3790   :  { %v2997_v35 = vrot.slane %v2992_v33, 4 }
0x3791   :  { %v4992_v36 = vpop.f32.mrf.mxu0 }
0x3792   :  { %v2999_v37 = vadd.f32 %v2997_v35, %v6272_v10 }
0x3794   :  { %5342 = vtanh.f32 %v2999_v37  ;;  %v4486_v39 = vmul.f32 -1.442695, %v2999_v37 }
0x3796   :  { %5344 = vpow2.f32 %v4486_v39 }
0x37a1   :  { %v5343_v38 = vpop.eup %5342 }
0x37a2   :  { %3012 = vrot.lane.b32.xlu1 %v5343_v38, %s5721_s11 }
0x37a3   :  { %v5345_v40 = vpop.eup %5344 }
0x37a4   :  { %v3003_v23 = vadd.f32 1.0, %v5345_v40 }
0x37a6   :  { %5346 = vrcp.f32 %v3003_v23 }
0x37b3   :  { %v5347_v41 = vpop.eup %5346 }
0x37b4   :  { %v3010_v48 = vmul.f32 %v5347_v41, %v3008_v47 }
0x3814   :  { %v3013_v43 = vpop.permute.xlu1 %3012 }
0x3815   :  { %v3015_v45 = vmul.f32 %v5347_v41, %v3013_v43 }
0x3817   :  { %3017 = vrot.lane.b32.xlu0 %v3015_v45, %s5722_s0 }
0x3889   :  { %v3018_v49 = vpop.permute.xlu0 %3017 }
0x388a   :  { %v3020_v34 = vadd.f32 %v3018_v49, %v3010_v48 }
0x388c   :  { %5348 = vtanh.f32 %v3020_v34  ;;  %v3115_v22 = vrot.slane %v3020_v34, 6 }
0x3899   :  { %v5349_v13 = vpop.eup %5348 }
0x389a   :  { %3023 = vrot.lane.b32.xlu1 %v5349_v13, %s5721_s11 }
0x390c   :  { %v3024_v50 = vpop.permute.xlu1 %3023 }
0x390d   :  { %v3026_v51 = vmul.f32 %v5347_v41, %v3024_v50 }
0x390f   :  { %v3028_v54 = vrot.slane %v3026_v51, 4  ;;  %v6401_v55 = vsel %vm278_vm6, %v3146_v52, %v3026_v51 }
0x3911   :  { %3029 = vrot.lane.b32.xlu0 %v3028_v54, %s5722_s0 }
0x3983   :  { %v3030_v56 = vpop.permute.xlu0 %3029 }
0x3984   :  { %5002 = vmatmul.mubr.msk.f32.vlgmr.msra.gmra.mxu1 %vm373_vm9, %v3030_v56 }
0x3985   :  { %5023 = vmatprep.mubr.msk.f32.mxu1 %vm5720_vm0, %v5719_v1  ;;  %5016 = vmatpush3.msra.mxu1 %v6413_v24 }
0x3986   :  { %5017 = vmatprep.subr.mxu1 %v5719_v1 }
0x3987   :  { %5018 = vmatpush3.msra.mxu1 %v6416_v60 }
0x3988   :  { %5019 = vmatprep.subr.mxu1 %v5719_v1 }
0x3a44   :  { %v3099_v57 = vpop.f32.mrf.mxu1 }
0x3a45   :  { %v3104_v58 = vrot.slane %v3099_v57, 2 }
0x3a46   :  { %v5003_v59 = vpop.f32.mrf.mxu1 }
0x3a47   :  { %v3106_v44 = vadd.f32 %v3104_v58, %v6272_v10 }
0x3a49   :  { %5350 = vtanh.f32 %v3106_v44  ;;  %v4488_v5 = vmul.f32 -1.442695, %v3106_v44 }
0x3a4b   :  { %5352 = vpow2.f32 %v4488_v5 }
0x3a56   :  { %v5351_v3 = vpop.eup %5350 }
0x3a57   :  { %3119 = vrot.lane.b32.xlu1 %v5351_v3, %s5721_s11 }
0x3a58   :  { %v5353_v6 = vpop.eup %5352 }
0x3a59   :  { %v3110_v7 = vadd.f32 1.0, %v5353_v6 }
0x3a5b   :  { %5354 = vrcp.f32 %v3110_v7 }
0x3a68   :  { %v5355_v8 = vpop.eup %5354 }
0x3a69   :  { %v3117_v14 = vmul.f32 %v5355_v8, %v3115_v22 }
0x3ac9   :  { %v3120_v9 = vpop.permute.xlu1 %3119 }
0x3aca   :  { %v3122_v11 = vmul.f32 %v5355_v8, %v3120_v9 }
0x3acc   :  { %3124 = vrot.lane.b32.xlu0 %v3122_v11, %s5722_s0 }
0x3ad0   :  { %3157 = vrot.lane.b32.xlu0 %v6356_v53, %s5722_s0  ;;  %v6419_v53 = vld [vmem:[#allocation19 + $0x8] sm:$0xff] }
0x3ad1   :  { %5020 = vmatpush3.msra.mxu1 %v6419_v53 }
0x3ad2   :  { %5021 = vmatprep.subr.mxu1 %v5719_v1 }
0x3ad3   :  { %5022 = vmatpush3.msra.mxu1 %v6427_v26 }
0x3ad4   :  { %5024 = vmatmul.mubr.f32.vlgmr.msra.gmra.mxu1 %v5719_v1  ;;  %5037 = vmatprep.subr.mxu1 %v5719_v1 }
0x3ad5   :  { %5038 = vmatpush3.msra.mxu1 %v6413_v24  ;;  %5045 = vmatprep.mubr.msk.f32.mxu1 %vm5720_vm0, %v5719_v1 }
0x3ad6   :  { %5039 = vmatprep.subr.mxu1 %v5719_v1 }
0x3ad7   :  { %5040 = vmatpush3.msra.mxu1 %v6416_v60 }
0x3ad8   :  { %5041 = vmatprep.subr.mxu1 %v5719_v1 }
0x3ad9   :  { %5042 = vmatpush3.msra.mxu1 %v6419_v53 }
0x3ada   :  { %5043 = vmatprep.subr.mxu1 %v5719_v1 }
0x3adb   :  { %5044 = vmatpush3.msra.mxu1 %v6427_v26 }
0x3adc   :  { %5059 = vmatprep.subr.mxu1 %v5719_v1 }
0x3b3e   :  { %v3125_v10 = vpop.permute.xlu0 %3124 }
0x3b3f   :  { %v3127_v15 = vadd.f32 %v3125_v10, %v3117_v14 }
0x3b41   :  { %5356 = vtanh.f32 %v3127_v15 }
0x3b42   :  { %v3158_v63 = vpop.permute.xlu0 %3157 }
0x3b43   :  { %5012 = vmatprep.mubr.msk.f32.mxu0 %vm373_vm9, %v3158_v63 }
0x3b4e   :  { %v5357_v61 = vpop.eup %5356 }
0x3b4f   :  { %3130 = vrot.lane.b32.xlu1 %v5357_v61, %s5721_s11 }
0x3b94   :  { %v3306_v0 = vpop.f32.mrf.mxu1 }
0x3b96   :  { %v5025_v2 = vpop.f32.mrf.mxu1 }
0x3bc1   :  { %v3131_v19 = vpop.permute.xlu1 %3130 }
0x3bc2   :  { %v3133_v62 = vmul.f32 %v5355_v8, %v3131_v19 }
0x3bc4   :  { %v3148_v20 = vsel %vm280_vm7, %v6401_v55, %v3133_v62 }
0x3bc5   :  { %3159 = vrot.lane.b32.xlu1 %v3148_v20, %s5722_s0 }
0x3c37   :  { %v3160_v25 = vpop.permute.xlu1 %3159 }
0x3c38   :  { %5013 = vmatmul.mubr.msk.f32.vlgmr.msra.gmra.mxu0 %vm373_vm9, %v3160_v25 }
0x3c39   :  { %5027 = vmatpush3.msra.mxu0 %v6413_v24  ;;  %5034 = vmatprep.mubr.msk.f32.mxu0 %vm5720_vm0, %v5719_v1 }
0x3c3a   :  { %5028 = vmatprep.subr.mxu0 %v5719_v1 }
0x3c3b   :  { %5029 = vmatpush3.msra.mxu0 %v6416_v60 }
0x3c3c   :  { %5030 = vmatprep.subr.mxu0 %v5719_v1 }
0x3c3d   :  { %5031 = vmatpush3.msra.mxu0 %v6419_v53 }
0x3c3e   :  { %5032 = vmatprep.subr.mxu0 %v5719_v1 }
0x3c3f   :  { %5033 = vmatpush3.msra.mxu0 %v6427_v26 }
0x3c40   :  { %5048 = vmatprep.subr.mxu0 %v5719_v1 }
0x3cf8   :  { %v5014_v4 = vpop.f32.mrf.mxu0 }
0x3cf9   :  { %v6456_v28 = vadd.f32 %v5014_v4, %v4489_v27 }
0x3cfa   :  { %v3231_v29 = vpop.f32.mrf.mxu0 }
0x3cfb   :  { %v6458_v12 = vadd.f32 %v4489_v27, %v3231_v29 }
0x3cfd   :  { %v3310_v30 = vadd.f32 %v3306_v0, %v6458_v12 }
0x3cff   :  { %5358 = vtanh.f32 %v3310_v30  ;;  %v4492_v33 = vmul.f32 -1.442695, %v3310_v30 }
0x3d01   :  { %5360 = vpow2.f32 %v4492_v33 }
0x3d0c   :  { %v5359_v21 = vpop.eup %5358 }
0x3d0d   :  { %3320 = vrot.lane.b32.xlu0 %v5359_v21, %s5721_s11 }
0x3d0e   :  { %v5361_v35 = vpop.eup %5360 }
0x3d0f   :  { %v3314_v36 = vadd.f32 1.0, %v5361_v35 }
0x3d11   :  { %5362 = vrcp.f32 %v3314_v36 }
0x3d1e   :  { %v5363_v37 = vpop.eup %5362 }
0x3d1f   :  { %v3318_v40 = vmul.f32 0.0, %v5363_v37 }
0x3d7f   :  { %v3321_v38 = vpop.permute.xlu0 %3320 }
0x3d80   :  { %v3323_v39 = vmul.f32 %v5363_v37, %v3321_v38 }
0x3d82   :  { %3325 = vrot.lane.b32.xlu1 %v3323_v39, %s5722_s0 }
0x3df4   :  { %v3326_v23 = vpop.permute.xlu1 %3325 }
0x3df5   :  { %v3328_v41 = vadd.f32 %v3326_v23, %v3318_v40 }
0x3df7   :  { %5364 = vtanh.f32 %v3328_v41  ;;  %v3422_v59 = vrot.slane %v3328_v41, 6 }
0x3e04   :  { %v5365_v43 = vpop.eup %5364 }
0x3e05   :  { %3331 = vrot.lane.b32.xlu0 %v5365_v43, %s5721_s11 }
0x3e77   :  { %v3332_v45 = vpop.permute.xlu0 %3331 }
0x3e78   :  { %v3334_v47 = vmul.f32 %v5363_v37, %v3332_v45 }
0x3e7a   :  { %3336 = vrot.lane.b32.xlu1 %v3334_v47, %s5722_s0 }
0x3eec   :  { %v3337_v48 = vpop.permute.xlu1 %3336 }
0x3eed   :  { %5035 = vmatmul.mubr.msk.f32.vlgmr.msra.gmra.mxu0 %vm373_vm9, %v3337_v48 }
0x3eee   :  { %5049 = vmatpush3.msra.mxu0 %v6413_v24  ;;  %5056 = vmatprep.mubr.msk.f32.mxu0 %vm5720_vm0, %v5719_v1 }
0x3eef   :  { %5050 = vmatprep.subr.mxu0 %v5719_v1 }
0x3ef0   :  { %5051 = vmatpush3.msra.mxu0 %v6416_v60 }
0x3ef1   :  { %5052 = vmatprep.subr.mxu0 %v5719_v1 }
0x3ef2   :  { %5053 = vmatpush3.msra.mxu0 %v6419_v53 }
0x3ef3   :  { %5054 = vmatprep.subr.mxu0 %v5719_v1 }
0x3ef4   :  { %5055 = vmatpush3.msra.mxu0 %v6427_v26 }
0x3ef5   :  { %5070 = vmatprep.subr.mxu0 %v5719_v1 }
0x3fad   :  { %v3406_v49 = vpop.f32.mrf.mxu0 }
0x3fae   :  { %v3411_v34 = vrot.slane %v3406_v49, 6 }
0x3faf   :  { %v5036_v13 = vpop.f32.mrf.mxu0 }
0x3fb0   :  { %v3413_v50 = vadd.f32 %v3411_v34, %v6458_v12 }
0x3fb2   :  { %5366 = vtanh.f32 %v3413_v50  ;;  %v4494_v52 = vmul.f32 -1.442695, %v3413_v50 }
0x3fb4   :  { %5368 = vpow2.f32 %v4494_v52 }
0x3fbf   :  { %v5367_v51 = vpop.eup %5366 }
0x3fc0   :  { %3426 = vrot.lane.b32.xlu0 %v5367_v51, %s5721_s11 }
0x3fc1   :  { %v5369_v54 = vpop.eup %5368 }
0x3fc2   :  { %v3417_v55 = vadd.f32 1.0, %v5369_v54 }
0x3fc4   :  { %5370 = vrcp.f32 %v3417_v55 }
0x3fd1   :  { %v5371_v56 = vpop.eup %5370 }
0x3fd2   :  { %v3424_v44 = vmul.f32 %v5371_v56, %v3422_v59 }
0x4032   :  { %v3427_v57 = vpop.permute.xlu0 %3426 }
0x4033   :  { %v3429_v58 = vmul.f32 %v5371_v56, %v3427_v57 }
0x4035   :  { %3431 = vrot.lane.b32.xlu1 %v3429_v58, %s5722_s0 }
0x40a7   :  { %v3432_v3 = vpop.permute.xlu1 %3431 }
0x40a8   :  { %v3434_v5 = vadd.f32 %v3432_v3, %v3424_v44 }
0x40aa   :  { %5372 = vtanh.f32 %v3434_v5  ;;  %v3529_v62 = vrot.slane %v3434_v5, 6 }
0x40b7   :  { %v5373_v6 = vpop.eup %5372 }
0x40b8   :  { %3437 = vrot.lane.b32.xlu0 %v5373_v6, %s5721_s11 }
0x412a   :  { %v3438_v7 = vpop.permute.xlu0 %3437 }
0x412b   :  { %v3440_v8 = vmul.f32 %v5371_v56, %v3438_v7 }
0x412d   :  { %v3442_v9 = vrot.slane %v3440_v8, 2 }
0x412f   :  { %3443 = vrot.lane.b32.xlu1 %v3442_v9, %s5722_s0 }
0x41a1   :  { %v3444_v11 = vpop.permute.xlu1 %3443 }
0x41a2   :  { %5046 = vmatmul.mubr.msk.f32.vlgmr.msra.gmra.mxu1 %vm373_vm9, %v3444_v11 }
0x41a3   :  { %5060 = vmatpush3.msra.mxu1 %v6413_v24  ;;  %5067 = vmatprep.mubr.msk.f32.mxu1 %vm5720_vm0, %v5719_v1 }
0x41a4   :  { %5061 = vmatprep.subr.mxu1 %v5719_v1 }
0x41a5   :  { %5062 = vmatpush3.msra.mxu1 %v6416_v60 }
0x41a6   :  { %5063 = vmatprep.subr.mxu1 %v5719_v1 }
0x41a7   :  { %5064 = vmatpush3.msra.mxu1 %v6419_v53 }
0x41a8   :  { %5065 = vmatprep.subr.mxu1 %v5719_v1 }
0x41a9   :  { %5066 = vmatpush3.msra.mxu1 %v6427_v26 }
0x41aa   :  { %5081 = vmatprep.subr.mxu1 %v5719_v1 }
0x4262   :  { %v3513_v22 = vpop.f32.mrf.mxu1 }
0x4263   :  { %v3518_v14 = vrot.slane %v3513_v22, 4 }
0x4264   :  { %v5047_v10 = vpop.f32.mrf.mxu1 }
0x4265   :  { %v3520_v15 = vadd.f32 %v3518_v14, %v6458_v12 }
0x4267   :  { %5374 = vtanh.f32 %v3520_v15  ;;  %v4496_v16 = vmul.f32 -1.442695, %v3520_v15 }
0x4269   :  { %5376 = vpow2.f32 %v4496_v16 }
0x4274   :  { %v5375_v63 = vpop.eup %5374 }
0x4275   :  { %3533 = vrot.lane.b32.xlu0 %v5375_v63, %s5721_s11 }
0x4276   :  { %v5377_v42 = vpop.eup %5376 }
0x4277   :  { %v3524_v17 = vadd.f32 1.0, %v5377_v42 }
0x4279   :  { %5378 = vrcp.f32 %v3524_v17 }
0x4286   :  { %v5379_v18 = vpop.eup %5378 }
0x4287   :  { %v3531_v20 = vmul.f32 %v5379_v18, %v3529_v62 }
0x42e7   :  { %v3534_v61 = vpop.permute.xlu0 %3533 }
0x42e8   :  { %v3536_v19 = vmul.f32 %v5379_v18, %v3534_v61 }
0x42ea   :  { %3538 = vrot.lane.b32.xlu1 %v3536_v19, %s5722_s0 }
0x435c   :  { %v3539_v25 = vpop.permute.xlu1 %3538 }
0x435d   :  { %v3541_v0 = vadd.f32 %v3539_v25, %v3531_v20 }
0x435f   :  { %5380 = vtanh.f32 %v3541_v0  ;;  %v3636_v45 = vrot.slane %v3541_v0, 6 }
0x436c   :  { %v5381_v2 = vpop.eup %5380 }
0x436d   :  { %3544 = vrot.lane.b32.xlu0 %v5381_v2, %s5721_s11 }
0x43df   :  { %v3545_v27 = vpop.permute.xlu0 %3544 }
0x43e0   :  { %v3547_v4 = vmul.f32 %v5379_v18, %v3545_v27 }
0x43e2   :  { %v3549_v29 = vrot.slane %v3547_v4, 4 }
0x43e4   :  { %3550 = vrot.lane.b32.xlu1 %v3549_v29, %s5722_s0 }
0x4456   :  { %v3551_v30 = vpop.permute.xlu1 %3550 }
0x4457   :  { %5057 = vmatmul.mubr.msk.f32.vlgmr.msra.gmra.mxu0 %vm373_vm9, %v3551_v30 }
0x4458   :  { %5071 = vmatpush3.msra.mxu0 %v6413_v24  ;;  %5078 = vmatprep.mubr.msk.f32.mxu0 %vm5720_vm0, %v5719_v1 }
0x4459   :  { %5072 = vmatprep.subr.mxu0 %v5719_v1 }
0x445a   :  { %5073 = vmatpush3.msra.mxu0 %v6416_v60 }
0x445b   :  { %5074 = vmatprep.subr.mxu0 %v5719_v1 }
0x445c   :  { %5075 = vmatpush3.msra.mxu0 %v6419_v53 }
0x445d   :  { %5076 = vmatprep.subr.mxu0 %v5719_v1 }
0x445e   :  { %5077 = vmatpush3.msra.mxu0 %v6427_v26 }
0x445f   :  { %5092 = vmatprep.subr.mxu0 %v5719_v1 }
0x4517   :  { %v3620_v21 = vpop.f32.mrf.mxu0 }
0x4518   :  { %v3625_v33 = vrot.slane %v3620_v21, 2 }
0x4519   :  { %v5058_v35 = vpop.f32.mrf.mxu0 }
0x451a   :  { %v3627_v36 = vadd.f32 %v3625_v33, %v6458_v12 }
0x451c   :  { %5382 = vtanh.f32 %v3627_v36  ;;  %v4498_v38 = vmul.f32 -1.442695, %v3627_v36 }
0x451e   :  { %5384 = vpow2.f32 %v4498_v38 }
0x4529   :  { %v5383_v37 = vpop.eup %5382 }
0x452a   :  { %3640 = vrot.lane.b32.xlu0 %v5383_v37, %s5721_s11 }
0x452b   :  { %v5385_v39 = vpop.eup %5384 }
0x452c   :  { %v3631_v40 = vadd.f32 1.0, %v5385_v39 }
0x452e   :  { %5386 = vrcp.f32 %v3631_v40 }
0x453b   :  { %v5387_v23 = vpop.eup %5386 }
0x453c   :  { %v3638_v47 = vmul.f32 %v5387_v23, %v3636_v45  ;;  %v2131_v45 = vrot.slane %v6314_v46, 2 }
0x459c   :  { %v3641_v41 = vpop.permute.xlu0 %3640 }
0x459d   :  { %v3643_v43 = vmul.f32 %v5387_v23, %v3641_v41 }
0x459f   :  { %3645 = vrot.lane.b32.xlu1 %v3643_v43, %s5722_s0 }
0x4611   :  { %v3646_v48 = vpop.permute.xlu1 %3645 }
0x4612   :  { %v3648_v49 = vadd.f32 %v3646_v48, %v3638_v47 }
0x4614   :  { %5388 = vtanh.f32 %v3648_v49  ;;  %v3740_v6 = vrot.slane %v3648_v49, 6 }
0x4621   :  { %v5389_v12 = vpop.eup %5388 }
0x4622   :  { %3651 = vrot.lane.b32.xlu0 %v5389_v12, %s5721_s11  ;;  %v2133_v12 = vadd.f32 %v2131_v45, %v6135_v32  ;;  %v2142_v32 = vrot.slane %v6282_v31, 6 }
0x4694   :  { %v3652_v34 = vpop.permute.xlu0 %3651 }
0x4695   :  { %v3654_v13 = vmul.f32 %v5387_v23, %v3652_v34 }
0x4697   :  { %v3656_v50 = vrot.slane %v3654_v13, 6 }
0x4699   :  { %3657 = vrot.lane.b32.xlu1 %v3656_v50, %s5722_s0  ;;  %v4470_v50 = vmul.f32 -1.442695, %v2133_v12 }
0x470b   :  { %v3658_v51 = vpop.permute.xlu1 %3657 }
0x470c   :  { %5068 = vmatmul.mubr.msk.f32.vlgmr.msra.gmra.mxu1 %vm373_vm9, %v3658_v51 }
0x470d   :  { %5082 = vmatpush3.msra.mxu1 %v6413_v24  ;;  %5089 = vmatprep.mubr.msk.f32.mxu1 %vm5720_vm0, %v5719_v1 }
0x470e   :  { %5083 = vmatprep.subr.mxu1 %v5719_v1 }
0x470f   :  { %5084 = vmatpush3.msra.mxu1 %v6416_v60 }
0x4710   :  { %5085 = vmatprep.subr.mxu1 %v5719_v1 }
0x4711   :  { %5086 = vmatpush3.msra.mxu1 %v6419_v53 }
0x4712   :  { %5087 = vmatprep.subr.mxu1 %v5719_v1 }
0x4713   :  { %5088 = vmatpush3.msra.mxu1 %v6427_v26 }
0x4714   :  { %5103 = vmatprep.subr.mxu1 %v5719_v1 }
0x47cc   :  { %v3727_v52 = vpop.f32.mrf.mxu1 }
0x47cd   :  { %v3731_v54 = vadd.f32 %v3727_v52, %v6456_v28 }
0x47ce   :  { %v5069_v55 = vpop.f32.mrf.mxu1 }
0x47cf   :  { %5390 = vtanh.f32 %v3731_v54  ;;  %v4500_v57 = vmul.f32 -1.442695, %v3731_v54 }
0x47d1   :  { %5392 = vpow2.f32 %v4500_v57 }
0x47dc   :  { %v5391_v56 = vpop.eup %5390 }
0x47dd   :  { %3744 = vrot.lane.b32.xlu0 %v5391_v56, %s5721_s11 }
0x47de   :  { %v5393_v58 = vpop.eup %5392 }
0x47df   :  { %v3735_v59 = vadd.f32 1.0, %v5393_v58 }
0x47e1   :  { %5394 = vrcp.f32 %v3735_v59 }
0x47ee   :  { %v5395_v44 = vpop.eup %5394 }
0x47ef   :  { %v3742_v7 = vmul.f32 %v5395_v44, %v3740_v6 }
0x484f   :  { %v3745_v3 = vpop.permute.xlu0 %3744 }
0x4850   :  { %v3747_v5 = vmul.f32 %v5395_v44, %v3745_v3 }
0x4852   :  { %3749 = vrot.lane.b32.xlu1 %v3747_v5, %s5722_s0 }
0x48c4   :  { %v3750_v8 = vpop.permute.xlu1 %3749 }
0x48c5   :  { %v3752_v9 = vadd.f32 %v3750_v8, %v3742_v7 }
0x48c7   :  { %5396 = vtanh.f32 %v3752_v9 }
0x48d4   :  { %v5397_v11 = vpop.eup %5396 }
0x48d5   :  { %3755 = vrot.lane.b32.xlu0 %v5397_v11, %s5721_s11 }
0x4947   :  { %v3756_v22 = vpop.permute.xlu0 %3755 }
0x4948   :  { %v3758_v14 = vmul.f32 %v5395_v44, %v3756_v22 }
0x494a   :  { %3760 = vrot.lane.b32.xlu1 %v3758_v14, %s5722_s0 }
0x49bc   :  { %v3761_v10 = vpop.permute.xlu1 %3760 }
0x49bd   :  { %5079 = vmatmul.mubr.msk.f32.vlgmr.msra.gmra.mxu0 %vm373_vm9, %v3761_v10 }
0x49be   :  { %5093 = vmatpush3.msra.mxu0 %v6413_v24  ;;  %5100 = vmatprep.mubr.msk.f32.mxu0 %vm5720_vm0, %v5719_v1 }
0x49bf   :  { %5094 = vmatprep.subr.mxu0 %v5719_v1 }
0x49c0   :  { %5095 = vmatpush3.msra.mxu0 %v6416_v60 }
0x49c1   :  { %5096 = vmatprep.subr.mxu0 %v5719_v1 }
0x49c2   :  { %5097 = vmatpush3.msra.mxu0 %v6419_v53 }
0x49c3   :  { %5098 = vmatprep.subr.mxu0 %v5719_v1 }
0x49c4   :  { %5099 = vmatpush3.msra.mxu0 %v6427_v26  ;;  %v3846_v26 = vrot.slane %v3752_v9, 6 }
0x49c5   :  { %5114 = vmatprep.subr.mxu0 %v5719_v1 }
0x4a7d   :  { %v3830_v15 = vpop.f32.mrf.mxu0 }
0x4a7e   :  { %v3835_v63 = vrot.slane %v3830_v15, 6 }
0x4a7f   :  { %v5080_v24 = vpop.f32.mrf.mxu0 }
0x4a80   :  { %v3837_v16 = vadd.f32 %v3835_v63, %v6456_v28 }
0x4a82   :  { %5398 = vtanh.f32 %v3837_v16  ;;  %v4502_v60 = vmul.f32 -1.442695, %v3837_v16  ;;  %v4082_v16 = vld [vmem:[%s6673_s14 + $0x18] sm:$0xff] }
0x4a84   :  { %5400 = vpow2.f32 %v4502_v60 }
0x4a8f   :  { %v5399_v42 = vpop.eup %5398 }
0x4a90   :  { %3850 = vrot.lane.b32.xlu0 %v5399_v42, %s5721_s11 }
0x4a91   :  { %v5401_v17 = vpop.eup %5400 }
0x4a92   :  { %v3841_v18 = vadd.f32 1.0, %v5401_v17 }
0x4a94   :  { %5402 = vrcp.f32 %v3841_v18 }
0x4aa1   :  { %v5403_v53 = vpop.eup %5402 }
0x4aa2   :  { %v3848_v62 = vmul.f32 %v5403_v53, %v3846_v26  ;;  %v4085_v26 = vld [vmem:[%s6673_s14 + $0x30] sm:$0xff] }
0x4b02   :  { %v3851_v61 = vpop.permute.xlu0 %3850 }
0x4b03   :  { %v3853_v19 = vmul.f32 %v5403_v53, %v3851_v61  ;;  %v4079_v61 = vld [vmem:[%s6673_s14] sm:$0xff] }
0x4b05   :  { %3855 = vrot.lane.b32.xlu1 %v3853_v19, %s5722_s0  ;;  %v4086_v19 = vld [vmem:[%s6673_s14 + $0x38] sm:$0xff] }
0x4b77   :  { %v3856_v20 = vpop.permute.xlu1 %3855 }
0x4b78   :  { %v3858_v25 = vadd.f32 %v3856_v20, %v3848_v62  ;;  %v4084_v62 = vld [vmem:[%s6673_s14 + $0x28] sm:$0xff] }
0x4b7a   :  { %5404 = vtanh.f32 %v3858_v25  ;;  %v3953_v43 = vrot.slane %v3858_v25, 6  ;;  %v4083_v25 = vld [vmem:[%s6673_s14 + $0x20] sm:$0xff] }
0x4b87   :  { %v5405_v0 = vpop.eup %5404 }
0x4b88   :  { %3861 = vrot.lane.b32.xlu0 %v5405_v0, %s5721_s11 }
0x4bfa   :  { %v3862_v2 = vpop.permute.xlu0 %3861 }
0x4bfb   :  { %v3864_v27 = vmul.f32 %v5403_v53, %v3862_v2  ;;  %v4080_v53 = vld [vmem:[%s6673_s14 + $0x8] sm:$0xff] }
0x4bfd   :  { %v3866_v4 = vrot.slane %v3864_v27, 2 }
0x4bff   :  { %3867 = vrot.lane.b32.xlu1 %v3866_v4, %s5722_s0 }
0x4c71   :  { %v3868_v29 = vpop.permute.xlu1 %3867 }
0x4c72   :  { %5090 = vmatmul.mubr.msk.f32.vlgmr.msra.gmra.mxu1 %vm373_vm9, %v3868_v29 }
0x4c73   :  { %5111 = vmatprep.mubr.msk.f32.mxu1 %vm5720_vm0, %v5719_v1  ;;  %5104 = vmatpush3.msra.mxu1 %v4086_v19 }
0x4c74   :  { %5105 = vmatprep.subr.mxu1 %v5719_v1 }
0x4c75   :  { %5106 = vmatpush3.msra.mxu1 %v4085_v26 }
0x4c76   :  { %5107 = vmatprep.subr.mxu1 %v5719_v1 }
0x4c77   :  { %5108 = vmatpush3.msra.mxu1 %v4084_v62 }
0x4c78   :  { %5109 = vmatprep.subr.mxu1 %v5719_v1 }
0x4c79   :  { %5110 = vmatpush3.msra.mxu1 %v4083_v25 }
0x4c7a   :  { %5125 = vmatprep.subr.mxu1 %v5719_v1 }
0x4d32   :  { %v3937_v30 = vpop.f32.mrf.mxu1 }
0x4d33   :  { %v3942_v21 = vrot.slane %v3937_v30, 4 }
0x4d34   :  { %v5091_v33 = vpop.f32.mrf.mxu1 }
0x4d35   :  { %v3944_v35 = vadd.f32 %v3942_v21, %v6456_v28  ;;  %v4255_v33 = vld [vmem:[%s6675_s16 + $0x38] sm:$0xff] }
0x4d37   :  { %5406 = vtanh.f32 %v3944_v35  ;;  %v4504_v37 = vmul.f32 -1.442695, %v3944_v35 }
0x4d39   :  { %5408 = vpow2.f32 %v4504_v37  ;;  %v4253_v37 = vld [vmem:[%s6675_s16 + $0x28] sm:$0xff] }
0x4d44   :  { %v5407_v36 = vpop.eup %5406 }
0x4d45   :  { %3957 = vrot.lane.b32.xlu0 %v5407_v36, %s5721_s11  ;;  %v4254_v36 = vld [vmem:[%s6675_s16 + $0x30] sm:$0xff] }
0x4d46   :  { %v5409_v38 = vpop.eup %5408 }
0x4d47   :  { %v3948_v39 = vadd.f32 1.0, %v5409_v38  ;;  %v4252_v38 = vld [vmem:[%s6675_s16 + $0x20] sm:$0xff] }
0x4d49   :  { %5410 = vrcp.f32 %v3948_v39  ;;  %v4251_v39 = vld [vmem:[%s6675_s16 + $0x18] sm:$0xff] }
0x4d56   :  { %v5411_v40 = vpop.eup %5410 }
0x4d57   :  { %v3955_v47 = vmul.f32 %v5411_v40, %v3953_v43  ;;  %v4341_v43 = vld [vmem:[%s6677_s18 + $0x18] sm:$0xff] }
0x4db7   :  { %v3958_v23 = vpop.permute.xlu0 %3957 }
0x4db8   :  { %v3960_v41 = vmul.f32 %v5411_v40, %v3958_v23  ;;  %v4249_v23 = vld [vmem:[%s6675_s16 + $0x8] sm:$0xff] }
0x4dba   :  { %3962 = vrot.lane.b32.xlu1 %v3960_v41, %s5722_s0  ;;  %v4248_v41 = vld [vmem:[%s6675_s16] sm:$0xff] }
0x4e2c   :  { %v3963_v48 = vpop.permute.xlu1 %3962 }
0x4e2d   :  { %v3965_v49 = vadd.f32 %v3963_v48, %v3955_v47 }
0x4e2f   :  { %5412 = vtanh.f32 %v3965_v49  ;;  %v4060_v42 = vrot.slane %v3965_v49, 6  ;;  %v4509_v49 = vld [vmem:[#allocation22] ss:$0 sm:$0xff] }
0x4e30   :  { %5414 = vtanh.f32 %v2133_v12 }
0x4e31   :  { %5416 = vpow2.f32 %v4470_v50 }
0x4e3c   :  { %v5413_v34 = vpop.eup %5412 }
0x4e3d   :  { %3968 = vrot.lane.b32.xlu0 %v5413_v34, %s5721_s11  ;;  %v5415_v13 = vpop.eup %5414 }
0x4e3e   :  { %v5417_v51 = vpop.eup %5416 }
0x4e3f   :  { %v2137_v52 = vadd.f32 1.0, %v5417_v51  ;;  %v4340_v51 = vld [vmem:[%s6677_s18 + $0x10] sm:$0xff] }
0x4e41   :  { %2146 = vrot.lane.b32.xlu0 %v5415_v13, %s5721_s11  ;;  %5418 = vrcp.f32 %v2137_v52  ;;  %v4339_v52 = vld [vmem:[%s6677_s18 + $0x8] sm:$0xff] }
0x4e4e   :  { %v5419_v56 = vpop.eup %5418 }
0x4e4f   :  { %v2144_v44 = vmul.f32 %v5419_v56, %v2142_v32  ;;  %v4512_v32 = vld [vmem:[#allocation2] ss:$0 sm:$0xff] }
0x4eaf   :  { %v3969_v54 = vpop.permute.xlu0 %3968 }
0x4eb0   :  { %v3971_v46 = vmul.f32 %v5411_v40, %v3969_v54  ;;  %v4250_v40 = vld [vmem:[%s6675_s16 + $0x10] sm:$0xff]  ;;  %v4338_v54 = vld [vmem:[%s6677_s18] sm:$0xff] }
0x4eb2   :  { %v3973_v55 = vrot.slane %v3971_v46, 4  ;;  %v4510_v46 = vld [vmem:[%s6676_s17] ss:$0 sm:$0xff] }
0x4eb3   :  { %v2147_v57 = vpop.permute.xlu0 %2146 }
0x4eb4   :  { %v2149_v58 = vmul.f32 %v5419_v56, %v2147_v57  ;;  %3974 = vrot.lane.b32.xlu1 %v3973_v55, %s5722_s0 }
0x4eb6   :  { %2151 = vrot.lane.b32.xlu0 %v2149_v58, %s5722_s0 }
0x4f26   :  { %v3975_v59 = vpop.permute.xlu1 %3974 }
0x4f27   :  { %5101 = vmatmul.mubr.msk.f32.vlgmr.msra.gmra.mxu0 %vm373_vm9, %v3975_v59 }
0x4f28   :  { %v2152_v3 = vpop.permute.xlu0 %2151  ;;  %5122 = vmatprep.mubr.msk.f32.mxu0 %vm5720_vm0, %v5719_v1  ;;  %5115 = vmatpush3.msra.mxu0 %v4082_v16 }
0x4f29   :  { %v2154_v5 = vadd.f32 %v2152_v3, %v2144_v44  ;;  %5116 = vmatprep.subr.mxu0 %v5719_v1 }
0x4f2b   :  { %5420 = vtanh.f32 %v2154_v5 }
0x4f38   :  { %v5421_v6 = vpop.eup %5420 }
0x4f39   :  { %2157 = vrot.lane.b32.xlu0 %v5421_v6, %s5721_s11 }
0x4fab   :  { %v2158_v20 = vpop.permute.xlu0 %2157 }
0x4fac   :  { %v2160_v0 = vmul.f32 %v5419_v56, %v2158_v20 }
0x4fae   :  { %v4164_v27 = vrot.slane %v2160_v0, 6 }
0x4fe7   :  { %v4044_v7 = vpop.f32.mrf.mxu0 }
0x4fe8   :  { %v4049_v8 = vrot.slane %v4044_v7, 2 }
0x4fe9   :  { %v5102_v9 = vpop.f32.mrf.mxu0 }
0x4fea   :  { %v4051_v11 = vadd.f32 %v4049_v8, %v6456_v28  ;;  %v4081_v28 = vld [vmem:[%s6673_s14 + $0x10] sm:$0xff] }
0x4feb   :  { %5117 = vmatpush3.msra.mxu0 %v4081_v28 }
0x4fec   :  { %5422 = vtanh.f32 %v4051_v11  ;;  %v4506_v22 = vmul.f32 -1.442695, %v4051_v11  ;;  %5118 = vmatprep.subr.mxu0 %v5719_v1 }
0x4fed   :  { %5119 = vmatpush3.msra.mxu0 %v4080_v53 }
0x4fee   :  { %5424 = vpow2.f32 %v4506_v22  ;;  %5120 = vmatprep.subr.mxu0 %v5719_v1 }
0x4fef   :  { %5121 = vmatpush3.msra.mxu0 %v4079_v61 }
0x4ff0   :  { %5144 = vmatprep.subr.mxu0 %v5719_v1 }
0x4ff9   :  { %v5423_v31 = vpop.eup %5422 }
0x4ffa   :  { %4064 = vrot.lane.b32.xlu1 %v5423_v31, %s5721_s11 }
0x4ffb   :  { %v5425_v14 = vpop.eup %5424 }
0x4ffc   :  { %v4055_v10 = vadd.f32 1.0, %v5425_v14 }
0x4ffe   :  { %5426 = vrcp.f32 %v4055_v10 }
0x500b   :  { %v5427_v15 = vpop.eup %5426 }
0x500c   :  { %v4062_v60 = vmul.f32 %v5427_v15, %v4060_v42 }
0x506c   :  { %v4065_v63 = vpop.permute.xlu1 %4064 }
0x506d   :  { %v4067_v24 = vmul.f32 %v5427_v15, %v4065_v63 }
0x506f   :  { %4069 = vrot.lane.b32.xlu1 %v4067_v24, %s5722_s0 }
0x50e1   :  { %v4070_v17 = vpop.permute.xlu1 %4069 }
0x50e2   :  { %v4072_v18 = vadd.f32 %v4070_v17, %v4062_v60 }
0x50e4   :  { %5428 = vtanh.f32 %v4072_v18 }
0x50f1   :  { %v5429_v2 = vpop.eup %5428 }
0x50f2   :  { %4075 = vrot.lane.b32.xlu1 %v5429_v2, %s5721_s11 }
0x50f6   :  { %4165 = vrot.lane.b32.xlu1 %v4164_v27, %s5722_s0 }
0x5164   :  { %v4076_v4 = vpop.permute.xlu1 %4075 }
0x5165   :  { %v4078_v29 = vmul.f32 %v5427_v15, %v4076_v4 }
0x5167   :  { %v4088_v30 = vrot.slane %v4078_v29, 6 }
0x5168   :  { %v4166_v21 = vpop.permute.xlu1 %4165 }
0x5169   :  { %4089 = vrot.lane.b32.xlu0 %v4088_v30, %s5722_s0  ;;  %5123 = vmatmul.mubr.msk.f32.vlgmr.msra.gmra.mxu0 %vm373_vm9, %v4166_v21 }
0x516a   :  { %5152 = vmatprep.mubr.msk.f32.mxu0 %vm5720_vm0, %v5719_v1  ;;  %5145 = vmatpush3.msra.mxu0 %v4341_v43 }
0x516b   :  { %5146 = vmatprep.subr.mxu0 %v5719_v1 }
0x516c   :  { %5147 = vmatpush3.msra.mxu0 %v4340_v51 }
0x516d   :  { %5148 = vmatprep.subr.mxu0 %v5719_v1 }
0x516e   :  { %5149 = vmatpush3.msra.mxu0 %v4339_v52 }
0x516f   :  { %5150 = vmatprep.subr.mxu0 %v5719_v1 }
0x5170   :  { %5151 = vmatpush3.msra.mxu0 %v4338_v54 }
0x51db   :  { %v4090_v35 = vpop.permute.xlu0 %4089 }
0x51dc   :  { %5112 = vmatmul.mubr.msk.f32.vlgmr.msra.gmra.mxu1 %vm373_vm9, %v4090_v35 }
0x51dd   :  { %5126 = vmatpush3.msra.mxu1 %v4255_v33  ;;  %5141 = vmatprep.mubr.msk.f32.mxu1 %vm5720_vm0, %v5719_v1 }
0x51de   :  { %5127 = vmatprep.subr.mxu1 %v5719_v1 }
0x51df   :  { %5128 = vmatpush3.msra.mxu1 %v4254_v36 }
0x51e0   :  { %5129 = vmatprep.subr.mxu1 %v5719_v1 }
0x51e1   :  { %5130 = vmatpush3.msra.mxu1 %v4253_v37 }
0x51e2   :  { %5131 = vmatprep.subr.mxu1 %v5719_v1 }
0x51e3   :  { %5132 = vmatpush3.msra.mxu1 %v4252_v38 }
0x51e4   :  { %5133 = vmatprep.subr.mxu1 %v5719_v1 }
0x51e5   :  { %5134 = vmatpush3.msra.mxu1 %v4251_v39 }
0x51e6   :  { %5135 = vmatprep.subr.mxu1 %v5719_v1 }
0x51e7   :  { %5136 = vmatpush3.msra.mxu1 %v4250_v40 }
0x51e8   :  { %5137 = vmatprep.subr.mxu1 %v5719_v1 }
0x51e9   :  { %5138 = vmatpush3.msra.mxu1 %v4249_v23 }
0x51ea   :  { %5139 = vmatprep.subr.mxu1 %v5719_v1 }
0x51eb   :  { %5140 = vmatpush3.msra.mxu1 %v4248_v41 }
0x5229   :  { %v4235_v45 = vpop.f32.mrf.mxu0 }
0x522b   :  { %v5124_v47 = vpop.f32.mrf.mxu0 }
0x529c   :  { %v4159_v48 = vpop.f32.mrf.mxu1 }
0x529d   :  { %v4236_v12 = vadd.f32 %v4235_v45, %v4159_v48 }
0x529e   :  { %v5113_v34 = vpop.f32.mrf.mxu1 }
0x529f   :  { %v4246_v13 = vadd.f32 %v4509_v49, %v4236_v12 }
0x52a1   :  { %v4247_v50 = vmax.f32 %v4246_v13, 0.0 }
0x52a3   :  { %5142 = vmatmul.mubr.msk.f32.vlgmr.msra.gmra.mxu1 %vm4263_vm11, %v4247_v50 }
0x5363   :  { %v4333_v55 = vpop.f32.mrf.mxu1 }
0x5364   :  { %v4334_v56 = vadd.f32 %v4510_v46, %v4333_v55 }
0x5365   :  { %v5143_v57 = vpop.f32.mrf.mxu1 }
0x5366   :  { %v4337_v58 = vmax.f32 %v4334_v56, 0.0 }
0x5368   :  { %5153 = vmatmul.mubr.msk.f32.vlgmr.msra.gmra.mxu0 %vm373_vm9, %v4337_v58 }
0x5428   :  { %v4418_v59 = vpop.f32.mrf.mxu0 }
0x5429   :  { %v4419_v44 = vadd.f32 %v4512_v32, %v4418_v59 }
0x542a   :  { %v5154_v1 = vpop.f32.mrf.mxu0 }
0x542b   :  { %4423 = vst.msk [vmem:[%s6679_s20] sm:$0x3] %vm4422_vm12, %v4419_v44 }
0x542c   :  { %4428 = vsyncpa [#allocation4], 1 }
0x542d   :  { %4429 = vsyncpa [#allocation6], 1 }
0x542e   :  { %4430 = vsyncpa [#allocation9], 1 }
0x542f   :  { %4431 = vsyncpa [#allocation12], 1 }
0x5430   :  { %4432 = vsyncpa [#allocation15], 1 }
0x5431   :  { %4433 = vsyncpa [#allocation18], 1 }
0x5432   :  { %4434 = vsyncpa [#allocation21], 1 }

</bundles_post_ra>
